<compile_context>
chip_gen: v5e
topology: v5e:2x2
jax: 0.10.0
libtpu: 0.0.40
codegen_flags: <defaults>
</compile_context>

<pallas_src>
import functools

import jax
import jax.numpy as jnp
from jax.experimental import pallas as pl
from jax.experimental.pallas import tpu as pltpu


# ----------------------------- Pallas kernel ---------------------------------
def _oab_kernel(x_ref, proxy_ref,
                w1p_ref, b1p_ref, w2p_ref, b2p_ref,
                wkvT_ref, bkvT_ref, w2oT_ref, b2oT_ref,
                wu_ref, bu_ref,
                out_ref, *, key_channels, num_objects):
    nb, cin, hw = x_ref.shape       # block: (batches_per_step, Cin, HW)
    mp = proxy_ref.shape[-1]        # padded object count
    kc = key_channels

    def cbr(a, w, b):               # 1x1 conv + folded BN + ReLU
        y = jnp.dot(a, w, preferred_element_type=jnp.float32)
        return jnp.maximum(y + b, 0.0)

    # ---- pixel path: pixels onto the sublane axis, batch fused ---------------
    # in-VMEM transpose of each (Cin, HW) tile; stack batches along sublanes.
    x2d = jnp.concatenate([x_ref[b].T for b in range(nb)], axis=0)   # (nb*HW, Cin)
    q1 = cbr(x2d, w1p_ref[...], b1p_ref[...])                        # (nb*HW, Kc)
    query = cbr(q1, w2p_ref[...], b2p_ref[...])                      # (nb*HW, Kc)

    # ---- attention, per batch element (M is tiny) -----------------------------
    inv_sqrt = kc ** -0.5
    if mp > num_objects:            # mask the padded object columns
        col = jax.lax.broadcasted_iota(jnp.int32, (hw, mp), 1)
        pad_mask = col >= num_objects

    ctx_list = []
    for b in range(nb):             # static unroll; nb is 1 or N (tiny)
        proxy_b = proxy_ref[b]                                       # (Cin, Mp) native NCHW
        # f_object layer-1 and f_down fused: one (2Kc, Cin) @ (Cin, Mp) matmul
        kvT = jnp.maximum(
            jnp.dot(wkvT_ref[...], proxy_b, preferred_element_type=jnp.float32)
            + bkvT_ref[...], 0.0)                                    # (2Kc, Mp)
        keyT = jnp.maximum(
            jnp.dot(w2oT_ref[...], kvT[:kc], preferred_element_type=jnp.float32)
            + b2oT_ref[...], 0.0)                                    # (Kc, Mp)
        valT = kvT[kc:]                                              # (Kc, Mp)

        q_b = query[b * hw:(b + 1) * hw]                             # (HW, Kc) static slice
        sim = jnp.dot(q_b, keyT, preferred_element_type=jnp.float32) * inv_sqrt
        if mp > num_objects:
            sim = jnp.where(pad_mask, jnp.float32(-1e30), sim)
        sim = sim - jnp.max(sim, axis=-1, keepdims=True)
        p = jnp.exp(sim)
        denom = jnp.sum(p, axis=-1, keepdims=True)
        attn = p * pl.reciprocal(denom, approx=True)                 # (HW, Mp)

        # context_b = attn @ value  (value = valT^T): contract over the object axis
        ctx_b = jnp.einsum('qm,km->qk', attn, valT,
                           preferred_element_type=jnp.float32)       # (HW, Kc)
        ctx_list.append(ctx_b)

    ctx = ctx_list[0] if nb == 1 else jnp.concatenate(ctx_list, axis=0)  # (nb*HW, Kc)

    # ---- f_up back to Cin (batch fused), write back in native NCHW ------------
    out2d = cbr(ctx, wu_ref[...], bu_ref[...])                       # (nb*HW, Cin)
    for b in range(nb):
        out_ref[b] = out2d[b * hw:(b + 1) * hw].T.astype(out_ref.dtype)


# ------------------------------ wrapper ---------------------------------------
def object_attention_block(x_nchw, proxy, params, *, key_channels,
                           batches_per_step=None):
    """x_nchw: (N, Cin, H, W); proxy: (N, Cin, M).  Returns (N, Cin, H, W).

    batches_per_step: batch elements fused per grid step.  Default = N
    (single grid step; best on v5e/v6e, one TensorCore).  Pass 1 on v7x to
    megacore-shard the batch axis over the two TensorCores.
    """
    N, Cin, H, W = x_nchw.shape
    M = proxy.shape[-1]
    HW = H * W
    Kc = key_channels
    Mp = max(M, 8)                                # pad object axis to 8 lanes

    nb = N if batches_per_step is None else batches_per_step
    assert N % nb == 0
    num_steps = N // nb

    # native layouts: NCHW -> (N, Cin, HW) is a free reshape; proxy only padded.
    x_flat = x_nchw.reshape(N, Cin, HW)
    proxy_p = jnp.pad(proxy, ((0, 0), (0, 0), (0, Mp - M))) if Mp != M else proxy

    (w1p, b1p, w2p, b2p, w1o, b1o, w2o, b2o, wd, bd, wu, bu) = params

    # Fuse f_object layer-1 + f_down (shared proxy LHS) into one matrix and
    # pre-transpose the proxy-path weights so the kernel consumes proxy as-is.
    wkvT = jnp.concatenate([w1o, wd], axis=1).T   # (2Kc, Cin)
    bkvT = jnp.concatenate([b1o, bd], axis=1).T   # (2Kc, 1)
    w2oT = w2o.T                                  # (Kc, Kc)
    b2oT = b2o.T                                  # (Kc, 1)

    def batch_spec(rows, cols):
        return pl.BlockSpec((nb, rows, cols), lambda s: (s, 0, 0))

    def full_spec(arr):
        return pl.BlockSpec(arr.shape, lambda s: (0,) * arr.ndim)

    kernel = functools.partial(_oab_kernel, key_channels=Kc, num_objects=M)

    flops = int(
        2 * N * HW * Cin * Kc            # f_pixel layer 1
        + 2 * N * HW * Kc * Kc           # f_pixel layer 2
        + 2 * N * Mp * Cin * (2 * Kc)    # fused f_object-1 / f_down
        + 2 * N * Mp * Kc * Kc           # f_object layer 2
        + 2 * N * HW * Kc * Mp           # sim
        + 2 * N * HW * Mp * Kc           # context
        + 2 * N * HW * Kc * Cin)         # f_up
    weight_bytes = 4 * int(w1p.size + b1p.size + w2p.size + b2p.size +
                           wkvT.size + bkvT.size + w2oT.size + b2oT.size +
                           wu.size + bu.size)
    bytes_accessed = int(4 * (x_flat.size + proxy_p.size + N * HW * Cin)
                         + num_steps * weight_bytes)

    out_flat = pl.pallas_call(
        kernel,
        out_shape=jax.ShapeDtypeStruct((N, Cin, HW), jnp.float32),
        grid_spec=pltpu.PrefetchScalarGridSpec(
            num_scalar_prefetch=0,
            grid=(num_steps,),
            in_specs=[
                batch_spec(Cin, HW),                 # x, native NCHW (HW flattened)
                batch_spec(Cin, Mp),                 # proxy, native layout (padded)
                full_spec(w1p), full_spec(b1p),
                full_spec(w2p), full_spec(b2p),
                full_spec(wkvT), full_spec(bkvT),
                full_spec(w2oT), full_spec(b2oT),
                full_spec(wu), full_spec(bu),
            ],
            out_specs=batch_spec(Cin, HW),
        ),
        compiler_params=pltpu.CompilerParams(
            dimension_semantics=("parallel",)),
        cost_estimate=pl.CostEstimate(
            flops=flops,
            transcendentals=int(N * HW * (Mp + 1)),
            bytes_accessed=bytes_accessed),
    )(x_flat, proxy_p, w1p, b1p, w2p, b2p, wkvT, bkvT, w2oT, b2oT, wu, bu)

    return out_flat.reshape(N, Cin, H, W)


# --------------------- deterministic parameter construction -------------------
def _fold_bn(w_mat, gamma, beta, mean, var, eps=1e-5):
    """Fold inference-mode BatchNorm into a (Cin_layer, Cout_layer) matmul weight."""
    scale = gamma / jnp.sqrt(var + eps)
    w_eff = w_mat * scale[None, :]
    b_eff = (beta - mean * scale)[None, :]
    return w_eff.astype(jnp.float32), b_eff.astype(jnp.float32)


def make_params(key, in_channels, key_channels):
    def conv_bn(k, cin, cout):
        kw_, kg, kb, km, kv = jax.random.split(k, 5)
        w = jax.random.normal(kw_, (cin, cout), jnp.float32) * 0.05
        gamma = 1.0 + 0.1 * jax.random.normal(kg, (cout,), jnp.float32)
        beta = 0.1 * jax.random.normal(kb, (cout,), jnp.float32)
        mean = 0.05 * jax.random.normal(km, (cout,), jnp.float32)
        var = jnp.abs(1.0 + 0.1 * jax.random.normal(kv, (cout,), jnp.float32))
        return _fold_bn(w, gamma, beta, mean, var)

    ks = jax.random.split(key, 6)
    w1p, b1p = conv_bn(ks[0], in_channels, key_channels)   # f_pixel layer 1
    w2p, b2p = conv_bn(ks[1], key_channels, key_channels)  # f_pixel layer 2
    w1o, b1o = conv_bn(ks[2], in_channels, key_channels)   # f_object layer 1
    w2o, b2o = conv_bn(ks[3], key_channels, key_channels)  # f_object layer 2
    wd, bd = conv_bn(ks[4], in_channels, key_channels)     # f_down
    wu, bu = conv_bn(ks[5], key_channels, in_channels)     # f_up
    return (w1p, b1p, w2p, b2p, w1o, b1o, w2o, b2o, wd, bd, wu, bu)


# ------------------------------ pure-JAX reference ----------------------------
def reference(x_nchw, proxy, params, key_channels):
    N, Cin, H, W = x_nchw.shape
    (w1p, b1p, w2p, b2p, w1o, b1o, w2o, b2o, wd, bd, wu, bu) = params
    x = jnp.transpose(x_nchw, (0, 2, 3, 1)).reshape(N, H * W, Cin)
    pr = jnp.transpose(proxy, (0, 2, 1))

    cbr = lambda a, w, b: jnp.maximum(a @ w + b, 0.0)
    query = cbr(cbr(x, w1p, b1p), w2p, b2p)
    key = cbr(cbr(pr, w1o, b1o), w2o, b2o)
    value = cbr(pr, wd, bd)
    sim = jnp.einsum('nqc,nkc->nqk', query, key) * (key_channels ** -0.5)
    sim = jax.nn.softmax(sim, axis=-1)
    ctx = jnp.einsum('nqk,nkc->nqc', sim, value)
    out = cbr(ctx, wu, bu)
    return jnp.transpose(out.reshape(N, H, W, Cin), (0, 3, 1, 2))


# ----------------------------------- main --------------------------------------
if __name__ == "__main__":
    # forward() hardcodes proxy.reshape(N, 256, 6, 1) => in_channels=256, 6 object regions
    N, Cin, H, W = 2, 256, 8, 8
    Kc, M = 64, 6

    root = jax.random.PRNGKey(0)
    kx, kp, kw = jax.random.split(root, 3)
    x = jax.random.normal(kx, (N, Cin, H, W), jnp.float32)
    proxy = jax.random.normal(kp, (N, Cin, M), jnp.float32)
    params = make_params(kw, Cin, Kc)

    out = object_attention_block(x, proxy, params, key_channels=Kc)
    out = jax.block_until_ready(out)

    ref = reference(x, proxy, params, Kc)
    assert out.shape == (N, Cin, H, W)
    err = float(jnp.max(jnp.abs(out - ref)))
    # tolerance accounts for pl.reciprocal(approx=True) in the softmax denominator
    assert jnp.allclose(out, ref, atol=5e-3, rtol=5e-3), f"max abs err {err}"
    print("KERNEL_OK")
</pallas_src>

<mosaic_0001>
module attributes {stable_mosaic.version = 11 : i64} {
  func.func @_oab_kernel(%arg0: i32, %arg1: memref<2x256x64xf32, #tpu.memory_space<vmem>>, %arg2: memref<2x256x8xf32, #tpu.memory_space<vmem>>, %arg3: memref<256x64xf32, #tpu.memory_space<vmem>>, %arg4: memref<1x64xf32, #tpu.memory_space<vmem>>, %arg5: memref<64x64xf32, #tpu.memory_space<vmem>>, %arg6: memref<1x64xf32, #tpu.memory_space<vmem>>, %arg7: memref<128x256xf32, #tpu.memory_space<vmem>>, %arg8: memref<128x1xf32, #tpu.memory_space<vmem>>, %arg9: memref<64x64xf32, #tpu.memory_space<vmem>>, %arg10: memref<64x1xf32, #tpu.memory_space<vmem>>, %arg11: memref<64x256xf32, #tpu.memory_space<vmem>>, %arg12: memref<1x256xf32, #tpu.memory_space<vmem>>, %arg13: memref<2x256x64xf32, #tpu.memory_space<vmem>>) attributes {dimension_semantics = [#tpu.dimension_semantics<parallel>], iteration_bounds = array<i64: 1>, scalar_prefetch = 0 : i64, scratch_operands = 0 : i64, tpu.core_type = #tpu.core_type<tc>, window_params = [{transform_indices = @transform_0, window_bounds = array<i64: 2, 256, 64>}, {transform_indices = @transform_1, window_bounds = array<i64: 2, 256, 8>}, {pipeline_mode = #tpu.pipeline_mode<synchronous>, transform_indices = @transform_2, window_bounds = array<i64: 256, 64>}, {pipeline_mode = #tpu.pipeline_mode<synchronous>, transform_indices = @transform_3, window_bounds = array<i64: 1, 64>}, {pipeline_mode = #tpu.pipeline_mode<synchronous>, transform_indices = @transform_4, window_bounds = array<i64: 64, 64>}, {pipeline_mode = #tpu.pipeline_mode<synchronous>, transform_indices = @transform_5, window_bounds = array<i64: 1, 64>}, {pipeline_mode = #tpu.pipeline_mode<synchronous>, transform_indices = @transform_6, window_bounds = array<i64: 128, 256>}, {pipeline_mode = #tpu.pipeline_mode<synchronous>, transform_indices = @transform_7, window_bounds = array<i64: 128, 1>}, {pipeline_mode = #tpu.pipeline_mode<synchronous>, transform_indices = @transform_8, window_bounds = array<i64: 64, 64>}, {pipeline_mode = #tpu.pipeline_mode<synchronous>, transform_indices = @transform_9, window_bounds = array<i64: 64, 1>}, {pipeline_mode = #tpu.pipeline_mode<synchronous>, transform_indices = @transform_10, window_bounds = array<i64: 64, 256>}, {pipeline_mode = #tpu.pipeline_mode<synchronous>, transform_indices = @transform_11, window_bounds = array<i64: 1, 256>}, {transform_indices = @transform_12, window_bounds = array<i64: 2, 256, 64>}]} {
    %c0 = arith.constant 0 : index
    %c0_0 = arith.constant 0 : index
    %c0_1 = arith.constant 0 : index
    %0 = vector.load %arg1[%c0, %c0_0, %c0_1] : memref<2x256x64xf32, #tpu.memory_space<vmem>>, vector<1x256x64xf32>
    %1 = vector.shape_cast %0 : vector<1x256x64xf32> to vector<256x64xf32>
    %2 = tpu.transpose %1, [1, 0] : vector<256x64xf32> -> vector<64x256xf32>
    %c1 = arith.constant 1 : index
    %c0_2 = arith.constant 0 : index
    %c0_3 = arith.constant 0 : index
    %3 = vector.load %arg1[%c1, %c0_2, %c0_3] : memref<2x256x64xf32, #tpu.memory_space<vmem>>, vector<1x256x64xf32>
    %4 = vector.shape_cast %3 : vector<1x256x64xf32> to vector<256x64xf32>
    %5 = tpu.transpose %4, [1, 0] : vector<256x64xf32> -> vector<64x256xf32>
    %6 = tpu.concatenate %2, %5 in 0 : vector<64x256xf32>, vector<64x256xf32> -> vector<128x256xf32>
    %c0_4 = arith.constant 0 : index
    %c0_5 = arith.constant 0 : index
    %7 = vector.load %arg3[%c0_4, %c0_5] : memref<256x64xf32, #tpu.memory_space<vmem>>, vector<256x64xf32>
    %c0_6 = arith.constant 0 : index
    %c0_7 = arith.constant 0 : index
    %8 = vector.load %arg4[%c0_6, %c0_7] : memref<1x64xf32, #tpu.memory_space<vmem>>, vector<1x64xf32>
    %cst = arith.constant dense<0.000000e+00> : vector<128x64xf32>
    %9 = tpu.matmul %6, %7, %cst {dimension_numbers = #tpu.dot_dimension_numbers<[1], [0], [0], [1], [0, 0, 1, 1], [], []>} : vector<128x256xf32>, vector<256x64xf32>, vector<128x64xf32> -> vector<128x64xf32>
    %10 = vector.broadcast %8 : vector<1x64xf32> to vector<128x64xf32>
    %11 = arith.addf %9, %10 : vector<128x64xf32>
    %cst_8 = arith.constant 0.000000e+00 : f32
    %12 = vector.broadcast %cst_8 : f32 to vector<128x64xf32>
    %13 = arith.maximumf %11, %12 : vector<128x64xf32>
    %c0_9 = arith.constant 0 : index
    %c0_10 = arith.constant 0 : index
    %14 = vector.load %arg5[%c0_9, %c0_10] : memref<64x64xf32, #tpu.memory_space<vmem>>, vector<64x64xf32>
    %c0_11 = arith.constant 0 : index
    %c0_12 = arith.constant 0 : index
    %15 = vector.load %arg6[%c0_11, %c0_12] : memref<1x64xf32, #tpu.memory_space<vmem>>, vector<1x64xf32>
    %cst_13 = arith.constant dense<0.000000e+00> : vector<128x64xf32>
    %16 = tpu.matmul %13, %14, %cst_13 {dimension_numbers = #tpu.dot_dimension_numbers<[1], [0], [0], [1], [0, 0, 1, 1], [], []>} : vector<128x64xf32>, vector<64x64xf32>, vector<128x64xf32> -> vector<128x64xf32>
    %17 = vector.broadcast %15 : vector<1x64xf32> to vector<128x64xf32>
    %18 = arith.addf %16, %17 : vector<128x64xf32>
    %cst_14 = arith.constant 0.000000e+00 : f32
    %19 = vector.broadcast %cst_14 : f32 to vector<128x64xf32>
    %20 = arith.maximumf %18, %19 : vector<128x64xf32>
    %21 = tpu.iota {dimensions = array<i32: 1>} : vector<64x8xi32>
    %c6_i32 = arith.constant 6 : i32
    %22 = vector.broadcast %c6_i32 : i32 to vector<64x8xi32>
    %23 = arith.cmpi sge, %21, %22 : vector<64x8xi32>
    %c0_15 = arith.constant 0 : index
    %c0_16 = arith.constant 0 : index
    %c0_17 = arith.constant 0 : index
    %24 = vector.load %arg2[%c0_15, %c0_16, %c0_17] : memref<2x256x8xf32, #tpu.memory_space<vmem>>, vector<1x256x8xf32>
    %25 = vector.shape_cast %24 : vector<1x256x8xf32> to vector<256x8xf32>
    %c0_18 = arith.constant 0 : index
    %c0_19 = arith.constant 0 : index
    %26 = vector.load %arg7[%c0_18, %c0_19] : memref<128x256xf32, #tpu.memory_space<vmem>>, vector<128x256xf32>
    %cst_20 = arith.constant dense<0.000000e+00> : vector<128x8xf32>
    %27 = tpu.matmul %26, %25, %cst_20 {dimension_numbers = #tpu.dot_dimension_numbers<[1], [0], [0], [1], [0, 0, 1, 1], [], []>} : vector<128x256xf32>, vector<256x8xf32>, vector<128x8xf32> -> vector<128x8xf32>
    %c0_21 = arith.constant 0 : index
    %c0_22 = arith.constant 0 : index
    %28 = vector.load %arg8[%c0_21, %c0_22] : memref<128x1xf32, #tpu.memory_space<vmem>>, vector<128x1xf32>
    %29 = vector.broadcast %28 : vector<128x1xf32> to vector<128x8xf32>
    %30 = arith.addf %27, %29 : vector<128x8xf32>
    %cst_23 = arith.constant 0.000000e+00 : f32
    %31 = vector.broadcast %cst_23 : f32 to vector<128x8xf32>
    %32 = arith.maximumf %30, %31 : vector<128x8xf32>
    %c0_24 = arith.constant 0 : index
    %c0_25 = arith.constant 0 : index
    %33 = vector.load %arg9[%c0_24, %c0_25] : memref<64x64xf32, #tpu.memory_space<vmem>>, vector<64x64xf32>
    %34 = vector.extract_strided_slice %32 {offsets = [0, 0], sizes = [64, 8], strides = [1, 1]} : vector<128x8xf32> to vector<64x8xf32>
    %cst_26 = arith.constant dense<0.000000e+00> : vector<64x8xf32>
    %35 = tpu.matmul %33, %34, %cst_26 {dimension_numbers = #tpu.dot_dimension_numbers<[1], [0], [0], [1], [0, 0, 1, 1], [], []>} : vector<64x64xf32>, vector<64x8xf32>, vector<64x8xf32> -> vector<64x8xf32>
    %c0_27 = arith.constant 0 : index
    %c0_28 = arith.constant 0 : index
    %36 = vector.load %arg10[%c0_27, %c0_28] : memref<64x1xf32, #tpu.memory_space<vmem>>, vector<64x1xf32>
    %37 = vector.broadcast %36 : vector<64x1xf32> to vector<64x8xf32>
    %38 = arith.addf %35, %37 : vector<64x8xf32>
    %cst_29 = arith.constant 0.000000e+00 : f32
    %39 = vector.broadcast %cst_29 : f32 to vector<64x8xf32>
    %40 = arith.maximumf %38, %39 : vector<64x8xf32>
    %41 = vector.extract_strided_slice %32 {offsets = [64, 0], sizes = [64, 8], strides = [1, 1]} : vector<128x8xf32> to vector<64x8xf32>
    %42 = vector.extract_strided_slice %20 {offsets = [0, 0], sizes = [64, 64], strides = [1, 1]} : vector<128x64xf32> to vector<64x64xf32>
    %cst_30 = arith.constant dense<0.000000e+00> : vector<64x8xf32>
    %43 = tpu.matmul %42, %40, %cst_30 {dimension_numbers = #tpu.dot_dimension_numbers<[1], [0], [0], [1], [0, 0, 1, 1], [], []>} : vector<64x64xf32>, vector<64x8xf32>, vector<64x8xf32> -> vector<64x8xf32>
    %cst_31 = arith.constant 1.250000e-01 : f32
    %44 = vector.broadcast %cst_31 : f32 to vector<64x8xf32>
    %45 = arith.mulf %43, %44 : vector<64x8xf32>
    %cst_32 = arith.constant -1.000000e+30 : f32
    %46 = vector.broadcast %cst_32 : f32 to vector<64x8xf32>
    %47 = arith.select %23, %46, %45 : vector<64x8xi1>, vector<64x8xf32>
    %cst_33 = arith.constant dense<0xFF800000> : vector<64xf32>
    %48 = vector.multi_reduction <maximumf>, %47, %cst_33 [1] : vector<64x8xf32> to vector<64xf32>
    %49 = vector.shape_cast %48 : vector<64xf32> to vector<64x1xf32>
    %50 = vector.broadcast %49 : vector<64x1xf32> to vector<64x8xf32>
    %51 = arith.subf %47, %50 : vector<64x8xf32>
    %52 = math.exp %51 : vector<64x8xf32>
    %cst_34 = arith.constant dense<0.000000e+00> : vector<64xf32>
    %53 = vector.multi_reduction <add>, %52, %cst_34 [1] : vector<64x8xf32> to vector<64xf32>
    %54 = vector.shape_cast %53 : vector<64xf32> to vector<64x1xf32>
    %55 = tpu.reciprocal %54 {approx = true} : vector<64x1xf32> -> vector<64x1xf32>
    %56 = vector.broadcast %55 : vector<64x1xf32> to vector<64x8xf32>
    %57 = arith.mulf %52, %56 : vector<64x8xf32>
    "tpu.trace_start"() <{level = 10 : i32, message = "qm,km->qk"}> : () -> ()
    %cst_35 = arith.constant dense<0.000000e+00> : vector<64x64xf32>
    %58 = tpu.matmul %57, %41, %cst_35 {dimension_numbers = #tpu.dot_dimension_numbers<[1], [1], [0], [0], [0, 0, 1, 0], [], []>} : vector<64x8xf32>, vector<64x8xf32>, vector<64x64xf32> -> vector<64x64xf32>
    "tpu.trace_stop"() : () -> ()
    %c1_36 = arith.constant 1 : index
    %c0_37 = arith.constant 0 : index
    %c0_38 = arith.constant 0 : index
    %59 = vector.load %arg2[%c1_36, %c0_37, %c0_38] : memref<2x256x8xf32, #tpu.memory_space<vmem>>, vector<1x256x8xf32>
    %60 = vector.shape_cast %59 : vector<1x256x8xf32> to vector<256x8xf32>
    %c0_39 = arith.constant 0 : index
    %c0_40 = arith.constant 0 : index
    %61 = vector.load %arg7[%c0_39, %c0_40] : memref<128x256xf32, #tpu.memory_space<vmem>>, vector<128x256xf32>
    %cst_41 = arith.constant dense<0.000000e+00> : vector<128x8xf32>
    %62 = tpu.matmul %61, %60, %cst_41 {dimension_numbers = #tpu.dot_dimension_numbers<[1], [0], [0], [1], [0, 0, 1, 1], [], []>} : vector<128x256xf32>, vector<256x8xf32>, vector<128x8xf32> -> vector<128x8xf32>
    %c0_42 = arith.constant 0 : index
    %c0_43 = arith.constant 0 : index
    %63 = vector.load %arg8[%c0_42, %c0_43] : memref<128x1xf32, #tpu.memory_space<vmem>>, vector<128x1xf32>
    %64 = vector.broadcast %63 : vector<128x1xf32> to vector<128x8xf32>
    %65 = arith.addf %62, %64 : vector<128x8xf32>
    %cst_44 = arith.constant 0.000000e+00 : f32
    %66 = vector.broadcast %cst_44 : f32 to vector<128x8xf32>
    %67 = arith.maximumf %65, %66 : vector<128x8xf32>
    %c0_45 = arith.constant 0 : index
    %c0_46 = arith.constant 0 : index
    %68 = vector.load %arg9[%c0_45, %c0_46] : memref<64x64xf32, #tpu.memory_space<vmem>>, vector<64x64xf32>
    %69 = vector.extract_strided_slice %67 {offsets = [0, 0], sizes = [64, 8], strides = [1, 1]} : vector<128x8xf32> to vector<64x8xf32>
    %cst_47 = arith.constant dense<0.000000e+00> : vector<64x8xf32>
    %70 = tpu.matmul %68, %69, %cst_47 {dimension_numbers = #tpu.dot_dimension_numbers<[1], [0], [0], [1], [0, 0, 1, 1], [], []>} : vector<64x64xf32>, vector<64x8xf32>, vector<64x8xf32> -> vector<64x8xf32>
    %c0_48 = arith.constant 0 : index
    %c0_49 = arith.constant 0 : index
    %71 = vector.load %arg10[%c0_48, %c0_49] : memref<64x1xf32, #tpu.memory_space<vmem>>, vector<64x1xf32>
    %72 = vector.broadcast %71 : vector<64x1xf32> to vector<64x8xf32>
    %73 = arith.addf %70, %72 : vector<64x8xf32>
    %cst_50 = arith.constant 0.000000e+00 : f32
    %74 = vector.broadcast %cst_50 : f32 to vector<64x8xf32>
    %75 = arith.maximumf %73, %74 : vector<64x8xf32>
    %76 = vector.extract_strided_slice %67 {offsets = [64, 0], sizes = [64, 8], strides = [1, 1]} : vector<128x8xf32> to vector<64x8xf32>
    %77 = vector.extract_strided_slice %20 {offsets = [64, 0], sizes = [64, 64], strides = [1, 1]} : vector<128x64xf32> to vector<64x64xf32>
    %cst_51 = arith.constant dense<0.000000e+00> : vector<64x8xf32>
    %78 = tpu.matmul %77, %75, %cst_51 {dimension_numbers = #tpu.dot_dimension_numbers<[1], [0], [0], [1], [0, 0, 1, 1], [], []>} : vector<64x64xf32>, vector<64x8xf32>, vector<64x8xf32> -> vector<64x8xf32>
    %cst_52 = arith.constant 1.250000e-01 : f32
    %79 = vector.broadcast %cst_52 : f32 to vector<64x8xf32>
    %80 = arith.mulf %78, %79 : vector<64x8xf32>
    %cst_53 = arith.constant -1.000000e+30 : f32
    %81 = vector.broadcast %cst_53 : f32 to vector<64x8xf32>
    %82 = arith.select %23, %81, %80 : vector<64x8xi1>, vector<64x8xf32>
    %cst_54 = arith.constant dense<0xFF800000> : vector<64xf32>
    %83 = vector.multi_reduction <maximumf>, %82, %cst_54 [1] : vector<64x8xf32> to vector<64xf32>
    %84 = vector.shape_cast %83 : vector<64xf32> to vector<64x1xf32>
    %85 = vector.broadcast %84 : vector<64x1xf32> to vector<64x8xf32>
    %86 = arith.subf %82, %85 : vector<64x8xf32>
    %87 = math.exp %86 : vector<64x8xf32>
    %cst_55 = arith.constant dense<0.000000e+00> : vector<64xf32>
    %88 = vector.multi_reduction <add>, %87, %cst_55 [1] : vector<64x8xf32> to vector<64xf32>
    %89 = vector.shape_cast %88 : vector<64xf32> to vector<64x1xf32>
    %90 = tpu.reciprocal %89 {approx = true} : vector<64x1xf32> -> vector<64x1xf32>
    %91 = vector.broadcast %90 : vector<64x1xf32> to vector<64x8xf32>
    %92 = arith.mulf %87, %91 : vector<64x8xf32>
    "tpu.trace_start"() <{level = 10 : i32, message = "qm,km->qk"}> : () -> ()
    %cst_56 = arith.constant dense<0.000000e+00> : vector<64x64xf32>
    %93 = tpu.matmul %92, %76, %cst_56 {dimension_numbers = #tpu.dot_dimension_numbers<[1], [1], [0], [0], [0, 0, 1, 0], [], []>} : vector<64x8xf32>, vector<64x8xf32>, vector<64x64xf32> -> vector<64x64xf32>
    "tpu.trace_stop"() : () -> ()
    %94 = tpu.concatenate %58, %93 in 0 : vector<64x64xf32>, vector<64x64xf32> -> vector<128x64xf32>
    %c0_57 = arith.constant 0 : index
    %c0_58 = arith.constant 0 : index
    %95 = vector.load %arg11[%c0_57, %c0_58] : memref<64x256xf32, #tpu.memory_space<vmem>>, vector<64x256xf32>
    %c0_59 = arith.constant 0 : index
    %c0_60 = arith.constant 0 : index
    %96 = vector.load %arg12[%c0_59, %c0_60] : memref<1x256xf32, #tpu.memory_space<vmem>>, vector<1x256xf32>
    %cst_61 = arith.constant dense<0.000000e+00> : vector<128x256xf32>
    %97 = tpu.matmul %94, %95, %cst_61 {dimension_numbers = #tpu.dot_dimension_numbers<[1], [0], [0], [1], [0, 0, 1, 1], [], []>} : vector<128x64xf32>, vector<64x256xf32>, vector<128x256xf32> -> vector<128x256xf32>
    %98 = vector.broadcast %96 : vector<1x256xf32> to vector<128x256xf32>
    %99 = arith.addf %97, %98 : vector<128x256xf32>
    %cst_62 = arith.constant 0.000000e+00 : f32
    %100 = vector.broadcast %cst_62 : f32 to vector<128x256xf32>
    %101 = arith.maximumf %99, %100 : vector<128x256xf32>
    %102 = vector.extract_strided_slice %101 {offsets = [0, 0], sizes = [64, 256], strides = [1, 1]} : vector<128x256xf32> to vector<64x256xf32>
    %103 = tpu.transpose %102, [1, 0] : vector<64x256xf32> -> vector<256x64xf32>
    %c0_63 = arith.constant 0 : index
    %c0_64 = arith.constant 0 : index
    %c0_65 = arith.constant 0 : index
    %104 = vector.load %arg13[%c0_63, %c0_64, %c0_65] : memref<2x256x64xf32, #tpu.memory_space<vmem>>, vector<1x256x64xf32>
    %105 = vector.shape_cast %104 : vector<1x256x64xf32> to vector<256x64xf32>
    %106 = vector.shape_cast %103 : vector<256x64xf32> to vector<1x256x64xf32>
    tpu.vector_store %arg13[%c0_63, %c0_64, %c0_65], %106 {strides = array<i32>} : memref<2x256x64xf32, #tpu.memory_space<vmem>>, vector<1x256x64xf32>,
    %107 = vector.extract_strided_slice %101 {offsets = [64, 0], sizes = [64, 256], strides = [1, 1]} : vector<128x256xf32> to vector<64x256xf32>
    %108 = tpu.transpose %107, [1, 0] : vector<64x256xf32> -> vector<256x64xf32>
    %c1_66 = arith.constant 1 : index
    %c0_67 = arith.constant 0 : index
    %c0_68 = arith.constant 0 : index
    %109 = vector.load %arg13[%c1_66, %c0_67, %c0_68] : memref<2x256x64xf32, #tpu.memory_space<vmem>>, vector<1x256x64xf32>
    %110 = vector.shape_cast %109 : vector<1x256x64xf32> to vector<256x64xf32>
    %111 = vector.shape_cast %108 : vector<256x64xf32> to vector<1x256x64xf32>
    tpu.vector_store %arg13[%c1_66, %c0_67, %c0_68], %111 {strides = array<i32>} : memref<2x256x64xf32, #tpu.memory_space<vmem>>, vector<1x256x64xf32>,
    return
  }
  func.func @transform_0(%arg0: i32) -> (i32, i32, i32) {
    %c0_i32 = arith.constant 0 : i32
    %c0_i32_0 = arith.constant 0 : i32
    %c0_i32_1 = arith.constant 0 : i32
    return %arg0, %c0_i32, %c0_i32_0 : i32, i32, i32
  }
  func.func @transform_1(%arg0: i32) -> (i32, i32, i32) {
    %c0_i32 = arith.constant 0 : i32
    %c0_i32_0 = arith.constant 0 : i32
    %c0_i32_1 = arith.constant 0 : i32
    return %arg0, %c0_i32, %c0_i32_0 : i32, i32, i32
  }
  func.func @transform_2(%arg0: i32) -> (i32, i32) {
    %c0_i32 = arith.constant 0 : i32
    %c0_i32_0 = arith.constant 0 : i32
    %c0_i32_1 = arith.constant 0 : i32
    return %c0_i32, %c0_i32_0 : i32, i32
  }
  func.func @transform_3(%arg0: i32) -> (i32, i32) {
    %c0_i32 = arith.constant 0 : i32
    %c0_i32_0 = arith.constant 0 : i32
    %c0_i32_1 = arith.constant 0 : i32
    return %c0_i32, %c0_i32_0 : i32, i32
  }
  func.func @transform_4(%arg0: i32) -> (i32, i32) {
    %c0_i32 = arith.constant 0 : i32
    %c0_i32_0 = arith.constant 0 : i32
    %c0_i32_1 = arith.constant 0 : i32
    return %c0_i32, %c0_i32_0 : i32, i32
  }
  func.func @transform_5(%arg0: i32) -> (i32, i32) {
    %c0_i32 = arith.constant 0 : i32
    %c0_i32_0 = arith.constant 0 : i32
    %c0_i32_1 = arith.constant 0 : i32
    return %c0_i32, %c0_i32_0 : i32, i32
  }
  func.func @transform_6(%arg0: i32) -> (i32, i32) {
    %c0_i32 = arith.constant 0 : i32
    %c0_i32_0 = arith.constant 0 : i32
    %c0_i32_1 = arith.constant 0 : i32
    return %c0_i32, %c0_i32_0 : i32, i32
  }
  func.func @transform_7(%arg0: i32) -> (i32, i32) {
    %c0_i32 = arith.constant 0 : i32
    %c0_i32_0 = arith.constant 0 : i32
    %c0_i32_1 = arith.constant 0 : i32
    return %c0_i32, %c0_i32_0 : i32, i32
  }
  func.func @transform_8(%arg0: i32) -> (i32, i32) {
    %c0_i32 = arith.constant 0 : i32
    %c0_i32_0 = arith.constant 0 : i32
    %c0_i32_1 = arith.constant 0 : i32
    return %c0_i32, %c0_i32_0 : i32, i32
  }
  func.func @transform_9(%arg0: i32) -> (i32, i32) {
    %c0_i32 = arith.constant 0 : i32
    %c0_i32_0 = arith.constant 0 : i32
    %c0_i32_1 = arith.constant 0 : i32
    return %c0_i32, %c0_i32_0 : i32, i32
  }
  func.func @transform_10(%arg0: i32) -> (i32, i32) {
    %c0_i32 = arith.constant 0 : i32
    %c0_i32_0 = arith.constant 0 : i32
    %c0_i32_1 = arith.constant 0 : i32
    return %c0_i32, %c0_i32_0 : i32, i32
  }
  func.func @transform_11(%arg0: i32) -> (i32, i32) {
    %c0_i32 = arith.constant 0 : i32
    %c0_i32_0 = arith.constant 0 : i32
    %c0_i32_1 = arith.constant 0 : i32
    return %c0_i32, %c0_i32_0 : i32, i32
  }
  func.func @transform_12(%arg0: i32) -> (i32, i32, i32) {
    %c0_i32 = arith.constant 0 : i32
    %c0_i32_0 = arith.constant 0 : i32
    %c0_i32_1 = arith.constant 0 : i32
    return %arg0, %c0_i32, %c0_i32_0 : i32, i32, i32
  }
}

</mosaic_0001>

<bundles_post_ra>
// kernel: tpu_custom_call.1
= control target key start
LH: loop header
LB: loop body
LE: loop exit
PB: predicated region body
PF: predicated region fallthrough
CT: control target
= control target key end

     0   :  { %vm428_vm0 = vcmask 523264   ;;  %vm1077_vm1 = vcmask 64512   ;;  %s4722_s0 = inlined_call_operand.vmem [shape: f32[2,256,64], index: 0, kind: input, shape index: {}]   ;;  %s4723_s2 = inlined_call_operand.vmem [shape: f32[256,64], index: 2, kind: input, shape index: {}]   ;;  %s4724_s3 = inlined_call_operand.vmem [shape: f32[1,64], index: 3, kind: input, shape index: {}]   ;;  %s4725_s4 = inlined_call_operand.vmem [shape: f32[64,64], index: 4, kind: input, shape index: {}]   ;;  %s4726_s7 = inlined_call_operand.vmem [shape: f32[128,1], index: 7, kind: input, shape index: {}]   ;;  %s4727_s5 = inlined_call_operand.vmem [shape: f32[1,64], index: 5, kind: input, shape index: {}]   ;;  %s4728_s9 = inlined_call_operand.vmem [shape: f32[64,1], index: 9, kind: input, shape index: {}]   ;;  %s4729_s1 = inlined_call_operand.vmem [shape: f32[2,256,8], index: 1, kind: input, shape index: {}]   ;;  %s4730_s6 = inlined_call_operand.vmem [shape: f32[128,256], index: 6, kind: input, shape index: {}]   ;;  %s4731_s8 = inlined_call_operand.vmem [shape: f32[64,64], index: 8, kind: input, shape index: {}]   ;;  %s4732_s10 = inlined_call_operand.vmem [shape: f32[64,256], index: 10, kind: input, shape index: {}]   ;;  %s4733_s11 = inlined_call_operand.vmem [shape: f32[1,256], index: 11, kind: input, shape index: {}]   ;;  %s4734_s12 = inlined_call_operand.vmem [shape: f32[2,256,64], index: 12, kind: output, shape index: {}]  }
   0x1   :  { %v2378_v0 = vld [vmem:[%s4722_s0 + $0x100] sm:$0xff]  ;;  %v2379_v1 = vld [vmem:[%s4722_s0 + $0x108] sm:$0xff]  ;;  %v2380_v2 = vld [vmem:[%s4722_s0 + $0x110] sm:$0xff] }
   0x2   :  { %170 = vxpose.xlu0.b32.start [1/16] (narrow) %v2378_v0, 64  ;;  %v2381_v3 = vld [vmem:[%s4722_s0 + $0x118] sm:$0xff]  ;;  %v41_v4 = vld [vmem:[%s4722_s0] sm:$0xff]  ;;  %v42_v8 = vld [vmem:[%s4722_s0 + $0x8] sm:$0xff] }
   0x3   :  { %v2394_v5 = vld [vmem:[%s4722_s0 + $0x180] sm:$0xff]  ;;  %v2395_v9 = vld [vmem:[%s4722_s0 + $0x188] sm:$0xff]  ;;  %v43_v12 = vld [vmem:[%s4722_s0 + $0x10] sm:$0xff] }
   0x4   :  { %v2657_v6 = vpack.i.bf16 %v2394_v5, %v41_v4  ;;  %v2382_v7 = vld [vmem:[%s4722_s0 + $0x120] sm:$0xff]  ;;  %v2659_v10 = vpack.i.bf16 %v2395_v9, %v42_v8  ;;  %v2383_v11 = vld [vmem:[%s4722_s0 + $0x128] sm:$0xff]  ;;  %v2396_v13 = vld [vmem:[%s4722_s0 + $0x190] sm:$0xff] }
   0x5   :  { %v2661_v14 = vpack.i.bf16 %v2396_v13, %v43_v12  ;;  %v2384_v15 = vld [vmem:[%s4722_s0 + $0x130] sm:$0xff]  ;;  %v44_v16 = vld [vmem:[%s4722_s0 + $0x18] sm:$0xff]  ;;  %v45_v20 = vld [vmem:[%s4722_s0 + $0x20] sm:$0xff] }
   0x6   :  { %2658 = vxpose.xlu1.b32.start [1/16] (narrow) %v2657_v6, 64  ;;  %v2397_v17 = vld [vmem:[%s4722_s0 + $0x198] sm:$0xff]  ;;  %v2398_v21 = vld [vmem:[%s4722_s0 + $0x1a0] sm:$0xff]  ;;  %v46_v24 = vld [vmem:[%s4722_s0 + $0x28] sm:$0xff] }
   0x7   :  { %v2663_v18 = vpack.i.bf16 %v2397_v17, %v44_v16  ;;  %v2385_v19 = vld [vmem:[%s4722_s0 + $0x138] sm:$0xff]  ;;  %v2665_v22 = vpack.i.bf16 %v2398_v21, %v45_v20  ;;  %v2386_v23 = vld [vmem:[%s4722_s0 + $0x140] sm:$0xff]  ;;  %v2399_v25 = vld [vmem:[%s4722_s0 + $0x1a8] sm:$0xff] }
   0x8   :  { %v2667_v26 = vpack.i.bf16 %v2399_v25, %v46_v24  ;;  %v2387_v27 = vld [vmem:[%s4722_s0 + $0x148] sm:$0xff]  ;;  %v47_v28 = vld [vmem:[%s4722_s0 + $0x30] sm:$0xff]  ;;  %v48_v32 = vld [vmem:[%s4722_s0 + $0x38] sm:$0xff] }
   0x9   :  { %v2400_v29 = vld [vmem:[%s4722_s0 + $0x1b0] sm:$0xff]  ;;  %v2401_v33 = vld [vmem:[%s4722_s0 + $0x1b8] sm:$0xff]  ;;  %v49_v36 = vld [vmem:[%s4722_s0 + $0x40] sm:$0xff] }
   0xa   :  { %171 = vxpose.xlu0.b32.cont [2/16] (narrow) %v2379_v1, 64  ;;  %v2669_v30 = vpack.i.bf16 %v2400_v29, %v47_v28  ;;  %v2388_v31 = vld [vmem:[%s4722_s0 + $0x150] sm:$0xff]  ;;  %v2671_v34 = vpack.i.bf16 %v2401_v33, %v48_v32  ;;  %v2389_v35 = vld [vmem:[%s4722_s0 + $0x158] sm:$0xff]  ;;  %v2402_v37 = vld [vmem:[%s4722_s0 + $0x1c0] sm:$0xff] }
   0xb   :  { %v2673_v38 = vpack.i.bf16 %v2402_v37, %v49_v36  ;;  %v249_v39 = vld [vmem:[%s4723_s2 + $0x78] sm:$0xff]  ;;  %v248_v40 = vld [vmem:[%s4723_s2 + $0x70] sm:$0xff]  ;;  %v247_v41 = vld [vmem:[%s4723_s2 + $0x68] sm:$0xff] }
   0xc   :  { %2586 = vmatpush.msra.mxu1 %v249_v39  ;;  %270 = vmatpush.msra.mxu0 %v249_v39  ;;  %v50_v42 = vld [vmem:[%s4722_s0 + $0x48] sm:$0xff]  ;;  %v2390_v44 = vld [vmem:[%s4722_s0 + $0x160] sm:$0xff]  ;;  %v245_v47 = vld [vmem:[%s4723_s2 + $0x58] sm:$0xff] }
   0xd   :  { %v2403_v43 = vld [vmem:[%s4722_s0 + $0x1c8] sm:$0xff]  ;;  %v246_v45 = vld [vmem:[%s4723_s2 + $0x60] sm:$0xff]  ;;  %v244_v48 = vld [vmem:[%s4723_s2 + $0x50] sm:$0xff] }
   0xe   :  { %2660 = vxpose.xlu1.b32.cont [2/16] (narrow) %v2659_v10, 64  ;;  %2587 = vmatpush.msra.mxu1 %v248_v40  ;;  %v2675_v46 = vpack.i.bf16 %v2403_v43, %v50_v42  ;;  %v243_v49 = vld [vmem:[%s4723_s2 + $0x48] sm:$0xff]  ;;  %v51_v50 = vld [vmem:[%s4722_s0 + $0x50] sm:$0xff]  ;;  %v242_v53 = vld [vmem:[%s4723_s2 + $0x40] sm:$0xff] }
   0xf   :  { %271 = vmatpush.msra.mxu0 %v248_v40  ;;  %v2404_v51 = vld [vmem:[%s4722_s0 + $0x1d0] sm:$0xff]  ;;  %v2391_v52 = vld [vmem:[%s4722_s0 + $0x168] sm:$0xff]  ;;  %v241_v55 = vld [vmem:[%s4723_s2 + $0x38] sm:$0xff] }
  0x10   :  { %2588 = vmatpush.msra.mxu1 %v247_v41  ;;  %v2677_v54 = vpack.i.bf16 %v2404_v51, %v51_v50  ;;  %v240_v56 = vld [vmem:[%s4723_s2 + $0x30] sm:$0xff]  ;;  %v239_v57 = vld [vmem:[%s4723_s2 + $0x28] sm:$0xff]  ;;  %v52_v58 = vld [vmem:[%s4722_s0 + $0x58] sm:$0xff] }
  0x11   :  { %272 = vmatpush.msra.mxu0 %v247_v41  ;;  %v2405_v59 = vld [vmem:[%s4722_s0 + $0x1d8] sm:$0xff]  ;;  %v2392_v60 = vld [vmem:[%s4722_s0 + $0x170] sm:$0xff]  ;;  %v238_v61 = vld [vmem:[%s4723_s2 + $0x20] sm:$0xff] }
  0x12   :  { %172 = vxpose.xlu0.b32.cont [3/16] (narrow) %v2380_v2, 64  ;;  %2589 = vmatpush.msra.mxu1 %v246_v45  ;;  %v2679_v62 = vpack.i.bf16 %v2405_v59, %v52_v58  ;;  %v237_v63 = vld [vmem:[%s4723_s2 + $0x18] sm:$0xff]  ;;  %v236_v0 = vld [vmem:[%s4723_s2 + $0x10] sm:$0xff]  ;;  %v235_v1 = vld [vmem:[%s4723_s2 + $0x8] sm:$0xff] }
  0x13   :  { %273 = vmatpush.msra.mxu0 %v246_v45  ;;  %v53_v2 = vld [vmem:[%s4722_s0 + $0x60] sm:$0xff]  ;;  %v2393_v4 = vld [vmem:[%s4722_s0 + $0x178] sm:$0xff]  ;;  %v2407_v8 = vld [vmem:[%s4722_s0 + $0x1e8] sm:$0xff] }
  0x14   :  { %2590 = vmatpush.msra.mxu1 %v245_v47  ;;  %v234_v5 = vld [vmem:[%s4723_s2] sm:$0xff]  ;;  %v72_v10 = vld [vmem:[%s4722_s0 + $0xf8] sm:$0xff]  ;;  %v70_v12 = vld [vmem:[%s4722_s0 + $0xe8] sm:$0xff] }
  0x15   :  { %274 = vmatpush.msra.mxu0 %v245_v47  ;;  %v69_v13 = vld [vmem:[%s4722_s0 + $0xe0] sm:$0xff]  ;;  %v68_v17 = vld [vmem:[%s4722_s0 + $0xd8] sm:$0xff]  ;;  %v63_v25 = vld [vmem:[%s4722_s0 + $0xb0] sm:$0xff] }
  0x16   :  { %2662 = vxpose.xlu1.b32.cont [3/16] (narrow) %v2661_v14, 64  ;;  %2591 = vmatpush.msra.mxu1 %v244_v48  ;;  %v55_v14 = vld [vmem:[%s4722_s0 + $0x70] sm:$0xff]  ;;  %v65_v20 = vld [vmem:[%s4722_s0 + $0xc0] sm:$0xff]  ;;  %v56_v21 = vld [vmem:[%s4722_s0 + $0x78] sm:$0xff] }
  0x17   :  { %275 = vmatpush.msra.mxu0 %v244_v48  ;;  %v64_v24 = vld [vmem:[%s4722_s0 + $0xb8] sm:$0xff]  ;;  %v59_v29 = vld [vmem:[%s4722_s0 + $0x90] sm:$0xff]  ;;  %v262_v36 = vld [vmem:[%s4723_s2 + $0xe0] sm:$0xff] }
  0x18   :  { %2592 = vmatpush.msra.mxu1 %v243_v49  ;;  %v60_v28 = vld [vmem:[%s4722_s0 + $0x98] sm:$0xff]  ;;  %v260_v39 = vld [vmem:[%s4723_s2 + $0xd0] sm:$0xff]  ;;  %v259_v40 = vld [vmem:[%s4723_s2 + $0xc8] sm:$0xff] }
  0x19   :  { %276 = vmatpush.msra.mxu0 %v243_v49  ;;  %v265_v33 = vld [vmem:[%s4723_s2 + $0xf8] sm:$0xff]  ;;  %v258_v41 = vld [vmem:[%s4723_s2 + $0xc0] sm:$0xff]  ;;  %v255_v45 = vld [vmem:[%s4723_s2 + $0xa8] sm:$0xff] }
  0x1a   :  { %173 = vxpose.xlu0.b32.cont [4/16] (narrow) %v2381_v3, 64  ;;  %2593 = vmatpush.msra.mxu1 %v242_v53  ;;  %v2406_v3 = vld [vmem:[%s4722_s0 + $0x1e0] sm:$0xff]  ;;  %v257_v43 = vld [vmem:[%s4723_s2 + $0xb8] sm:$0xff]  ;;  %v252_v49 = vld [vmem:[%s4723_s2 + $0x90] sm:$0xff] }
  0x1b   :  { %277 = vmatpush.msra.mxu0 %v242_v53  ;;  %v2681_v6 = vpack.i.bf16 %v2406_v3, %v53_v2  ;;  %v253_v48 = vld [vmem:[%s4723_s2 + $0x98] sm:$0xff]  ;;  %v251_v50 = vld [vmem:[%s4723_s2 + $0x88] sm:$0xff]  ;;  %v250_v53 = vld [vmem:[%s4723_s2 + $0x80] sm:$0xff] }
  0x1c   :  { %2594 = vmatpush.msra.mxu1 %v241_v55 }
  0x1d   :  { %278 = vmatpush.msra.mxu0 %v241_v55 }
  0x1e   :  { %2664 = vxpose.xlu1.b32.cont [4/16] (narrow) %v2663_v18, 64  ;;  %2595 = vmatpush.msra.mxu1 %v240_v56  ;;  %v67_v18 = vld [vmem:[%s4722_s0 + $0xd0] sm:$0xff] }
  0x1f   :  { %279 = vmatpush.msra.mxu0 %v240_v56 }
  0x20   :  { %2596 = vmatpush.msra.mxu1 %v239_v57 }
  0x21   :  { %280 = vmatpush.msra.mxu0 %v239_v57 }
  0x22   :  { %174 = vxpose.xlu0.b32.cont [5/16] (narrow) %v2382_v7, 64  ;;  %2597 = vmatpush.msra.mxu1 %v238_v61  ;;  %v54_v7 = vld [vmem:[%s4722_s0 + $0x68] sm:$0xff] }
  0x23   :  { %281 = vmatpush.msra.mxu0 %v238_v61  ;;  %v2683_v9 = vpack.i.bf16 %v2407_v8, %v54_v7 }
  0x24   :  { %2598 = vmatpush.msra.mxu1 %v237_v63 }
  0x25   :  { %282 = vmatpush.msra.mxu0 %v237_v63 }
  0x26   :  { %2666 = vxpose.xlu1.b32.cont [5/16] (narrow) %v2665_v22, 64  ;;  %2599 = vmatpush.msra.mxu1 %v236_v0  ;;  %v2409_v22 = vld [vmem:[%s4722_s0 + $0x1f8] sm:$0xff] }
  0x27   :  { %283 = vmatpush.msra.mxu0 %v236_v0 }
  0x28   :  { %2600 = vmatpush.msra.mxu1 %v235_v1 }
  0x29   :  { %284 = vmatpush.msra.mxu0 %v235_v1 }
  0x2a   :  { %175 = vxpose.xlu0.b32.cont [6/16] (narrow) %v2383_v11, 64  ;;  %2601 = vmatpush.msra.mxu1 %v234_v5  ;;  %v71_v11 = vld [vmem:[%s4722_s0 + $0xf0] sm:$0xff] }
  0x2b   :  { %285 = vmatpush.msra.mxu0 %v234_v5 }
  0x2c   :  { %2630 = vmatpush.lsf.msrb.mxu1 %v72_v10 }
  0x2e   :  { %2668 = vxpose.xlu1.b32.cont [6/16] (narrow) %v2667_v26, 64  ;;  %2631 = vmatpush.lsf.msrb.mxu1 %v71_v11  ;;  %v62_v26 = vld [vmem:[%s4722_s0 + $0xa8] sm:$0xff] }
  0x30   :  { %2632 = vmatpush.lsf.msrb.mxu1 %v70_v12 }
  0x32   :  { %176 = vxpose.xlu0.b32.cont [7/16] (narrow) %v2384_v15, 64  ;;  %v2408_v15 = vld [vmem:[%s4722_s0 + $0x1f0] sm:$0xff]  ;;  %2633 = vmatpush.lsf.msrb.mxu1 %v69_v13 }
  0x33   :  { %v2685_v16 = vpack.i.bf16 %v2408_v15, %v55_v14  ;;  %v423_v14 = vld [vmem:[%s4725_s4 + $0x38] sm:$0xff]  ;;  %v422_v15 = vld [vmem:[%s4725_s4 + $0x30] sm:$0xff] }
  0x34   :  { %2634 = vmatpush.lsf.msrb.mxu1 %v68_v17  ;;  %485 = vmatpush.msra.mxu2 %v423_v14 }
  0x35   :  { %2602 = vmatpush.msra.mxu3 %v423_v14 }
  0x36   :  { %2670 = vxpose.xlu1.b32.cont [7/16] (narrow) %v2669_v30, 64  ;;  %2635 = vmatpush.lsf.msrb.mxu1 %v67_v18  ;;  %v58_v30 = vld [vmem:[%s4722_s0 + $0x88] sm:$0xff] }
  0x37   :  { %486 = vmatpush.msra.mxu2 %v422_v15  ;;  %2603 = vmatpush.msra.mxu3 %v422_v15  ;;  %v421_v18 = vld [vmem:[%s4725_s4 + $0x28] sm:$0xff] }
  0x39   :  { %487 = vmatpush.msra.mxu2 %v421_v18  ;;  %2604 = vmatpush.msra.mxu3 %v421_v18 }
  0x3a   :  { %177 = vxpose.xlu0.b32.cont [8/16] (narrow) %v2385_v19, 64  ;;  %v66_v19 = vld [vmem:[%s4722_s0 + $0xc8] sm:$0xff] }
  0x3b   :  { %2636 = vmatpush.lsf.msrb.mxu1 %v66_v19  ;;  %v420_v19 = vld [vmem:[%s4725_s4 + $0x20] sm:$0xff] }
  0x3c   :  { %488 = vmatpush.msra.mxu2 %v420_v19  ;;  %2605 = vmatpush.msra.mxu3 %v420_v19 }
  0x3d   :  { %2637 = vmatpush.lsf.msrb.mxu1 %v65_v20  ;;  %v419_v20 = vld [vmem:[%s4725_s4 + $0x18] sm:$0xff] }
  0x3e   :  { %2672 = vxpose.xlu1.b32.cont [8/16] (narrow) %v2671_v34, 64  ;;  %v264_v34 = vld [vmem:[%s4723_s2 + $0xf0] sm:$0xff]  ;;  %489 = vmatpush.msra.mxu2 %v419_v20 }
  0x3f   :  { %2638 = vmatpush.lsf.msrb.mxu1 %v64_v24  ;;  %2606 = vmatpush.msra.mxu3 %v419_v20  ;;  %v417_v24 = vld [vmem:[%s4725_s4 + $0x8] sm:$0xff] }
  0x41   :  { %2639 = vmatpush.lsf.msrb.mxu1 %v63_v25  ;;  %v416_v25 = vld [vmem:[%s4725_s4] sm:$0xff] }
  0x42   :  { %178 = vxpose.xlu0.b32.cont [9/16] (narrow) %v2386_v23, 64  ;;  %v2687_v23 = vpack.i.bf16 %v2409_v22, %v56_v21  ;;  %v418_v21 = vld [vmem:[%s4725_s4 + $0x10] sm:$0xff] }
  0x43   :  { %2640 = vmatpush.lsf.msrb.mxu1 %v62_v26  ;;  %490 = vmatpush.msra.mxu2 %v418_v21 }
  0x44   :  { %2607 = vmatpush.msra.mxu3 %v418_v21 }
  0x45   :  { %491 = vmatpush.msra.mxu2 %v417_v24 }
  0x46   :  { %2674 = vxpose.xlu1.b32.cont [9/16] (narrow) %v2673_v38, 64  ;;  %v261_v38 = vld [vmem:[%s4723_s2 + $0xd8] sm:$0xff]  ;;  %2608 = vmatpush.msra.mxu3 %v417_v24 }
  0x47   :  { %492 = vmatpush.msra.mxu2 %v416_v25 }
  0x48   :  { %2609 = vmatpush.msra.mxu3 %v416_v25 }
  0x4a   :  { %179 = vxpose.xlu0.b32.cont [10/16] (narrow) %v2387_v27, 64  ;;  %v61_v27 = vld [vmem:[%s4722_s0 + $0xa0] sm:$0xff] }
  0x4b   :  { %2641 = vmatpush.lsf.msrb.mxu1 %v61_v27 }
  0x4d   :  { %2642 = vmatpush.lsf.msrb.mxu1 %v60_v28 }
  0x4e   :  { %2676 = vxpose.xlu1.b32.cont [10/16] (narrow) %v2675_v46, 64  ;;  %v254_v46 = vld [vmem:[%s4723_s2 + $0xa0] sm:$0xff] }
  0x4f   :  { %2643 = vmatpush.lsf.msrb.mxu1 %v59_v29 }
  0x51   :  { %2644 = vmatpush.lsf.msrb.mxu1 %v58_v30 }
  0x52   :  { %180 = vxpose.xlu0.b32.cont [11/16] (narrow) %v2388_v31, 64  ;;  %v57_v31 = vld [vmem:[%s4722_s0 + $0x80] sm:$0xff] }
  0x53   :  { %2645 = vmatpush.lsf.msrb.mxu1 %v57_v31 }
  0x54   :  { %2646 = vllmr.8.mxu1 }
  0x56   :  { %2678 = vxpose.xlu1.b32.cont [11/16] (narrow) %v2677_v54, 64 }
  0x5a   :  { %181 = vxpose.xlu0.b32.cont [12/16] (narrow) %v2389_v35, 64  ;;  %v263_v35 = vld [vmem:[%s4723_s2 + $0xe8] sm:$0xff] }
  0x5e   :  { %2680 = vxpose.xlu1.b32.cont [12/16] (narrow) %v2679_v62, 64 }
  0x62   :  { %182 = vxpose.xlu0.b32.cont [13/16] (narrow) %v2390_v44, 64  ;;  %v256_v44 = vld [vmem:[%s4723_s2 + $0xb0] sm:$0xff] }
  0x66   :  { %2682 = vxpose.xlu1.b32.cont [13/16] (narrow) %v2681_v6, 64 }
  0x6a   :  { %183 = vxpose.xlu0.b32.cont [14/16] (narrow) %v2391_v52, 64 }
  0x6e   :  { %2684 = vxpose.xlu1.b32.cont [14/16] (narrow) %v2683_v9, 64 }
  0x72   :  { %184 = vxpose.xlu0.b32.cont [15/16] (narrow) %v2392_v60, 64 }
  0x76   :  { %2686 = vxpose.xlu1.b32.cont [15/16] (narrow) %v2685_v16, 64 }
  0x7a   :  { %185 = vxpose.xlu0.b32.end [16/16] (narrow) %v2393_v4, 64 }
  0x7e   :  { %2688 = vxpose.xlu1.b32.end [16/16] (narrow) %v2687_v23, 64 }
  0xa6   :  { %v186_v32 = vpop.trf.xlu0 }
  0xa7   :  { %310 = vmatmul.f32.vlgmr.msra.gmra.mxu1 %v186_v32 }
  0xa8   :  { %335 = vmatpush.msra.mxu1 %v265_v33 }
  0xaa   :  { %336 = vmatpush.msra.mxu1 %v264_v34  ;;  %v2689_v51 = vpop.trf.xlu1  ;;  %v3200_v34 = vld [vmem:[%s4724_s3] ss:$0 sm:$0xff] }
  0xab   :  { %v2690_v52 = vunpack.i.l.bf16 %v2689_v51  ;;  %v2693_v9 = vunpack.i.h.bf16 %v2689_v51 }
  0xac   :  { %337 = vmatpush.msra.mxu1 %v263_v35  ;;  %v2802_v35 = vmov 0  }
  0xad   :  { %286 = vmatmul.f32.vlgmr.msra.gmra.mxu0 %v2690_v52  ;;  %2729 = vset.pattern.permute.xlu2 %v2802_v35 }
  0xae   :  { %v187_v37 = vpop.trf.xlu0  ;;  %338 = vmatpush.msra.mxu1 %v262_v36  ;;  %v632_v36 = vld [vmem:[%s4726_s7 + $0x38] sm:$0xff] }
  0xaf   :  { %313 = vmatmul.f32.gmra.mxu1 %v187_v37  ;;  %678 = vperm.xlu2 %2729, %v632_v36  }
  0xb0   :  { %339 = vmatpush.msra.mxu1 %v261_v38 }
  0xb2   :  { %340 = vmatpush.msra.mxu1 %v260_v39  ;;  %v2694_v55 = vpop.trf.xlu1 }
  0xb3   :  { %v2695_v56 = vunpack.i.l.bf16 %v2694_v55  ;;  %v2698_v11 = vunpack.i.h.bf16 %v2694_v55 }
  0xb4   :  { %341 = vmatpush.msra.mxu1 %v259_v40 }
  0xb5   :  { %289 = vmatmul.f32.gmra.mxu0 %v2695_v56 }
  0xb6   :  { %v188_v42 = vpop.trf.xlu0  ;;  %342 = vmatpush.msra.mxu1 %v258_v41 }
  0xb7   :  { %316 = vmatmul.f32.gmra.mxu1 %v188_v42  ;;  %v631_v42 = vld [vmem:[%s4726_s7 + $0x30] sm:$0xff] }
  0xb8   :  { %343 = vmatpush.msra.mxu1 %v257_v43  ;;  %673 = vperm.xlu2 %2729, %v631_v42   ;;  %v590_v42 = vld [vmem:[%s4729_s1 + $0xe8] sm:$0xff] }
  0xba   :  { %344 = vmatpush.msra.mxu1 %v256_v44  ;;  %v2699_v58 = vpop.trf.xlu1 }
  0xbb   :  { %v2700_v59 = vunpack.i.l.bf16 %v2699_v58  ;;  %v2703_v13 = vunpack.i.h.bf16 %v2699_v58 }
  0xbc   :  { %345 = vmatpush.msra.mxu1 %v255_v45 }
  0xbd   :  { %292 = vmatmul.f32.gmra.mxu0 %v2700_v59  ;;  %v628_v59 = vld [vmem:[%s4726_s7 + $0x18] sm:$0xff] }
  0xbe   :  { %v189_v47 = vpop.trf.xlu0  ;;  %346 = vmatpush.msra.mxu1 %v254_v46 }
  0xbf   :  { %319 = vmatmul.f32.gmra.mxu1 %v189_v47 }
  0xc0   :  { %347 = vmatpush.msra.mxu1 %v253_v48  ;;  %v630_v48 = vld [vmem:[%s4726_s7 + $0x28] sm:$0xff] }
  0xc1   :  { %668 = vperm.xlu2 %2729, %v630_v48  }
  0xc2   :  { %348 = vmatpush.msra.mxu1 %v252_v49  ;;  %v2704_v61 = vpop.trf.xlu1 }
  0xc3   :  { %v2705_v62 = vunpack.i.l.bf16 %v2704_v61  ;;  %v2708_v17 = vunpack.i.h.bf16 %v2704_v61 }
  0xc4   :  { %349 = vmatpush.msra.mxu1 %v251_v50 }
  0xc5   :  { %295 = vmatmul.f32.gmra.mxu0 %v2705_v62 }
  0xc6   :  { %v190_v54 = vpop.trf.xlu0  ;;  %350 = vmatpush.msra.mxu1 %v250_v53  ;;  %v629_v53 = vld [vmem:[%s4726_s7 + $0x20] sm:$0xff] }
  0xc7   :  { %322 = vmatmul.f32.gmra.mxu1 %v190_v54 }
  0xc9   :  { %663 = vperm.xlu2 %2729, %v629_v53   ;;  %v569_v53 = vld [vmem:[%s4729_s1 + $0x40] sm:$0xff] }
  0xca   :  { %v2709_v0 = vpop.trf.xlu1 }
  0xcb   :  { %v2710_v1 = vunpack.i.l.bf16 %v2709_v0  ;;  %v2713_v23 = vunpack.i.h.bf16 %v2709_v0 }
  0xcd   :  { %298 = vmatmul.f32.gmra.mxu0 %v2710_v1  ;;  %v627_v1 = vld [vmem:[%s4726_s7 + $0x10] sm:$0xff] }
  0xce   :  { %v191_v57 = vpop.trf.xlu0 }
  0xcf   :  { %325 = vmatmul.f32.gmra.mxu1 %v191_v57 }
  0xd1   :  { %2730 = vset.pattern.permute.xlu1 %v2802_v35  ;;  %658 = vperm.xlu2 %2729, %v628_v59   ;;  %v584_v59 = vld [vmem:[%s4729_s1 + $0xb8] sm:$0xff] }
  0xd2   :  { %v2714_v2 = vpop.trf.xlu1 }
  0xd3   :  { %v2715_v3 = vunpack.i.l.bf16 %v2714_v2  ;;  %v2718_v27 = vunpack.i.h.bf16 %v2714_v2 }
  0xd5   :  { %301 = vmatmul.f32.gmra.mxu0 %v2715_v3 }
  0xd6   :  { %v192_v60 = vpop.trf.xlu0 }
  0xd7   :  { %328 = vmatmul.f32.gmra.mxu1 %v192_v60 }
  0xd9   :  { %653 = vperm.xlu2 %2729, %v627_v1   ;;  %v565_v1 = vld [vmem:[%s4729_s1 + $0x20] sm:$0xff] }
  0xda   :  { %v2719_v4 = vpop.trf.xlu1 }
  0xdb   :  { %v2720_v5 = vunpack.i.l.bf16 %v2719_v4  ;;  %v2723_v30 = vunpack.i.h.bf16 %v2719_v4 }
  0xdd   :  { %304 = vmatmul.f32.gmra.mxu0 %v2720_v5 }
  0xde   :  { %v193_v63 = vpop.trf.xlu0 }
  0xdf   :  { %331 = vmatmul.f32.gmra.mxu1 %v193_v63 }
  0xe1   :  { %2731 = vset.pattern.permute.xlu0 %v2802_v35  ;;  %v592_v35 = vld [vmem:[%s4729_s1 + $0xf8] sm:$0xff] }
  0xe2   :  { %v2724_v6 = vpop.trf.xlu1  ;;  %786 = vmatpush.msrb.mxu2 %v592_v35  ;;  %v3398_v35 = vld [vmem:[%s4730_s6 + $0x28] sm:$0xff] }
  0xe3   :  { %v2725_v7 = vunpack.i.l.bf16 %v2724_v6  ;;  %v2728_v33 = vunpack.i.h.bf16 %v2724_v6 }
  0xe5   :  { %307 = vmatmul.f32.gmra.mxu0 %v2725_v7  ;;  %v626_v7 = vld [vmem:[%s4726_s7 + $0x8] sm:$0xff] }
  0xe6   :  { %648 = vperm.xlu2 %2729, %v626_v7  }
  0xe7   :  { %2647 = vmatmul.lmr.bf16.vlgmr.msra.gmra.8.mxu1 }
  0xef   :  { %2648 = vmatmul.lmr.bf16.gmra.8.mxu1 }
  0xf7   :  { %2649 = vmatmul.lmr.bf16.gmra.8.mxu1 }
  0xff   :  { %2650 = vmatmul.lmr.bf16.gmra.8.mxu1 }
 0x107   :  { %2651 = vmatmul.lmr.bf16.gmra.8.mxu1 }
 0x10f   :  { %2652 = vmatmul.lmr.bf16.gmra.8.mxu1 }
 0x117   :  { %2653 = vmatmul.lmr.bf16.gmra.8.mxu1 }
 0x11f   :  { %2654 = vmatmul.lmr.bf16.gmra.8.mxu1 }
 0x124   :  { %v3157_v8 = vpop.f32.mrf.mxu1 }
 0x125   :  { %v312_v24 = vadd.f32 %v3200_v34, %v3157_v8  ;;  %v575_v8 = vld [vmem:[%s4729_s1 + $0x70] sm:$0xff] }
 0x127   :  { %375 = vmatmul.f32.gmra.mxu1 %v2693_v9 }
 0x12a   :  { %v287_v28 = vpop.f32.mrf.mxu0 }
 0x12b   :  { %v288_v37 = vadd.f32 %v3200_v34, %v287_v28 }
 0x12c   :  { %v3159_v10 = vpop.f32.mrf.mxu1 }
 0x12f   :  { %378 = vmatmul.f32.gmra.mxu1 %v2698_v11 }
 0x132   :  { %v290_v31 = vpop.f32.mrf.mxu0 }
 0x133   :  { %v291_v43 = vadd.f32 %v3200_v34, %v290_v31  ;;  %v576_v31 = vld [vmem:[%s4729_s1 + $0x78] sm:$0xff] }
 0x134   :  { %v3161_v12 = vpop.f32.mrf.mxu1  ;;  %721 = vmatpush.msrb.mxu3 %v576_v31 }
 0x136   :  { %722 = vmatpush.msrb.mxu3 %v575_v8  ;;  %v875_v8 = vld [vmem:[%s4728_s9] sm:$0xff] }
 0x137   :  { %381 = vmatmul.f32.gmra.mxu1 %v2703_v13 }
 0x13a   :  { %v293_v39 = vpop.f32.mrf.mxu0 }
 0x13b   :  { %v294_v49 = vadd.f32 %v3200_v34, %v293_v39 }
 0x13c   :  { %v3169_v16 = vpop.f32.mrf.mxu1 }
 0x13f   :  { %384 = vmatmul.f32.gmra.mxu1 %v2708_v17  ;;  %v625_v17 = vld [vmem:[%s4726_s7] sm:$0xff] }
 0x140   :  { %643 = vperm.xlu2 %2729, %v625_v17   ;;  %v578_v17 = vld [vmem:[%s4729_s1 + $0x88] sm:$0xff] }
 0x142   :  { %v296_v46 = vpop.f32.mrf.mxu0 }
 0x143   :  { %v297_v55 = vadd.f32 %v3200_v34, %v296_v46  ;;  %v571_v46 = vld [vmem:[%s4729_s1 + $0x50] sm:$0xff] }
 0x144   :  { %v3183_v22 = vpop.f32.mrf.mxu1 }
 0x145   :  { %v324_v7 = vadd.f32 %v3200_v34, %v3183_v22  ;;  %v561_v22 = vld [vmem:[%s4729_s1] sm:$0xff] }
 0x147   :  { %387 = vmatmul.f32.gmra.mxu1 %v2713_v23  ;;  %v882_v23 = vld [vmem:[%s4728_s9 + $0x38] sm:$0xff] }
 0x148   :  { %920 = vperm.xlu2 %2729, %v882_v23  }
 0x14a   :  { %v299_v54 = vpop.f32.mrf.mxu0 }
 0x14b   :  { %v300_v60 = vadd.f32 %v3200_v34, %v299_v54  ;;  %v586_v54 = vld [vmem:[%s4729_s1 + $0xc8] sm:$0xff] }
 0x14c   :  { %v3191_v26 = vpop.f32.mrf.mxu1 }
 0x14f   :  { %390 = vmatmul.f32.gmra.mxu1 %v2718_v27 }
 0x152   :  { %v302_v61 = vpop.f32.mrf.mxu0 }
 0x153   :  { %v303_v2 = vadd.f32 %v3200_v34, %v302_v61 }
 0x154   :  { %v3193_v29 = vpop.f32.mrf.mxu1 }
 0x157   :  { %393 = vmatmul.f32.gmra.mxu1 %v2723_v30  ;;  %v881_v30 = vld [vmem:[%s4728_s9 + $0x30] sm:$0xff] }
 0x158   :  { %915 = vperm.xlu2 %2729, %v881_v30  }
 0x15a   :  { %v305_v4 = vpop.f32.mrf.mxu0 }
 0x15b   :  { %v306_v9 = vadd.f32 %v3200_v34, %v305_v4  ;;  %v581_v4 = vld [vmem:[%s4729_s1 + $0xa0] sm:$0xff] }
 0x15c   :  { %v3195_v32 = vpop.f32.mrf.mxu1 }
 0x15f   :  { %396 = vmatmul.f32.gmra.mxu1 %v2728_v33  ;;  %v315_v33 = vadd.f32 %v3200_v34, %v3159_v10  ;;  %v591_v10 = vld [vmem:[%s4729_s1 + $0xf0] sm:$0xff] }
 0x160   :  { %787 = vmatpush.msrb.mxu2 %v591_v10  ;;  %v640_v10 = vld [vmem:[%s4726_s7 + $0x78] sm:$0xff] }
 0x162   :  { %v308_v14 = vpop.f32.mrf.mxu0  ;;  %788 = vmatpush.msrb.mxu2 %v590_v42  ;;  %v636_v42 = vld [vmem:[%s4726_s7 + $0x58] sm:$0xff] }
 0x163   :  { %v309_v18 = vadd.f32 %v3200_v34, %v308_v14 }
 0x164   :  { %v352_v38 = vpop.f32.mrf.mxu1 }
 0x165   :  { %v353_v40 = vadd.f32 %v352_v38, %v288_v37  ;;  %v574_v38 = vld [vmem:[%s4729_s1 + $0x68] sm:$0xff] }
 0x166   :  { %723 = vmatpush.msrb.mxu3 %v574_v38 }
 0x167   :  { %v400_v41 = vmax.f32 %v353_v40, 0.0  ;;  %v880_v40 = vld [vmem:[%s4728_s9 + $0x28] sm:$0xff] }
 0x168   :  { %910 = vperm.xlu2 %2729, %v880_v40   ;;  %v3425_v40 = vld [vmem:[%s4730_s6 + $0x48] sm:$0xff] }
 0x169   :  { %2410 = vmatmul.msk.f32.vlgmr.msra.gmra.mxu2 %vm428_vm0, %v400_v41  ;;  %v573_v41 = vld [vmem:[%s4729_s1 + $0x60] sm:$0xff] }
 0x16a   :  { %724 = vmatpush.msrb.mxu3 %v573_v41  ;;  %v3431_v41 = vld [vmem:[%s4730_s6 + $0x10] sm:$0xff] }
 0x16c   :  { %v355_v44 = vpop.f32.mrf.mxu1 }
 0x16d   :  { %v356_v45 = vadd.f32 %v355_v44, %v291_v43  ;;  %v572_v43 = vld [vmem:[%s4729_s1 + $0x58] sm:$0xff]  ;;  %v589_v44 = vld [vmem:[%s4729_s1 + $0xe0] sm:$0xff] }
 0x16e   :  { %725 = vmatpush.msrb.mxu3 %v572_v43  ;;  %789 = vmatpush.msrb.mxu2 %v589_v44  ;;  %v3440_v43 = vld [vmem:[%s4730_s6 + $0x58] sm:$0xff]  ;;  %v3446_v44 = vld [vmem:[%s4730_s6 + $0x20] sm:$0xff] }
 0x16f   :  { %v401_v47 = vmax.f32 %v356_v45, 0.0  ;;  %v318_v45 = vadd.f32 %v3200_v34, %v3161_v12  ;;  %v587_v12 = vld [vmem:[%s4729_s1 + $0xd0] sm:$0xff] }
 0x170   :  { %726 = vmatpush.msrb.mxu3 %v571_v46  ;;  %v635_v46 = vld [vmem:[%s4726_s7 + $0x50] sm:$0xff] }
 0x171   :  { %2411 = vmatmul.msk.f32.gmra.mxu2 %vm428_vm0, %v401_v47  ;;  %v588_v47 = vld [vmem:[%s4729_s1 + $0xd8] sm:$0xff] }
 0x172   :  { %790 = vmatpush.msrb.mxu2 %v588_v47  ;;  %v3457_v47 = vld [vmem:[%s4730_s6 + $0x68] sm:$0xff] }
 0x173   :  { %4756 = vst [vmem:[#allocation2_spill] sm:$0xff] %v3457_v47 }
 0x174   :  { %v358_v50 = vpop.f32.mrf.mxu1  ;;  %791 = vmatpush.msrb.mxu2 %v587_v12  ;;  %v3474_v12 = vld [vmem:[%s4730_s6 + $0x78] sm:$0xff] }
 0x175   :  { %v359_v51 = vadd.f32 %v358_v50, %v294_v49  ;;  %v570_v50 = vld [vmem:[%s4729_s1 + $0x48] sm:$0xff]  ;;  %4757 = vst [vmem:[#allocation3_spill] sm:$0xff] %v3474_v12 }
 0x176   :  { %727 = vmatpush.msrb.mxu3 %v570_v50  ;;  %792 = vmatpush.msrb.mxu2 %v586_v54  ;;  %v3494_v54 = vld [vmem:[%s4730_s6 + $0x50] sm:$0xff] }
 0x177   :  { %v402_v52 = vmax.f32 %v359_v51, 0.0 }
 0x178   :  { %728 = vmatpush.msrb.mxu3 %v569_v53 }
 0x179   :  { %2412 = vmatmul.msk.f32.gmra.mxu2 %vm428_vm0, %v402_v52  ;;  %v879_v52 = vld [vmem:[%s4728_s9 + $0x20] sm:$0xff] }
 0x17a   :  { %905 = vperm.xlu2 %2729, %v879_v52   ;;  %v3486_v52 = vld [vmem:[%s4730_s6 + $0x88] sm:$0xff] }
 0x17b   :  { %4758 = vst [vmem:[#allocation4_spill] sm:$0xff] %v3486_v52 }
 0x17c   :  { %v361_v56 = vpop.f32.mrf.mxu1 }
 0x17d   :  { %v362_v57 = vadd.f32 %v361_v56, %v297_v55  ;;  %v568_v55 = vld [vmem:[%s4729_s1 + $0x38] sm:$0xff]  ;;  %v585_v56 = vld [vmem:[%s4729_s1 + $0xc0] sm:$0xff] }
 0x17e   :  { %729 = vmatpush.msrb.mxu3 %v568_v55  ;;  %793 = vmatpush.msrb.mxu2 %v585_v56  ;;  %v3500_v55 = vld [vmem:[%s4730_s6 + $0x98] sm:$0xff] }
 0x17f   :  { %v403_v58 = vmax.f32 %v362_v57, 0.0  ;;  %v321_v57 = vadd.f32 %v3200_v34, %v3169_v16  ;;  %v583_v16 = vld [vmem:[%s4729_s1 + $0xb0] sm:$0xff]  ;;  %4759 = vst [vmem:[#allocation5_spill] sm:$0xff] %v3500_v55 }
 0x180   :  { %794 = vmatpush.msrb.mxu2 %v584_v59  ;;  %v3520_v59 = vld [vmem:[%s4730_s6 + $0x70] sm:$0xff] }
 0x181   :  { %2413 = vmatmul.msk.f32.gmra.mxu2 %vm428_vm0, %v403_v58  ;;  %v567_v58 = vld [vmem:[%s4729_s1 + $0x30] sm:$0xff]  ;;  %4761 = vst [vmem:[#allocation7_spill] sm:$0xff] %v3520_v59 }
 0x182   :  { %730 = vmatpush.msrb.mxu3 %v567_v58  ;;  %795 = vmatpush.msrb.mxu2 %v583_v16  ;;  %v3514_v58 = vld [vmem:[%s4730_s6 + $0xa8] sm:$0xff] }
 0x183   :  { %4760 = vst [vmem:[#allocation6_spill] sm:$0xff] %v3514_v58 }
 0x184   :  { %v364_v62 = vpop.f32.mrf.mxu1 }
 0x185   :  { %v365_v63 = vadd.f32 %v364_v62, %v300_v60  ;;  %v566_v62 = vld [vmem:[%s4729_s1 + $0x28] sm:$0xff] }
 0x186   :  { %731 = vmatpush.msrb.mxu3 %v566_v62  ;;  %v3534_v62 = vld [vmem:[%s4730_s6 + $0x80] sm:$0xff] }
 0x187   :  { %v404_v0 = vmax.f32 %v365_v63, 0.0  ;;  %4763 = vst [vmem:[#allocation9_spill] sm:$0xff] %v3534_v62 }
 0x188   :  { %732 = vmatpush.msrb.mxu3 %v565_v1  ;;  %v3550_v1 = vpop.permute.xlu2 %678 }
 0x189   :  { %2414 = vmatmul.msk.f32.gmra.mxu2 %vm428_vm0, %v404_v0  ;;  %v878_v0 = vld [vmem:[%s4728_s9 + $0x18] sm:$0xff] }
 0x18a   :  { %900 = vperm.xlu2 %2729, %v878_v0   ;;  %v3548_v0 = vld [vmem:[%s4730_s6 + $0x90] sm:$0xff] }
 0x18b   :  { %4765 = vst [vmem:[#allocation11_spill] sm:$0xff] %v3548_v0 }
 0x18c   :  { %v367_v3 = vpop.f32.mrf.mxu1 }
 0x18d   :  { %v368_v5 = vadd.f32 %v367_v3, %v303_v2  ;;  %v582_v2 = vld [vmem:[%s4729_s1 + $0xa8] sm:$0xff]  ;;  %v564_v3 = vld [vmem:[%s4729_s1 + $0x18] sm:$0xff] }
 0x18e   :  { %796 = vmatpush.msrb.mxu2 %v582_v2  ;;  %733 = vmatpush.msrb.mxu3 %v564_v3  ;;  %v3556_v2 = vld [vmem:[%s4730_s6 + $0xd8] sm:$0xff] }
 0x18f   :  { %v405_v6 = vmax.f32 %v368_v5, 0.0  ;;  %v563_v5 = vld [vmem:[%s4729_s1 + $0x10] sm:$0xff]  ;;  %4766 = vst [vmem:[#allocation12_spill] sm:$0xff] %v3556_v2 }
 0x190   :  { %797 = vmatpush.msrb.mxu2 %v581_v4  ;;  %734 = vmatpush.msrb.mxu3 %v563_v5  ;;  %v3566_v5 = vld [vmem:[%s4730_s6 + $0xa0] sm:$0xff] }
 0x191   :  { %2415 = vmatmul.msk.f32.gmra.mxu2 %vm428_vm0, %v405_v6  ;;  %v580_v6 = vld [vmem:[%s4729_s1 + $0x98] sm:$0xff]  ;;  %4768 = vst [vmem:[#allocation14_spill] sm:$0xff] %v3566_v5 }
 0x192   :  { %798 = vmatpush.msrb.mxu2 %v580_v6  ;;  %v674_v6 = vpop.permute.xlu2 %673 }
 0x194   :  { %v370_v11 = vpop.f32.mrf.mxu1 }
 0x195   :  { %v371_v13 = vadd.f32 %v370_v11, %v306_v9  ;;  %v562_v9 = vld [vmem:[%s4729_s1 + $0x8] sm:$0xff] }
 0x196   :  { %735 = vmatpush.msrb.mxu3 %v562_v9 }
 0x197   :  { %v406_v15 = vmax.f32 %v371_v13, 0.0  ;;  %v579_v13 = vld [vmem:[%s4729_s1 + $0x90] sm:$0xff] }
 0x198   :  { %799 = vmatpush.msrb.mxu2 %v579_v13  ;;  %736 = vmatpush.msrb.mxu3 %v561_v22  ;;  %v3582_v13 = vld [vmem:[%s4730_s6 + $0xb0] sm:$0xff] }
 0x199   :  { %2416 = vmatmul.msk.f32.gmra.mxu2 %vm428_vm0, %v406_v15  ;;  %v877_v15 = vld [vmem:[%s4728_s9 + $0x10] sm:$0xff]  ;;  %4771 = vst [vmem:[#allocation17_spill] sm:$0xff] %v3582_v13 }
 0x19a   :  { %895 = vperm.xlu2 %2729, %v877_v15   ;;  %800 = vmatpush.msrb.mxu2 %v578_v17  ;;  %v669_v15 = vpop.permute.xlu2 %668  ;;  %v3596_v17 = vld [vmem:[%s4730_s6 + $0xc0] sm:$0xff] }
 0x19b   :  { %4774 = vst [vmem:[#allocation20_spill] sm:$0xff] %v3596_v17 }
 0x19c   :  { %v373_v19 = vpop.f32.mrf.mxu1 }
 0x19d   :  { %v374_v20 = vadd.f32 %v373_v19, %v309_v18  ;;  %v577_v19 = vld [vmem:[%s4729_s1 + $0x80] sm:$0xff] }
 0x19e   :  { %801 = vmatpush.msrb.mxu2 %v577_v19 }
 0x19f   :  { %v407_v21 = vmax.f32 %v374_v20, 0.0  ;;  %v3374_v20 = vld [vmem:[%s4730_s6 + $0x8] sm:$0xff] }
 0x1a1   :  { %2417 = vmatmul.msk.f32.gmra.mxu2 %vm428_vm0, %v407_v21  ;;  %v327_v21 = vadd.f32 %v3200_v34, %v3191_v26  ;;  %v330_v26 = vadd.f32 %v3200_v34, %v3193_v29  ;;  %v333_v29 = vadd.f32 %v3200_v34, %v3195_v32  ;;  %v3416_v32 = vld [vmem:[%s4730_s6] sm:$0xff]  ;;  %v639_v34 = vld [vmem:[%s4726_s7 + $0x70] sm:$0xff] }
 0x1a4   :  { %v376_v25 = vpop.f32.mrf.mxu1 }
 0x1a5   :  { %v377_v27 = vadd.f32 %v376_v25, %v312_v24 }
 0x1a7   :  { %v408_v28 = vmax.f32 %v377_v27, 0.0  ;;  %v876_v27 = vld [vmem:[%s4728_s9 + $0x8] sm:$0xff] }
 0x1a8   :  { %890 = vperm.xlu2 %2729, %v876_v27   ;;  %v3616_v27 = vld [vmem:[%s4730_s6 + $0xe0] sm:$0xff] }
 0x1a9   :  { %2418 = vmatmul.msk.f32.gmra.mxu2 %vm428_vm0, %v408_v28  ;;  %v3386_v28 = vld [vmem:[%s4730_s6 + $0x18] sm:$0xff]  ;;  %4779 = vst [vmem:[#allocation25_spill] sm:$0xff] %v3616_v27 }
 0x1ac   :  { %v379_v36 = vpop.f32.mrf.mxu1 }
 0x1ad   :  { %v380_v37 = vadd.f32 %v379_v36, %v315_v33 }
 0x1af   :  { %v409_v39 = vmax.f32 %v380_v37, 0.0 }
 0x1b0   :  { %885 = vperm.xlu2 %2729, %v875_v8   ;;  %v3630_v8 = vld [vmem:[%s4726_s7 + $0x60] sm:$0xff] }
 0x1b1   :  { %2419 = vmatmul.msk.f32.vlgmr.msra.gmra.mxu3 %vm428_vm0, %v409_v39  ;;  %802 = vmatmul.f32.vlgmr.msrb.gmra.mxu2 %v3374_v20  ;;  %v3410_v39 = vld [vmem:[%s4730_s6 + $0x38] sm:$0xff]  ;;  %4782 = vst [vmem:[#allocation28_spill] sm:$0xff] %v3630_v8 }
 0x1b2   :  { %703 = vperm.xlu0 %2731, %v3630_v8  }
 0x1b4   :  { %v382_v48 = vpop.f32.mrf.mxu1 }
 0x1b5   :  { %v383_v49 = vadd.f32 %v382_v48, %v318_v45  ;;  %v3463_v48 = vld [vmem:[%s4730_s6 + $0x30] sm:$0xff] }
 0x1b7   :  { %v410_v51 = vmax.f32 %v383_v49, 0.0  ;;  %v634_v49 = vld [vmem:[%s4726_s7 + $0x48] sm:$0xff] }
 0x1b8   :  { %718 = vperm.xlu2 %2729, %v640_v10  }
 0x1b9   :  { %2420 = vmatmul.msk.f32.gmra.mxu3 %vm428_vm0, %v410_v51  ;;  %805 = vmatmul.f32.gmra.mxu2 %v3386_v28  ;;  %v3480_v51 = vld [vmem:[%s4730_s6 + $0x40] sm:$0xff] }
 0x1bc   :  { %v385_v60 = vpop.f32.mrf.mxu1 }
 0x1bd   :  { %v386_v61 = vadd.f32 %v385_v60, %v321_v57  ;;  %v3508_v57 = vld [vmem:[%s4730_s6 + $0x60] sm:$0xff] }
 0x1bf   :  { %v411_v63 = vmax.f32 %v386_v61, 0.0  ;;  %v3528_v61 = vld [vmem:[%s4730_s6 + $0xb8] sm:$0xff] }
 0x1c0   :  { %713 = vperm.xlu2 %2729, %v639_v34   ;;  %4762 = vst [vmem:[#allocation8_spill] sm:$0xff] %v3528_v61 }
 0x1c1   :  { %2421 = vmatmul.msk.f32.gmra.mxu3 %vm428_vm0, %v411_v63  ;;  %808 = vmatmul.f32.gmra.mxu2 %v3398_v35  ;;  %v3542_v63 = vld [vmem:[%s4730_s6 + $0xc8] sm:$0xff] }
 0x1c2   :  { %4764 = vst [vmem:[#allocation10_spill] sm:$0xff] %v3542_v63 }
 0x1c4   :  { %v388_v11 = vpop.f32.mrf.mxu1 }
 0x1c5   :  { %v389_v14 = vadd.f32 %v388_v11, %v324_v7  ;;  %v3572_v7 = vld [vmem:[%s4730_s6 + $0xe8] sm:$0xff] }
 0x1c6   :  { %4769 = vst [vmem:[#allocation15_spill] sm:$0xff] %v3572_v7 }
 0x1c7   :  { %v412_v18 = vmax.f32 %v389_v14, 0.0  ;;  %v3588_v14 = vld [vmem:[%s4730_s6 + $0xf8] sm:$0xff] }
 0x1c8   :  { %698 = vperm.xlu2 %2729, %v636_v42   ;;  %4772 = vst [vmem:[#allocation18_spill] sm:$0xff] %v3588_v14 }
 0x1c9   :  { %2422 = vmatmul.msk.f32.gmra.mxu3 %vm428_vm0, %v412_v18  ;;  %811 = vmatmul.f32.gmra.mxu2 %v3410_v39 }
 0x1cc   :  { %v391_v23 = vpop.f32.mrf.mxu1 }
 0x1cd   :  { %v392_v24 = vadd.f32 %v391_v23, %v327_v21  ;;  %v664_v21 = vpop.permute.xlu2 %663  ;;  %v3606_v23 = vld [vmem:[%s4730_s6 + $0xd0] sm:$0xff] }
 0x1ce   :  { %4777 = vst [vmem:[#allocation23_spill] sm:$0xff] %v3606_v23 }
 0x1cf   :  { %v413_v25 = vmax.f32 %v392_v24, 0.0 }
 0x1d0   :  { %693 = vperm.xlu2 %2729, %v635_v46  }
 0x1d1   :  { %2423 = vmatmul.msk.f32.gmra.mxu3 %vm428_vm0, %v413_v25  ;;  %814 = vmatmul.f32.gmra.mxu2 %v3425_v40 }
 0x1d4   :  { %v394_v30 = vpop.f32.mrf.mxu1 }
 0x1d5   :  { %v395_v31 = vadd.f32 %v394_v30, %v330_v26  ;;  %v659_v26 = vpop.permute.xlu2 %658 }
 0x1d7   :  { %v414_v33 = vmax.f32 %v395_v31, 0.0  ;;  %v3621_v31 = vld [vmem:[%s4726_s7 + $0x68] sm:$0xff] }
 0x1d8   :  { %688 = vperm.xlu2 %2729, %v634_v49   ;;  %4780 = vst [vmem:[#allocation26_spill] sm:$0xff] %v3621_v31  ;;  %708 = vperm.xlu1 %2730, %v3621_v31  }
 0x1d9   :  { %2424 = vmatmul.msk.f32.gmra.mxu3 %vm428_vm0, %v414_v33  ;;  %817 = vmatmul.f32.gmra.mxu2 %v3440_v43 }
 0x1dc   :  { %v397_v36 = vpop.f32.mrf.mxu1 }
 0x1dd   :  { %v398_v37 = vadd.f32 %v397_v36, %v333_v29  ;;  %v3635_v29 = vld [vmem:[%s4730_s6 + $0xf0] sm:$0xff]  ;;  %v654_v36 = vpop.permute.xlu2 %653 }
 0x1de   :  { %4783 = vst [vmem:[#allocation29_spill] sm:$0xff] %v3635_v29 }
 0x1df   :  { %v415_v38 = vmax.f32 %v398_v37, 0.0 }
 0x1e1   :  { %2425 = vmatmul.msk.f32.gmra.mxu3 %vm428_vm0, %v415_v38  ;;  %820 = vmatmul.f32.gmra.mxu2 %v3457_v47 }
 0x1e5   :  { %v649_v10 = vpop.permute.xlu2 %648 }
 0x1e9   :  { %737 = vmatmul.f32.vlgmr.msrb.gmra.mxu3 %v3416_v32  ;;  %823 = vmatmul.f32.gmra.mxu2 %v3474_v12 }
 0x1ec   :  { %v3448_v45 = vpop.f32.mrf.mxu2 }
 0x1ed   :  { %v644_v49 = vpop.permute.xlu2 %643 }
 0x1f1   :  { %740 = vmatmul.f32.gmra.mxu3 %v3431_v41  ;;  %826 = vmatmul.f32.gmra.mxu2 %v3486_v52 }
 0x1f4   :  { %v3468_v50 = vpop.f32.mrf.mxu2 }
 0x1f9   :  { %743 = vmatmul.f32.gmra.mxu3 %v3446_v44  ;;  %829 = vmatmul.f32.gmra.mxu2 %v3500_v55 }
 0x1fc   :  { %v3488_v53 = vpop.f32.mrf.mxu2 }
 0x201   :  { %746 = vmatmul.f32.gmra.mxu3 %v3463_v48  ;;  %832 = vmatmul.f32.gmra.mxu2 %v3514_v58 }
 0x204   :  { %v3503_v56 = vpop.f32.mrf.mxu2 }
 0x209   :  { %749 = vmatmul.f32.gmra.mxu3 %v3480_v51  ;;  %835 = vmatmul.f32.gmra.mxu2 %v3528_v61 }
 0x20c   :  { %v3522_v60 = vpop.f32.mrf.mxu2 }
 0x211   :  { %752 = vmatmul.f32.gmra.mxu3 %v3494_v54  ;;  %838 = vmatmul.f32.gmra.mxu2 %v3542_v63 }
 0x214   :  { %v3536_v16 = vpop.f32.mrf.mxu2 }
 0x219   :  { %755 = vmatmul.f32.gmra.mxu3 %v3508_v57  ;;  %841 = vmatmul.f32.gmra.mxu2 %v3556_v2 }
 0x21c   :  { %v3558_v3 = vpop.f32.mrf.mxu2 }
 0x221   :  { %758 = vmatmul.f32.gmra.mxu3 %v3520_v59  ;;  %844 = vmatmul.f32.gmra.mxu2 %v3572_v7 }
 0x224   :  { %v3577_v11 = vpop.f32.mrf.mxu2 }
 0x229   :  { %761 = vmatmul.f32.gmra.mxu3 %v3534_v62  ;;  %847 = vmatmul.f32.gmra.mxu2 %v3588_v14 }
 0x22c   :  { %v3598_v18 = vpop.f32.mrf.mxu2 }
 0x22d   :  { %4775 = vst [vmem:[#allocation21_spill] sm:$0xff] %v3598_v18 }
 0x231   :  { %764 = vmatmul.f32.gmra.mxu3 %v3548_v0 }
 0x234   :  { %v3560_v4 = vpop.f32.mrf.mxu3  ;;  %v3608_v24 = vpop.f32.mrf.mxu2 }
 0x235   :  { %4767 = vst [vmem:[#allocation13_spill] sm:$0xff] %v3560_v4 }
 0x239   :  { %767 = vmatmul.f32.gmra.mxu3 %v3566_v5 }
 0x23c   :  { %v3574_v9 = vpop.f32.mrf.mxu3  ;;  %v806_v30 = vpop.f32.mrf.mxu2 }
 0x23d   :  { %4770 = vst [vmem:[#allocation16_spill] sm:$0xff] %v3574_v9 }
 0x241   :  { %770 = vmatmul.f32.gmra.mxu3 %v3582_v13 }
 0x244   :  { %v3590_v22 = vpop.f32.mrf.mxu3  ;;  %v809_v37 = vpop.f32.mrf.mxu2 }
 0x245   :  { %4773 = vst [vmem:[#allocation19_spill] sm:$0xff] %v3590_v22 }
 0x249   :  { %773 = vmatmul.f32.gmra.mxu3 %v3596_v17 }
 0x24c   :  { %v3601_v19 = vpop.f32.mrf.mxu3  ;;  %v812_v34 = vpop.f32.mrf.mxu2 }
 0x24d   :  { %4776 = vst [vmem:[#allocation22_spill] sm:$0xff] %v3601_v19  ;;  %v3641_v19 = vpop.permute.xlu2 %920 }
 0x251   :  { %776 = vmatmul.f32.gmra.mxu3 %v3606_v23 }
 0x254   :  { %v3611_v25 = vpop.f32.mrf.mxu3 }
 0x255   :  { %4778 = vst [vmem:[#allocation24_spill] sm:$0xff] %v3611_v25  ;;  %v3643_v4 = vpop.permute.xlu2 %915 }
 0x259   :  { %779 = vmatmul.f32.gmra.mxu3 %v3616_v27 }
 0x25c   :  { %v3625_v33 = vpop.f32.mrf.mxu3 }
 0x25d   :  { %4781 = vst [vmem:[#allocation27_spill] sm:$0xff] %v3625_v33  ;;  %v815_v33 = vpop.f32.mrf.mxu2  ;;  %v3645_v31 = vpop.permute.xlu2 %910 }
 0x261   :  { %782 = vmatmul.f32.gmra.mxu3 %v3635_v29 }
 0x264   :  { %v3639_v38 = vpop.f32.mrf.mxu3 }
 0x265   :  { %4784 = vst [vmem:[#allocation30_spill] sm:$0xff] %v3639_v38  ;;  %v818_v22 = vpop.f32.mrf.mxu2  ;;  %v3647_v7 = vpop.permute.xlu2 %905 }
 0x26c   :  { %v738_v42 = vpop.f32.mrf.mxu3 }
 0x26d   :  { %v821_v18 = vpop.f32.mrf.mxu2  ;;  %v3652_v61 = vpop.permute.xlu2 %900 }
 0x274   :  { %v741_v46 = vpop.f32.mrf.mxu3 }
 0x275   :  { %v824_v14 = vpop.f32.mrf.mxu2 }
 0x27c   :  { %v744_v25 = vpop.f32.mrf.mxu3 }
 0x27d   :  { %v3649_v27 = vpop.f32.mrf.mxu2  ;;  %v745_v12 = vadd.f32 %v744_v25, %v654_v36  ;;  %v3686_v25 = vld [vmem:[%s4731_s8 + $0x10] sm:$0xff] }
 0x27e   :  { %4785 = vst [vmem:[#allocation31_spill] sm:$0xff] %v3649_v27 }
 0x284   :  { %v747_v9 = vpop.f32.mrf.mxu3 }
 0x285   :  { %v3654_v55 = vpop.f32.mrf.mxu2  ;;  %v748_v0 = vadd.f32 %v747_v9, %v659_v26 }
 0x28c   :  { %v750_v8 = vpop.f32.mrf.mxu3 }
 0x28d   :  { %v751_v13 = vadd.f32 %v750_v8, %v664_v21 }
 0x28f   :  { %v816_v59 = vadd.f32 %v815_v33, %v751_v13  ;;  %v870_v33 = vld [vmem:[%s4731_s8 + $0x18] sm:$0xff] }
 0x294   :  { %v753_v29 = vpop.f32.mrf.mxu3 }
 0x295   :  { %v754_v63 = vadd.f32 %v753_v29, %v669_v15  ;;  %v813_v15 = vadd.f32 %v812_v34, %v748_v0  ;;  %v810_v29 = vadd.f32 %v809_v37, %v745_v12  ;;  %v3668_v12 = vld [vmem:[%s4731_s8] sm:$0xff] }
 0x296   :  { %v871_v37 = vld [vmem:[%s4731_s8 + $0x20] sm:$0xff] }
 0x297   :  { %v819_v52 = vadd.f32 %v818_v22, %v754_v63  ;;  %v854_v63 = vmax.f32 %v813_v15, 0.0  ;;  %v3677_v22 = vld [vmem:[%s4731_s8 + $0x8] sm:$0xff]  ;;  %v709_v15 = vpop.permute.xlu1 %708 }
 0x29c   :  { %v756_v38 = vpop.f32.mrf.mxu3 }
 0x29d   :  { %v757_v2 = vadd.f32 %v756_v38, %v674_v6  ;;  %v742_v6 = vadd.f32 %v741_v46, %v649_v10 }
 0x29f   :  { %v822_v58 = vadd.f32 %v821_v18, %v757_v2  ;;  %v855_v2 = vmax.f32 %v816_v59, 0.0 }
 0x2a1   :  { %v857_v47 = vmax.f32 %v822_v58, 0.0  ;;  %v853_v58 = vmax.f32 %v810_v29, 0.0 }
 0x2a4   :  { %v759_v23 = vpop.f32.mrf.mxu3 }
 0x2a5   :  { %v760_v17 = vadd.f32 %v759_v23, %v3550_v1  ;;  %v856_v1 = vmax.f32 %v819_v52, 0.0  ;;  %v739_v23 = vadd.f32 %v738_v42, %v644_v49  ;;  %v872_v42 = vld [vmem:[%s4731_s8 + $0x28] sm:$0xff] }
 0x2a7   :  { %v825_v5 = vadd.f32 %v824_v14, %v760_v17  ;;  %v3658_v14 = vpop.permute.xlu2 %895  ;;  %v807_v17 = vadd.f32 %v806_v30, %v742_v6 }
 0x2a9   :  { %v858_v62 = vmax.f32 %v825_v5, 0.0  ;;  %v3660_v5 = vpop.f32.mrf.mxu2 }
 0x2ab   :  { %955 = vmatpush.msrb.mxu0 %v858_v62  ;;  %v804_v62 = vadd.f32 %v3608_v24, %v739_v23 }
 0x2ac   :  { %v3656_v27 = vpop.f32.mrf.mxu3 }
 0x2ad   :  { %956 = vmatpush.msrb.mxu0 %v857_v47  ;;  %v852_v47 = vmax.f32 %v807_v17, 0.0  ;;  %v851_v52 = vmax.f32 %v804_v62, 0.0 }
 0x2af   :  { %957 = vmatpush.msrb.mxu0 %v856_v1  ;;  %v3672_v59 = vpop.permute.xlu2 %890 }
 0x2b1   :  { %958 = vmatpush.msrb.mxu0 %v855_v2  ;;  %v836_v0 = vpop.f32.mrf.mxu2  ;;  %v3705_v2 = vld [vmem:[%s4731_s8 + $0x30] sm:$0xff] }
 0x2b3   :  { %959 = vmatpush.msrb.mxu0 %v854_v63  ;;  %v704_v63 = vpop.permute.xlu0 %703 }
 0x2b4   :  { %v3663_v9 = vpop.f32.mrf.mxu3 }
 0x2b5   :  { %960 = vmatpush.msrb.mxu0 %v853_v58 }
 0x2b7   :  { %961 = vmatpush.msrb.mxu0 %v852_v47  ;;  %v3681_v21 = vpop.permute.xlu2 %885 }
 0x2b9   :  { %962 = vmatpush.msrb.mxu0 %v851_v52  ;;  %v839_v24 = vpop.f32.mrf.mxu2 }
 0x2ba   :  { %2426 = vmatmul.msk.f32.vlgmr.msrb.gmra.mxu0 %vm428_vm0, %v3668_v12 }
 0x2bc   :  { %v768_v13 = vpop.f32.mrf.mxu3 }
 0x2bf   :  { %v719_v30 = vpop.permute.xlu2 %718 }
 0x2c1   :  { %v842_v8 = vpop.f32.mrf.mxu2 }
 0x2c2   :  { %2427 = vmatmul.msk.f32.gmra.mxu0 %vm428_vm0, %v3677_v22 }
 0x2c4   :  { %v771_v18 = vpop.f32.mrf.mxu3 }
 0x2c7   :  { %v714_v38 = vpop.permute.xlu2 %713 }
 0x2c9   :  { %v845_v10 = vpop.f32.mrf.mxu2 }
 0x2ca   :  { %2428 = vmatmul.msk.f32.gmra.mxu0 %vm428_vm0, %v3686_v25 }
 0x2cc   :  { %v774_v26 = vpop.f32.mrf.mxu3 }
 0x2cd   :  { %v775_v52 = vadd.f32 %v774_v26, %v704_v63 }
 0x2cf   :  { %v699_v46 = vpop.permute.xlu2 %698 }
 0x2d1   :  { %v848_v49 = vpop.f32.mrf.mxu2 }
 0x2d2   :  { %2429 = vmatmul.msk.f32.gmra.mxu0 %vm428_vm0, %v870_v33 }
 0x2d4   :  { %v777_v36 = vpop.f32.mrf.mxu3 }
 0x2d5   :  { %v778_v17 = vadd.f32 %v777_v36, %v709_v15  ;;  %v3714_v36 = vld [vmem:[%s4731_s8 + $0x38] sm:$0xff] }
 0x2d7   :  { %v843_v47 = vadd.f32 %v842_v8, %v778_v17 }
 0x2da   :  { %2430 = vmatmul.msk.f32.gmra.mxu0 %vm428_vm0, %v871_v37  ;;  %v864_v37 = vmax.f32 %v843_v47, 0.0 }
 0x2dc   :  { %v780_v34 = vpop.f32.mrf.mxu3 }
 0x2dd   :  { %v781_v1 = vadd.f32 %v780_v34, %v714_v38  ;;  %v840_v38 = vadd.f32 %v839_v24, %v775_v52 }
 0x2df   :  { %v846_v62 = vadd.f32 %v845_v10, %v781_v1  ;;  %v772_v10 = vadd.f32 %v771_v18, %v699_v46  ;;  %v863_v34 = vmax.f32 %v840_v38, 0.0 }
 0x2e1   :  { %v865_v33 = vmax.f32 %v846_v62, 0.0  ;;  %v837_v26 = vadd.f32 %v836_v0, %v772_v10 }
 0x2e2   :  { %2431 = vmatmul.msk.f32.gmra.mxu0 %vm428_vm0, %v872_v42 }
 0x2e4   :  { %v783_v6 = vpop.f32.mrf.mxu3 }
 0x2e5   :  { %v784_v23 = vadd.f32 %v783_v6, %v719_v30  ;;  %v694_v30 = vpop.permute.xlu2 %693  ;;  %v862_v6 = vmax.f32 %v837_v26, 0.0 }
 0x2e6   :  { %v769_v8 = vadd.f32 %v768_v13, %v694_v30 }
 0x2e7   :  { %v849_v29 = vadd.f32 %v848_v49, %v784_v23 }
 0x2e8   :  { %v834_v24 = vadd.f32 %v3660_v5, %v769_v8 }
 0x2e9   :  { %v866_v58 = vmax.f32 %v849_v29, 0.0 }
 0x2ea   :  { %2432 = vmatmul.msk.f32.gmra.mxu0 %vm428_vm0, %v3705_v2  ;;  %v861_v46 = vmax.f32 %v834_v24, 0.0  ;;  %v2473_v24 = vld [vmem:[%s4729_s1 + $0x178] sm:$0xff] }
 0x2eb   :  { %2442 = vmatpush.xpose.msk.msra.mxu3 %vm1077_vm1, %v866_v58  ;;  %1416 = vmatpush.msra.mxu0 %v2473_v24 }
 0x2ed   :  { %v689_v42 = vpop.permute.xlu2 %688 }
 0x2ee   :  { %v766_v49 = vadd.f32 %v3663_v9, %v689_v42 }
 0x2ef   :  { %2443 = vmatpush.xpose.msk.msra.mxu3 %vm1077_vm1, %v865_v33 }
 0x2f0   :  { %v831_v18 = vadd.f32 %v3654_v55, %v766_v49 }
 0x2f2   :  { %2433 = vmatmul.msk.f32.gmra.mxu0 %vm428_vm0, %v3714_v36  ;;  %v860_v15 = vmax.f32 %v831_v18, 0.0  ;;  %v2471_v18 = vld [vmem:[%s4729_s1 + $0x168] sm:$0xff] }
 0x2f3   :  { %2444 = vmatpush.xpose.msk.msra.mxu3 %vm1077_vm1, %v864_v37 }
 0x2f7   :  { %2445 = vmatpush.xpose.msk.msra.mxu3 %vm1077_vm1, %v863_v34 }
 0x2fb   :  { %2446 = vmatpush.xpose.msk.msra.mxu3 %vm1077_vm1, %v862_v6 }
 0x2ff   :  { %2447 = vmatpush.xpose.msk.msra.mxu3 %vm1077_vm1, %v861_v46  ;;  %v2487_v46 = vld [vmem:[%s4729_s1 + $0x1e8] sm:$0xff] }
 0x303   :  { %2448 = vmatpush.xpose.msk.msra.mxu3 %vm1077_vm1, %v860_v15  ;;  %v2470_v15 = vld [vmem:[%s4729_s1 + $0x160] sm:$0xff] }
 0x337   :  { %v964_v13 = vpop.f32.mrf.mxu0 }
 0x33f   :  { %v967_v0 = vpop.f32.mrf.mxu0 }
 0x347   :  { %v970_v1 = vpop.f32.mrf.mxu0 }
 0x348   :  { %v971_v37 = vadd.f32 %v970_v1, %v3658_v14  ;;  %v2485_v1 = vld [vmem:[%s4729_s1 + $0x1d8] sm:$0xff] }
 0x34a   :  { %v990_v10 = vmax.f32 %v971_v37, 0.0  ;;  %v2479_v37 = vld [vmem:[%s4729_s1 + $0x1a8] sm:$0xff] }
 0x34f   :  { %v973_v23 = vpop.f32.mrf.mxu0 }
 0x350   :  { %v974_v33 = vadd.f32 %v973_v23, %v3652_v61  ;;  %v2468_v23 = vld [vmem:[%s4729_s1 + $0x150] sm:$0xff] }
 0x357   :  { %v976_v29 = vpop.f32.mrf.mxu0 }
 0x358   :  { %v977_v47 = vadd.f32 %v976_v29, %v3647_v7  ;;  %v965_v7 = vadd.f32 %v964_v13, %v3681_v21  ;;  %v2486_v13 = vld [vmem:[%s4729_s1 + $0x1e0] sm:$0xff]  ;;  %v2484_v29 = vld [vmem:[%s4729_s1 + $0x1d0] sm:$0xff] }
 0x35a   :  { %v992_v38 = vmax.f32 %v977_v47, 0.0  ;;  %v988_v14 = vmax.f32 %v965_v7, 0.0  ;;  %v2464_v47 = vld [vmem:[%s4729_s1 + $0x130] sm:$0xff]  ;;  %v2477_v7 = vld [vmem:[%s4729_s1 + $0x198] sm:$0xff] }
 0x35f   :  { %v979_v17 = vpop.f32.mrf.mxu0 }
 0x360   :  { %v980_v55 = vadd.f32 %v979_v17, %v3645_v31  ;;  %v991_v31 = vmax.f32 %v974_v33, 0.0 }
 0x362   :  { %v993_v30 = vmax.f32 %v980_v55, 0.0  ;;  %v2465_v55 = vld [vmem:[%s4729_s1 + $0x138] sm:$0xff] }
 0x367   :  { %v982_v9 = vpop.f32.mrf.mxu0 }
 0x368   :  { %v983_v5 = vadd.f32 %v982_v9, %v3643_v4  ;;  %v3735_v4 = vld [vmem:[%s4727_s5] ss:$0 sm:$0xff]  ;;  %v2467_v9 = vld [vmem:[%s4729_s1 + $0x148] sm:$0xff] }
 0x369   :  { %v495_v61 = vadd.f32 %v3735_v4, %v3448_v45  ;;  %v501_v21 = vadd.f32 %v3735_v4, %v3488_v53  ;;  %v504_v45 = vadd.f32 %v3735_v4, %v3503_v56  ;;  %v2489_v53 = vld [vmem:[%s4729_s1 + $0x1f8] sm:$0xff]  ;;  %v2488_v56 = vld [vmem:[%s4729_s1 + $0x1f0] sm:$0xff]  ;;  %v507_v6 = vadd.f32 %v3735_v4, %v3522_v60 }
 0x36a   :  { %v994_v52 = vmax.f32 %v983_v5, 0.0  ;;  %v510_v17 = vadd.f32 %v3735_v4, %v3536_v16  ;;  %v2466_v5 = vld [vmem:[%s4729_s1 + $0x140] sm:$0xff]  ;;  %v513_v33 = vadd.f32 %v3735_v4, %v3558_v3 }
 0x36b   :  { %v542_v8 = vmax.f32 %v495_v61, 0.0  ;;  %v544_v42 = vmax.f32 %v501_v21, 0.0  ;;  %v545_v49 = vmax.f32 %v504_v45, 0.0  ;;  %v546_v60 = vmax.f32 %v507_v6, 0.0  ;;  %v2476_v61 = vld [vmem:[%s4729_s1 + $0x190] sm:$0xff]  ;;  %v4792_v45 = vld [vmem:[#allocation5_spill] sm:$0xff] }
 0x36c   :  { %v547_v16 = vmax.f32 %v510_v17, 0.0  ;;  %v548_v3 = vmax.f32 %v513_v33, 0.0  ;;  %v4794_v6 = vld [vmem:[#allocation6_spill] sm:$0xff] }
 0x36f   :  { %v985_v63 = vpop.f32.mrf.mxu0 }
 0x370   :  { %v986_v62 = vadd.f32 %v985_v63, %v3641_v19  ;;  %v968_v19 = vadd.f32 %v967_v0, %v3672_v59  ;;  %v498_v59 = vadd.f32 %v3735_v4, %v3468_v50  ;;  %v2472_v50 = vld [vmem:[%s4729_s1 + $0x170] sm:$0xff]  ;;  %v2469_v0 = vld [vmem:[%s4729_s1 + $0x158] sm:$0xff]  ;;  %v2483_v63 = vld [vmem:[%s4729_s1 + $0x1c8] sm:$0xff] }
 0x371   :  { %1417 = vmatpush.msra.mxu0 %v2472_v50 }
 0x372   :  { %v995_v58 = vmax.f32 %v986_v62, 0.0  ;;  %v989_v34 = vmax.f32 %v968_v19, 0.0  ;;  %v543_v26 = vmax.f32 %v498_v59, 0.0  ;;  %v2482_v62 = vld [vmem:[%s4729_s1 + $0x1c0] sm:$0xff] }
 0x373   :  { %1418 = vmatpush.msra.mxu0 %v2471_v18  ;;  %v2478_v19 = vld [vmem:[%s4729_s1 + $0x1a0] sm:$0xff]  ;;  %v4795_v18 = vld [vmem:[#allocation17_spill] sm:$0xff] }
 0x374   :  { %1028 = vmatpush.msra.mxu1 %v995_v58  ;;  %v2481_v58 = vld [vmem:[%s4729_s1 + $0x1b8] sm:$0xff]  ;;  %v2458_v59 = vld [vmem:[%s4729_s1 + $0x100] sm:$0xff] }
 0x375   :  { %1419 = vmatpush.msra.mxu0 %v2470_v15 }
 0x376   :  { %1029 = vmatpush.msra.mxu1 %v994_v52  ;;  %v2480_v52 = vld [vmem:[%s4729_s1 + $0x1b0] sm:$0xff] }
 0x377   :  { %1420 = vmatpush.msra.mxu0 %v2469_v0  ;;  %v4796_v0 = vld [vmem:[#allocation8_spill] sm:$0xff] }
 0x378   :  { %1030 = vmatpush.msra.mxu1 %v993_v30  ;;  %v2463_v30 = vld [vmem:[%s4729_s1 + $0x128] sm:$0xff] }
 0x379   :  { %1421 = vmatpush.msra.mxu0 %v2468_v23 }
 0x37a   :  { %1031 = vmatpush.msra.mxu1 %v992_v38  ;;  %v2462_v38 = vld [vmem:[%s4729_s1 + $0x120] sm:$0xff] }
 0x37b   :  { %1422 = vmatpush.msra.mxu0 %v2467_v9 }
 0x37c   :  { %1032 = vmatpush.msra.mxu1 %v991_v31  ;;  %v2461_v31 = vld [vmem:[%s4729_s1 + $0x118] sm:$0xff] }
 0x37d   :  { %1423 = vmatpush.msra.mxu0 %v2466_v5  ;;  %v4799_v5 = vld [vmem:[#allocation23_spill] sm:$0xff] }
 0x37e   :  { %1033 = vmatpush.msra.mxu1 %v990_v10  ;;  %v2460_v10 = vld [vmem:[%s4729_s1 + $0x110] sm:$0xff] }
 0x37f   :  { %1424 = vmatpush.msra.mxu0 %v2465_v55 }
 0x380   :  { %1034 = vmatpush.msra.mxu1 %v989_v34  ;;  %v516_v34 = vadd.f32 %v3735_v4, %v3577_v11 }
 0x381   :  { %1425 = vmatpush.msra.mxu0 %v2464_v47  ;;  %v4800_v47 = vld [vmem:[#allocation12_spill] sm:$0xff] }
 0x382   :  { %1035 = vmatpush.msra.mxu1 %v988_v14  ;;  %v2459_v14 = vld [vmem:[%s4729_s1 + $0x108] sm:$0xff]  ;;  %v549_v11 = vmax.f32 %v516_v34, 0.0  ;;  %v1326_v34 = vld [vmem:[%s4726_s7 + $0x30] sm:$0xff] }
 0x383   :  { %2434 = vmatmul.msk.f32.vlgmr.msra.gmra.mxu1 %vm428_vm0, %v542_v8  ;;  %1426 = vmatpush.msra.mxu0 %v2463_v30  ;;  %v2475_v8 = vld [vmem:[%s4729_s1 + $0x188] sm:$0xff] }
 0x384   :  { %1481 = vmatpush.msra.mxu1 %v2489_v53 }
 0x385   :  { %1427 = vmatpush.msra.mxu0 %v2462_v38 }
 0x386   :  { %1482 = vmatpush.msra.mxu1 %v2488_v56 }
 0x387   :  { %1428 = vmatpush.msra.mxu0 %v2461_v31 }
 0x388   :  { %1483 = vmatpush.msra.mxu1 %v2487_v46 }
 0x389   :  { %1429 = vmatpush.msra.mxu0 %v2460_v10  ;;  %v4804_v10 = vld [vmem:[#allocation18_spill] sm:$0xff] }
 0x38a   :  { %1484 = vmatpush.msra.mxu1 %v2486_v13 }
 0x38b   :  { %2435 = vmatmul.msk.f32.gmra.mxu1 %vm428_vm0, %v543_v26  ;;  %v2474_v26 = vld [vmem:[%s4729_s1 + $0x180] sm:$0xff]  ;;  %1430 = vmatpush.msra.mxu0 %v2459_v14 }
 0x38c   :  { %1485 = vmatpush.msra.mxu1 %v2485_v1  ;;  %v4797_v1 = vld [vmem:[#allocation20_spill] sm:$0xff] }
 0x38d   :  { %1431 = vmatpush.msra.mxu0 %v2458_v59 }
 0x38e   :  { %1486 = vmatpush.msra.mxu1 %v2484_v29  ;;  %1432 = vmatmul.f32.vlgmr.msra.gmra.mxu0 %v3416_v32  ;;  %v558_v32 = vlaneseq }
 0x390   :  { %1487 = vmatpush.msra.mxu1 %v2483_v63  ;;  %v4798_v63 = vld [vmem:[#allocation10_spill] sm:$0xff] }
 0x392   :  { %1488 = vmatpush.msra.mxu1 %v2482_v62 }
 0x393   :  { %2436 = vmatmul.msk.f32.gmra.mxu1 %vm428_vm0, %v544_v42 }
 0x394   :  { %1489 = vmatpush.msra.mxu1 %v2481_v58 }
 0x396   :  { %1490 = vmatpush.msra.mxu1 %v2480_v52  ;;  %1435 = vmatmul.f32.gmra.mxu0 %v3431_v41  ;;  %v4789_v41 = vld [vmem:[#allocation9_spill] sm:$0xff] }
 0x397   :  { %v4801_v52 = vld [vmem:[#allocation25_spill] sm:$0xff] }
 0x398   :  { %1491 = vmatpush.msra.mxu1 %v2479_v37 }
 0x39a   :  { %1492 = vmatpush.msra.mxu1 %v2478_v19  ;;  %v4802_v19 = vld [vmem:[#allocation15_spill] sm:$0xff] }
 0x39b   :  { %2437 = vmatmul.msk.f32.gmra.mxu1 %vm428_vm0, %v545_v49  ;;  %v4793_v49 = vld [vmem:[#allocation14_spill] sm:$0xff] }
 0x39c   :  { %1493 = vmatpush.msra.mxu1 %v2477_v7  ;;  %v1327_v7 = vld [vmem:[%s4726_s7 + $0x38] sm:$0xff] }
 0x39e   :  { %1494 = vmatpush.msra.mxu1 %v2476_v61  ;;  %1438 = vmatmul.f32.gmra.mxu0 %v3446_v44  ;;  %v3942_v61 = vld [vmem:[%s4726_s7 + $0x40] sm:$0xff] }
 0x3a0   :  { %1495 = vmatpush.msra.mxu1 %v2475_v8 }
 0x3a2   :  { %1496 = vmatpush.msra.mxu1 %v2474_v26 }
 0x3a3   :  { %2438 = vmatmul.msk.f32.gmra.mxu1 %vm428_vm0, %v546_v60 }
 0x3a6   :  { %1441 = vmatmul.f32.gmra.mxu0 %v3463_v48  ;;  %v4790_v48 = vld [vmem:[#allocation4_spill] sm:$0xff] }
 0x3ab   :  { %2439 = vmatmul.msk.f32.gmra.mxu1 %vm428_vm0, %v547_v16 }
 0x3ae   :  { %1444 = vmatmul.f32.gmra.mxu0 %v3480_v51  ;;  %v4791_v51 = vld [vmem:[#allocation11_spill] sm:$0xff] }
 0x3b3   :  { %2440 = vmatmul.msk.f32.gmra.mxu1 %vm428_vm0, %v548_v3  ;;  %v4803_v3 = vld [vmem:[#allocation29_spill] sm:$0xff] }
 0x3b6   :  { %1447 = vmatmul.f32.gmra.mxu0 %v3494_v54 }
 0x3bb   :  { %2441 = vmatmul.msk.f32.gmra.mxu1 %vm428_vm0, %v549_v11 }
 0x3be   :  { %1450 = vmatmul.f32.gmra.mxu0 %v3508_v57 }
 0x3c3   :  { %1497 = vmatmul.f32.vlgmr.msra.gmra.mxu1 %v3374_v20  ;;  %v4786_v20 = vld [vmem:[#allocation2_spill] sm:$0xff] }
 0x3cb   :  { %1500 = vmatmul.f32.gmra.mxu1 %v3386_v28  ;;  %v4787_v28 = vld [vmem:[#allocation7_spill] sm:$0xff] }
 0x3cc   :  { %1453 = vmatmul.f32.gmra.mxu0 %v4787_v28 }
 0x3d3   :  { %1503 = vmatmul.f32.gmra.mxu1 %v3398_v35  ;;  %v4788_v35 = vld [vmem:[#allocation3_spill] sm:$0xff] }
 0x3d4   :  { %1456 = vmatmul.f32.gmra.mxu0 %v4789_v41 }
 0x3db   :  { %1506 = vmatmul.f32.gmra.mxu1 %v3410_v39  ;;  %v3876_v39 = vand.u32 127, %v558_v32 }
 0x3dc   :  { %1459 = vmatmul.f32.gmra.mxu0 %v4791_v51 }
 0x3dd   :  { %vm560_vm2 = vcmp.ge.s32.totalorder %v3876_v39, 6 }
 0x3e3   :  { %1509 = vmatmul.f32.gmra.mxu1 %v3425_v40 }
 0x3e4   :  { %1462 = vmatmul.f32.gmra.mxu0 %v4793_v49 }
 0x3eb   :  { %1512 = vmatmul.f32.gmra.mxu1 %v3440_v43 }
 0x3ec   :  { %1465 = vmatmul.f32.gmra.mxu0 %v4795_v18 }
 0x3f3   :  { %1515 = vmatmul.f32.gmra.mxu1 %v4786_v20 }
 0x3f4   :  { %1468 = vmatmul.f32.gmra.mxu0 %v4797_v1 }
 0x3fb   :  { %1518 = vmatmul.f32.gmra.mxu1 %v4788_v35 }
 0x3fc   :  { %1471 = vmatmul.f32.gmra.mxu0 %v4799_v5 }
 0x400   :  { %v1037_v44 = vpop.f32.mrf.mxu1 }
 0x401   :  { %v1061_v40 = vmul.f32 0.125, %v1037_v44 }
 0x403   :  { %v3881_v43 = vsel %vm560_vm2, -1e+30, %v1061_v40  ;;  %1521 = vmatmul.f32.gmra.mxu1 %v4790_v48 }
 0x404   :  { %v1078_v54 = vsel %vm1077_vm1, %v3881_v43, -inf  ;;  %1474 = vmatmul.f32.gmra.mxu0 %v4801_v52 }
 0x405   :  { %1079 = vmax.xlane.f32.xlu0 %v1078_v54 }
 0x408   :  { %v1040_v57 = vpop.f32.mrf.mxu1 }
 0x409   :  { %v1062_v21 = vmul.f32 0.125, %v1040_v57 }
 0x40b   :  { %v3889_v42 = vsel %vm560_vm2, -1e+30, %v1062_v21  ;;  %1524 = vmatmul.f32.gmra.mxu1 %v4792_v45  ;;  %v3952_v26 = vpop.f32.mrf.mxu0 }
 0x40c   :  { %v1081_v24 = vsel %vm1077_vm1, %v3889_v42, -inf  ;;  %1477 = vmatmul.f32.gmra.mxu0 %v4803_v3 }
 0x40d   :  { %1082 = vmax.xlane.f32.xlu1 %v1081_v24 }
 0x410   :  { %v1043_v50 = vpop.f32.mrf.mxu1 }
 0x411   :  { %v1063_v53 = vmul.f32 0.125, %v1043_v50 }
 0x413   :  { %v3897_v56 = vsel %vm560_vm2, -1e+30, %v1063_v53  ;;  %1527 = vmatmul.f32.gmra.mxu1 %v4794_v6  ;;  %v3958_v28 = vpop.f32.mrf.mxu0 }
 0x414   :  { %v1084_v46 = vsel %vm1077_vm1, %v3897_v56, -inf }
 0x415   :  { %1085 = vmax.xlane.f32.xlu2 %v1084_v46 }
 0x418   :  { %v1046_v15 = vpop.f32.mrf.mxu1 }
 0x419   :  { %v1064_v13 = vmul.f32 0.125, %v1046_v15 }
 0x41b   :  { %v3905_v60 = vsel %vm560_vm2, -1e+30, %v1064_v13  ;;  %1530 = vmatmul.f32.gmra.mxu1 %v4796_v0  ;;  %v3963_v48 = vpop.f32.mrf.mxu0 }
 0x41c   :  { %v1087_v23 = vsel %vm1077_vm1, %v3905_v60, -inf }
 0x41d   :  { %1088 = vmax.xlane.f32.xlu2 %v1087_v23 }
 0x420   :  { %v1049_v29 = vpop.f32.mrf.mxu1 }
 0x421   :  { %v1065_v17 = vmul.f32 0.125, %v1049_v29 }
 0x423   :  { %v3913_v9 = vsel %vm560_vm2, -1e+30, %v1065_v17  ;;  %1533 = vmatmul.f32.gmra.mxu1 %v4798_v63  ;;  %v3975_v50 = vpop.f32.mrf.mxu0 }
 0x424   :  { %v1090_v62 = vsel %vm1077_vm1, %v3913_v9, -inf }
 0x425   :  { %1091 = vmax.xlane.f32.xlu2 %v1090_v62 }
 0x428   :  { %v1052_v16 = vpop.f32.mrf.mxu1 }
 0x429   :  { %v1066_v55 = vmul.f32 0.125, %v1052_v16 }
 0x42b   :  { %v3921_v58 = vsel %vm560_vm2, -1e+30, %v1066_v55  ;;  %1536 = vmatmul.f32.gmra.mxu1 %v4800_v47  ;;  %v3986_v0 = vpop.f32.mrf.mxu0 }
 0x42c   :  { %v1093_v33 = vsel %vm1077_vm1, %v3921_v58, -inf }
 0x42d   :  { %1094 = vmax.xlane.f32.xlu1 %v1093_v33 }
 0x430   :  { %v1055_v30 = vpop.f32.mrf.mxu1 }
 0x431   :  { %v1067_v37 = vmul.f32 0.125, %v1055_v30 }
 0x433   :  { %v3929_v38 = vsel %vm560_vm2, -1e+30, %v1067_v37  ;;  %1539 = vmatmul.f32.gmra.mxu1 %v4802_v19  ;;  %v3995_v5 = vpop.f32.mrf.mxu0 }
 0x434   :  { %v1096_v31 = vsel %vm1077_vm1, %v3929_v38, -inf }
 0x435   :  { %1097 = vmax.xlane.f32.xlu0 %v1096_v31 }
 0x438   :  { %v1058_v14 = vpop.f32.mrf.mxu1 }
 0x439   :  { %v1068_v8 = vmul.f32 0.125, %v1058_v14 }
 0x43b   :  { %1542 = vmatmul.f32.gmra.mxu1 %v4804_v10  ;;  %v3950_v59 = vsel %vm560_vm2, -1e+30, %v1068_v8  ;;  %v1451_v30 = vpop.f32.mrf.mxu0 }
 0x43c   :  { %v1099_v11 = vsel %vm1077_vm1, %v3950_v59, -inf }
 0x43d   :  { %1373 = vperm.xlu2 %2729, %v1327_v7  }
 0x440   :  { %v3956_v20 = vpop.f32.mrf.mxu1 }
 0x446   :  { %683 = vperm.xlu1 %2730, %v3942_v61  }
 0x448   :  { %v3961_v41 = vpop.f32.mrf.mxu1 }
 0x449   :  { %1368 = vperm.xlu0 %2731, %v1326_v34   ;;  %v1454_v10 = vpop.f32.mrf.mxu0 }
 0x450   :  { %v3970_v45 = vpop.f32.mrf.mxu1 }
 0x458   :  { %v3979_v6 = vpop.f32.mrf.mxu1 }
 0x460   :  { %v3988_v23 = vpop.f32.mrf.mxu1 }
 0x468   :  { %v4000_v47 = vpop.f32.mrf.mxu1 }
 0x470   :  { %1100 = vmax.xlane.f32.xlu1 %v1099_v11  ;;  %v1516_v31 = vpop.f32.mrf.mxu1 }
 0x478   :  { %v1080_v32 = vpop.xlane.xlu0 %1079  ;;  %v1519_v11 = vpop.f32.mrf.mxu1 }
 0x479   :  { %v1102_v35 = vsub.f32 %v3881_v43, %v1080_v32 }
 0x47b   :  { %v1110_v44 = vmul.f32 1.442695, %v1102_v35 }
 0x47d   :  { %2734 = vpow2.f32 %v1110_v44  ;;  %v4805_v44 = vld [vmem:[#allocation31_spill] sm:$0xff] }
 0x480   :  { %v1083_v40 = vpop.xlane.xlu1 %1082 }
 0x481   :  { %v1103_v51 = vsub.f32 %v3889_v42, %v1083_v40 }
 0x483   :  { %v3966_v54 = vpop.eup %2734  ;;  %v1112_v57 = vmul.f32 1.442695, %v1103_v51 }
 0x484   :  { %v1126_v21 = vsel %vm1077_vm1, %v3966_v54, 0.0 }
 0x485   :  { %2736 = vpow2.f32 %v1112_v57  ;;  %1127 = vadd.xlane.f32.xlu2 %v1126_v21 }
 0x488   :  { %v1086_v43 = vpop.xlane.xlu2 %1085 }
 0x489   :  { %v1104_v49 = vsub.f32 %v3897_v56, %v1086_v43 }
 0x48b   :  { %v3973_v24 = vpop.eup %2736  ;;  %v1114_v53 = vmul.f32 1.442695, %v1104_v49 }
 0x48c   :  { %v1129_v42 = vsel %vm1077_vm1, %v3973_v24, 0.0 }
 0x48d   :  { %2738 = vpow2.f32 %v1114_v53  ;;  %1130 = vadd.xlane.f32.xlu0 %v1129_v42  ;;  %v1324_v42 = vld [vmem:[%s4726_s7 + $0x20] sm:$0xff] }
 0x490   :  { %v1089_v18 = vpop.xlane.xlu2 %1088 }
 0x491   :  { %v1105_v46 = vsub.f32 %v3905_v60, %v1089_v18  ;;  %v1322_v18 = vld [vmem:[%s4726_s7 + $0x10] sm:$0xff] }
 0x493   :  { %v3982_v15 = vpop.eup %2738  ;;  %v1116_v13 = vmul.f32 1.442695, %v1105_v46  ;;  %v1321_v46 = vld [vmem:[%s4726_s7 + $0x8] sm:$0xff] }
 0x494   :  { %v1132_v56 = vsel %vm1077_vm1, %v3982_v15, 0.0 }
 0x495   :  { %2740 = vpow2.f32 %v1116_v13  ;;  %1133 = vadd.xlane.f32.xlu0 %v1132_v56  ;;  %v1320_v13 = vld [vmem:[%s4726_s7] sm:$0xff]  ;;  %v1577_v56 = vld [vmem:[%s4728_s9 + $0x38] sm:$0xff] }
 0x498   :  { %v1092_v1 = vpop.xlane.xlu2 %1091 }
 0x499   :  { %v1106_v29 = vsub.f32 %v3913_v9, %v1092_v1  ;;  %v1575_v1 = vld [vmem:[%s4728_s9 + $0x28] sm:$0xff] }
 0x49b   :  { %v3991_v17 = vpop.eup %2740  ;;  %v1118_v63 = vmul.f32 1.442695, %v1106_v29  ;;  %v1574_v29 = vld [vmem:[%s4728_s9 + $0x20] sm:$0xff] }
 0x49c   :  { %v1135_v60 = vsel %vm1077_vm1, %v3991_v17, 0.0 }
 0x49d   :  { %2742 = vpow2.f32 %v1118_v63  ;;  %1136 = vadd.xlane.f32.xlu2 %v1135_v60  ;;  %v1572_v63 = vld [vmem:[%s4728_s9 + $0x10] sm:$0xff] }
 0x4a0   :  { %v1095_v62 = vpop.xlane.xlu1 %1094  ;;  %v1374_v34 = vpop.permute.xlu2 %1373 }
 0x4a1   :  { %v1107_v16 = vsub.f32 %v3921_v58, %v1095_v62  ;;  %v1455_v8 = vadd.f32 %v1454_v10, %v1374_v34  ;;  %v1325_v34 = vld [vmem:[%s4726_s7 + $0x28] sm:$0xff] }
 0x4a3   :  { %v3998_v55 = vpop.eup %2742  ;;  %v1120_v52 = vmul.f32 1.442695, %v1107_v16  ;;  %v1520_v35 = vadd.f32 %v1519_v11, %v1455_v8 }
 0x4a4   :  { %v1138_v9 = vsel %vm1077_vm1, %v3998_v55, 0.0 }
 0x4a5   :  { %2744 = vpow2.f32 %v1120_v52  ;;  %1139 = vadd.xlane.f32.xlu0 %v1138_v9  ;;  %v1553_v43 = vmax.f32 %v1520_v35, 0.0  ;;  %v1571_v52 = vld [vmem:[%s4728_s9 + $0x8] sm:$0xff]  ;;  %v4806_v9 = vld [vmem:[#allocation26_spill] sm:$0xff] }
 0x4a8   :  { %v1098_v33 = vpop.xlane.xlu0 %1097 }
 0x4a9   :  { %v1108_v37 = vsub.f32 %v3929_v38, %v1098_v33 }
 0x4ab   :  { %v4005_v19 = vpop.eup %2744  ;;  %v1122_v3 = vmul.f32 1.442695, %v1108_v37 }
 0x4ac   :  { %v1141_v58 = vsel %vm1077_vm1, %v4005_v19, 0.0 }
 0x4ad   :  { %2746 = vpow2.f32 %v1122_v3  ;;  %1142 = vadd.xlane.f32.xlu2 %v1141_v58  ;;  %v4807_v3 = vld [vmem:[#allocation28_spill] sm:$0xff] }
 0x4b3   :  { %v4009_v7 = vpop.eup %2746 }
 0x4b4   :  { %v1144_v14 = vsel %vm1077_vm1, %v4009_v7, 0.0 }
 0x4b5   :  { %1145 = vadd.xlane.f32.xlu0 %v1144_v14 }
 0x4b8   :  { %v684_v38 = vpop.permute.xlu1 %683 }
 0x4b9   :  { %v763_v32 = vadd.f32 %v3656_v27, %v684_v38  ;;  %v1323_v27 = vld [vmem:[%s4726_s7 + $0x18] sm:$0xff] }
 0x4bb   :  { %v828_v40 = vadd.f32 %v4805_v44, %v763_v32  ;;  %v1369_v51 = vpop.permute.xlu0 %1368 }
 0x4bc   :  { %v1452_v57 = vadd.f32 %v1451_v30, %v1369_v51  ;;  %v1335_v30 = vld [vmem:[%s4726_s7 + $0x78] sm:$0xff] }
 0x4bd   :  { %v859_v21 = vmax.f32 %v828_v40, 0.0 }
 0x4be   :  { %v1517_v49 = vadd.f32 %v1516_v31, %v1452_v57 }
 0x4bf   :  { %2449 = vmatpush.xpose.msk.msra.mxu3 %vm1077_vm1, %v859_v21 }
 0x4c0   :  { %v1552_v53 = vmax.f32 %v1517_v49, 0.0 }
 0x4c3   :  { %1650 = vmatpush.msrb.mxu3 %v1553_v43 }
 0x4c5   :  { %1651 = vmatpush.msrb.mxu3 %v1552_v53  ;;  %1358 = vperm.xlu2 %2729, %v1324_v42  }
 0x4c9   :  { %1353 = vperm.xlu0 %2731, %v1323_v27  }
 0x4cd   :  { %1348 = vperm.xlu2 %2729, %v1322_v18  }
 0x4d1   :  { %1343 = vperm.xlu0 %2731, %v1321_v46   ;;  %v4087_v46 = vpop.f32.mrf.mxu1 }
 0x4d5   :  { %1338 = vperm.xlu2 %2729, %v1320_v13  }
 0x4d9   :  { %1615 = vperm.xlu0 %2731, %v1577_v56   ;;  %v4091_v56 = vpop.f32.mrf.mxu1 }
 0x4dd   :  { %1605 = vperm.xlu2 %2729, %v1575_v1  }
 0x4e1   :  { %1600 = vperm.xlu0 %2731, %v1574_v29  }
 0x4e3   :  { %v1101_v60 = vpop.xlane.xlu1 %1100 }
 0x4e4   :  { %v1109_v62 = vsub.f32 %v3950_v59, %v1101_v60  ;;  %v4112_v60 = vpop.f32.mrf.mxu1 }
 0x4e5   :  { %1590 = vperm.xlu2 %2729, %v1572_v63   ;;  %v4109_v63 = vld [vmem:[%s4732_s10 + $0x58] sm:$0xff] }
 0x4e6   :  { %v1124_v16 = vmul.f32 1.442695, %v1109_v62 }
 0x4e8   :  { %2748 = vpow2.f32 %v1124_v16 }
 0x4e9   :  { %1585 = vperm.xlu0 %2731, %v1571_v52   ;;  %v4120_v52 = vld [vmem:[%s4732_s10 + $0x48] sm:$0xff] }
 0x4ed   :  { %1403 = vperm.xlu2 %2729, %v4806_v9   ;;  %v4126_v9 = vld [vmem:[%s4732_s10 + $0x38] sm:$0xff] }
 0x4ee   :  { %v4048_v33 = vpop.eup %2748 }
 0x4ef   :  { %v1147_v37 = vsel %vm1077_vm1, %v4048_v33, 0.0 }
 0x4f0   :  { %1148 = vadd.xlane.f32.xlu1 %v1147_v37  ;;  %v4134_v37 = vld [vmem:[%s4732_s10 + $0x28] sm:$0xff] }
 0x4f1   :  { %1413 = vperm.xlu0 %2731, %v1335_v30   ;;  %v4128_v30 = vpop.f32.mrf.mxu1 }
 0x4f8   :  { %v1128_v59 = vpop.xlane.xlu2 %1127 }
 0x4f9   :  { %2750 = vrcp.f32 %v1128_v59  ;;  %1398 = vperm.xlu0 %2731, %v4807_v3   ;;  %v4140_v59 = vld [vmem:[%s4732_s10 + $0x18] sm:$0xff] }
 0x4ff   :  { %v2751_v58 = vpop.eup %2750 }
 0x500   :  { %v1158_v31 = vmul.f32 %v2751_v58, %v3966_v54  ;;  %v1131_v10 = vpop.xlane.xlu0 %1130  ;;  %v1576_v54 = vld [vmem:[%s4728_s9 + $0x30] sm:$0xff] }
 0x501   :  { %2752 = vrcp.f32 %v1131_v10 }
 0x502   :  { %2450 = vmatmul.msk.f32.vlgmr.msra.gmra.mxu3 %vm1077_vm1, %v1158_v31  ;;  %v4148_v31 = vld [vmem:[%s4732_s10 + $0x8] sm:$0xff] }
 0x507   :  { %v2753_v14 = vpop.eup %2752 }
 0x508   :  { %v1134_v8 = vpop.xlane.xlu0 %1133  ;;  %v1159_v11 = vmul.f32 %v2753_v14, %v3973_v24  ;;  %v1573_v24 = vld [vmem:[%s4728_s9 + $0x18] sm:$0xff]  ;;  %v4153_v14 = vpop.f32.mrf.mxu1 }
 0x509   :  { %2754 = vrcp.f32 %v1134_v8  ;;  %1363 = vperm.xlu1 %2730, %v1325_v34  }
 0x50a   :  { %2451 = vmatmul.msk.f32.gmra.mxu3 %vm1077_vm1, %v1159_v11 }
 0x50f   :  { %v2755_v38 = vpop.eup %2754 }
 0x510   :  { %v1137_v32 = vpop.xlane.xlu2 %1136  ;;  %v1160_v35 = vmul.f32 %v2755_v38, %v3982_v15  ;;  %v1570_v15 = vld [vmem:[%s4728_s9] sm:$0xff] }
 0x511   :  { %2756 = vrcp.f32 %v1137_v32  ;;  %1610 = vperm.xlu1 %2730, %v1576_v54  }
 0x512   :  { %2452 = vmatmul.msk.f32.gmra.mxu3 %vm1077_vm1, %v1160_v35  ;;  %v1537_v35 = vpop.f32.mrf.mxu1 }
 0x517   :  { %v2757_v44 = vpop.eup %2756 }
 0x518   :  { %v1140_v40 = vpop.xlane.xlu0 %1139  ;;  %v1161_v51 = vmul.f32 %v2757_v44, %v3991_v17  ;;  %v1334_v17 = vld [vmem:[%s4726_s7 + $0x70] sm:$0xff] }
 0x519   :  { %2758 = vrcp.f32 %v1140_v40  ;;  %1595 = vperm.xlu1 %2730, %v1573_v24  }
 0x51a   :  { %2453 = vmatmul.msk.f32.gmra.mxu3 %vm1077_vm1, %v1161_v51 }
 0x51f   :  { %v2759_v57 = vpop.eup %2758 }
 0x520   :  { %v1143_v21 = vpop.xlane.xlu2 %1142  ;;  %v1162_v43 = vmul.f32 %v2759_v57, %v3998_v55  ;;  %v4085_v55 = vpop.f32.mrf.mxu0 }
 0x521   :  { %2760 = vrcp.f32 %v1143_v21  ;;  %1580 = vperm.xlu1 %2730, %v1570_v15   ;;  %v1540_v15 = vpop.f32.mrf.mxu1 }
 0x522   :  { %2454 = vmatmul.msk.f32.gmra.mxu3 %vm1077_vm1, %v1162_v43 }
 0x527   :  { %v2761_v49 = vpop.eup %2760 }
 0x528   :  { %v1146_v53 = vpop.xlane.xlu0 %1145  ;;  %v1163_v42 = vmul.f32 %v2761_v49, %v4005_v19  ;;  %v4089_v13 = vpop.f32.mrf.mxu0  ;;  %v4096_v19 = vld [vmem:[%s4732_s10 + $0x78] sm:$0xff] }
 0x529   :  { %2762 = vrcp.f32 %v1146_v53  ;;  %1408 = vperm.xlu1 %2730, %v1334_v17   ;;  %2092 = vmatpush.msrb.mxu0 %v4096_v19  ;;  %v1359_v34 = vpop.permute.xlu2 %1358 }
 0x52a   :  { %2455 = vmatmul.msk.f32.gmra.mxu3 %vm1077_vm1, %v1163_v42  ;;  %v1446_v40 = vadd.f32 %v3986_v0, %v1359_v34 }
 0x52f   :  { %v2763_v27 = vpop.eup %2762 }
 0x530   :  { %v1164_v18 = vmul.f32 %v2763_v27, %v4009_v7  ;;  %v4101_v7 = vld [vmem:[%s4732_s10 + $0x68] sm:$0xff]  ;;  %v4103_v29 = vpop.f32.mrf.mxu0 }
 0x531   :  { %2093 = vmatpush.msrb.mxu0 %v4101_v7  ;;  %v1349_v32 = vpop.permute.xlu2 %1348 }
 0x532   :  { %2456 = vmatmul.msk.f32.gmra.mxu3 %vm1077_vm1, %v1164_v18  ;;  %v1440_v17 = vadd.f32 %v3963_v48, %v1349_v32 }
 0x533   :  { %2094 = vmatpush.msrb.mxu0 %v4109_v63 }
 0x534   :  { %v1505_v34 = vadd.f32 %v3970_v45, %v1440_v17 }
 0x535   :  { %2095 = vmatpush.msrb.mxu0 %v4120_v52 }
 0x537   :  { %2096 = vmatpush.msrb.mxu0 %v4126_v9 }
 0x538   :  { %v4115_v16 = vpop.f32.mrf.mxu0 }
 0x539   :  { %2097 = vmatpush.msrb.mxu0 %v4134_v37  ;;  %v1339_v51 = vpop.permute.xlu2 %1338 }
 0x53b   :  { %v1354_v1 = vpop.permute.xlu0 %1353  ;;  %2098 = vmatpush.msrb.mxu0 %v4140_v59 }
 0x53c   :  { %v1443_v21 = vadd.f32 %v3975_v50, %v1354_v1  ;;  %v1434_v50 = vadd.f32 %v3952_v26, %v1339_v51 }
 0x53d   :  { %2099 = vmatpush.msrb.mxu0 %v4148_v31 }
 0x53e   :  { %v1508_v53 = vadd.f32 %v3979_v6, %v1443_v21  ;;  %v1543_v6 = vpop.f32.mrf.mxu1 }
 0x540   :  { %v4150_v10 = vpop.f32.mrf.mxu0 }
 0x541   :  { %v4173_v1 = vpop.permute.xlu2 %1605 }
 0x543   :  { %v1344_v62 = vpop.permute.xlu0 %1343 }
 0x544   :  { %v1437_v42 = vadd.f32 %v3958_v28, %v1344_v62  ;;  %v1548_v62 = vmax.f32 %v1505_v34, 0.0 }
 0x546   :  { %v1502_v48 = vadd.f32 %v3961_v41, %v1437_v42 }
 0x548   :  { %v1472_v38 = vpop.f32.mrf.mxu0  ;;  %v1547_v26 = vmax.f32 %v1502_v48, 0.0 }
 0x54b   :  { %v4142_v3 = vpop.permute.xlu0 %1615 }
 0x550   :  { %v1475_v24 = vpop.f32.mrf.mxu0 }
 0x553   :  { %v4156_v54 = vpop.permute.xlu0 %1600 }
 0x558   :  { %v1478_v18 = vpop.f32.mrf.mxu0 }
 0x55b   :  { %v4159_v44 = vpop.permute.xlu0 %1585 }
 0x563   :  { %v1149_v58 = vpop.xlane.xlu1 %1148  ;;  %v1414_v0 = vpop.permute.xlu0 %1413 }
 0x564   :  { %2764 = vrcp.f32 %v1149_v58 }
 0x56a   :  { %v2765_v8 = vpop.eup %2764 }
 0x56b   :  { %v1165_v11 = vmul.f32 %v2765_v8, %v4048_v33  ;;  %v1511_v33 = vadd.f32 %v3988_v23, %v1446_v40  ;;  %v1549_v23 = vmax.f32 %v1508_v53, 0.0  ;;  %v1499_v8 = vadd.f32 %v3956_v20, %v1434_v50  ;;  %v1591_v20 = vpop.permute.xlu2 %1590 }
 0x56d   :  { %2457 = vmatmul.msk.f32.gmra.mxu3 %vm1077_vm1, %v1165_v11  ;;  %v1550_v58 = vmax.f32 %v1511_v33, 0.0  ;;  %v1546_v11 = vmax.f32 %v1499_v8, 0.0 }
 0x573   :  { %v1404_v21 = vpop.permute.xlu2 %1403 }
 0x574   :  { %v1473_v33 = vadd.f32 %v1472_v38, %v1404_v21 }
 0x576   :  { %v1538_v42 = vadd.f32 %v1537_v35, %v1473_v33 }
 0x57b   :  { %v1364_v57 = vpop.permute.xlu1 %1363 }
 0x57c   :  { %v1449_v43 = vadd.f32 %v3995_v5, %v1364_v57 }
 0x57e   :  { %v1514_v49 = vadd.f32 %v4000_v47, %v1449_v43  ;;  %v1479_v47 = vadd.f32 %v1478_v18, %v1414_v0  ;;  %v1559_v18 = vmax.f32 %v1538_v42, 0.0  ;;  %v2798_v0 = vld [vmem:[%s4731_s8 + $0x18] sm:$0xff] }
 0x580   :  { %v1551_v27 = vmax.f32 %v1514_v49, 0.0  ;;  %v1544_v45 = vadd.f32 %v1543_v6, %v1479_v47 }
 0x582   :  { %1652 = vmatpush.msrb.mxu3 %v1551_v27  ;;  %v1561_v40 = vmax.f32 %v1544_v45, 0.0 }
 0x583   :  { %v4171_v5 = vpop.permute.xlu1 %1610 }
 0x584   :  { %1653 = vmatpush.msrb.mxu3 %v1550_v58 }
 0x585   :  { %v4176_v28 = vpop.f32.mrf.mxu3 }
 0x586   :  { %1654 = vmatpush.msrb.mxu3 %v1549_v23  ;;  %2538 = vmatmul.msk.f32.vlgmr.msrb.gmra.mxu0 %vm428_vm0, %v4176_v28 }
 0x588   :  { %1655 = vmatpush.msrb.mxu3 %v1548_v62 }
 0x58a   :  { %1656 = vmatpush.msrb.mxu3 %v1547_v26 }
 0x58b   :  { %v1596_v32 = vpop.permute.xlu1 %1595 }
 0x58c   :  { %1657 = vmatpush.msrb.mxu3 %v1546_v11 }
 0x58d   :  { %v4181_v41 = vpop.f32.mrf.mxu3  ;;  %2490 = vmatmul.msk.f32.vlgmr.msrb.gmra.mxu3 %vm428_vm0, %v3668_v12  ;;  %v1399_v12 = vpop.permute.xlu0 %1398 }
 0x58e   :  { %2506 = vmatpush.xpose.msk.msra.mxu3 %vm1077_vm1, %v1561_v40  ;;  %2539 = vmatmul.msk.f32.gmra.mxu0 %vm428_vm0, %v4181_v41 }
 0x593   :  { %v1581_v51 = vpop.permute.xlu1 %1580 }
 0x595   :  { %v4188_v57 = vpop.f32.mrf.mxu3  ;;  %2491 = vmatmul.msk.f32.gmra.mxu3 %vm428_vm0, %v3677_v22  ;;  %v1470_v22 = vadd.f32 %v4150_v10, %v1399_v12 }
 0x596   :  { %2540 = vmatmul.msk.f32.gmra.mxu0 %vm428_vm0, %v4188_v57 }
 0x597   :  { %v1535_v38 = vadd.f32 %v4153_v14, %v1470_v22  ;;  %v2799_v14 = vld [vmem:[%s4731_s8 + $0x20] sm:$0xff] }
 0x59b   :  { %v1409_v43 = vpop.permute.xlu1 %1408 }
 0x59c   :  { %v1476_v17 = vadd.f32 %v1475_v24, %v1409_v43 }
 0x59d   :  { %v4194_v49 = vpop.f32.mrf.mxu3  ;;  %2492 = vmatmul.msk.f32.gmra.mxu3 %vm428_vm0, %v3686_v25  ;;  %v1558_v25 = vmax.f32 %v1535_v38, 0.0 }
 0x59e   :  { %v1541_v53 = vadd.f32 %v1540_v15, %v1476_v17  ;;  %2541 = vmatmul.msk.f32.gmra.mxu0 %vm428_vm0, %v4194_v49  ;;  %v2800_v15 = vld [vmem:[%s4731_s8 + $0x28] sm:$0xff] }
 0x5a0   :  { %v1560_v27 = vmax.f32 %v1541_v53, 0.0 }
 0x5a2   :  { %2507 = vmatpush.xpose.msk.msra.mxu3 %vm1077_vm1, %v1560_v27 }
 0x5a5   :  { %v4203_v24 = vpop.f32.mrf.mxu3  ;;  %2493 = vmatmul.msk.f32.gmra.mxu3 %vm428_vm0, %v2798_v0  ;;  %v1963_v0 = vld [vmem:[%s4732_s10 + $0x70] sm:$0xff] }
 0x5a6   :  { %2508 = vmatpush.xpose.msk.msra.mxu3 %vm1077_vm1, %v1559_v18  ;;  %2542 = vmatmul.msk.f32.gmra.mxu0 %vm428_vm0, %v4203_v24 }
 0x5aa   :  { %2509 = vmatpush.xpose.msk.msra.mxu3 %vm1077_vm1, %v1558_v25  ;;  %v1961_v25 = vld [vmem:[%s4732_s10 + $0x60] sm:$0xff] }
 0x5ad   :  { %v4213_v10 = vpop.f32.mrf.mxu3  ;;  %2494 = vmatmul.msk.f32.gmra.mxu3 %vm428_vm0, %v2799_v14  ;;  %v4811_v14 = vld [vmem:[#allocation19_spill] sm:$0xff] }
 0x5ae   :  { %2543 = vmatmul.msk.f32.gmra.mxu0 %vm428_vm0, %v4213_v10 }
 0x5b5   :  { %v4221_v35 = vpop.f32.mrf.mxu3  ;;  %2495 = vmatmul.msk.f32.gmra.mxu3 %vm428_vm0, %v2800_v15  ;;  %v528_v15 = vadd.f32 %v3735_v4, %v4811_v14 }
 0x5b6   :  { %2544 = vmatmul.msk.f32.gmra.mxu0 %vm428_vm0, %v4221_v35 }
 0x5bd   :  { %2496 = vmatmul.msk.f32.gmra.mxu3 %vm428_vm0, %v3705_v2 }
 0x5c5   :  { %2497 = vmatmul.msk.f32.gmra.mxu3 %vm428_vm0, %v3714_v36 }
 0x5f0   :  { %v4233_v58 = vpop.f32.mrf.mxu3 }
 0x5f1   :  { %2545 = vmatmul.msk.f32.gmra.mxu0 %vm428_vm0, %v4233_v58 }
 0x610   :  { %v1659_v34 = vpop.f32.mrf.mxu3 }
 0x618   :  { %v1662_v50 = vpop.f32.mrf.mxu3 }
 0x619   :  { %v1663_v12 = vadd.f32 %v1662_v50, %v4159_v44  ;;  %v1957_v50 = vld [vmem:[%s4732_s10 + $0x40] sm:$0xff] }
 0x61b   :  { %v1684_v22 = vmax.f32 %v1663_v12, 0.0 }
 0x620   :  { %v1665_v23 = vpop.f32.mrf.mxu3 }
 0x621   :  { %v1666_v33 = vadd.f32 %v1665_v23, %v1591_v20  ;;  %v4809_v20 = vld [vmem:[#allocation13_spill] sm:$0xff]  ;;  %v553_v23 = vmax.f32 %v528_v15, 0.0 }
 0x622   :  { %v522_v27 = vadd.f32 %v3735_v4, %v4809_v20 }
 0x623   :  { %v1685_v42 = vmax.f32 %v1666_v33, 0.0  ;;  %v4815_v33 = vld [vmem:[#allocation30_spill] sm:$0xff] }
 0x624   :  { %v551_v44 = vmax.f32 %v522_v27, 0.0 }
 0x628   :  { %v1668_v48 = vpop.f32.mrf.mxu3 }
 0x629   :  { %v1669_v21 = vadd.f32 %v1668_v48, %v1596_v32  ;;  %v1955_v48 = vld [vmem:[%s4732_s10 + $0x30] sm:$0xff] }
 0x62b   :  { %v1686_v53 = vmax.f32 %v1669_v21, 0.0 }
 0x630   :  { %v1671_v47 = vpop.f32.mrf.mxu3 }
 0x631   :  { %v1672_v11 = vadd.f32 %v1671_v47, %v4156_v54  ;;  %v2801_v47 = vld [vmem:[%s4727_s5] ss:$0 sm:$0xff] }
 0x633   :  { %v1687_v17 = vmax.f32 %v1672_v11, 0.0 }
 0x638   :  { %v1674_v6 = vpop.f32.mrf.mxu3 }
 0x639   :  { %v1675_v45 = vadd.f32 %v1674_v6, %v4173_v1  ;;  %v4812_v6 = vld [vmem:[#allocation22_spill] sm:$0xff] }
 0x63b   :  { %v1688_v43 = vmax.f32 %v1675_v45, 0.0  ;;  %v4813_v45 = vld [vmem:[#allocation24_spill] sm:$0xff] }
 0x640   :  { %v1677_v62 = vpop.f32.mrf.mxu3 }
 0x641   :  { %v1678_v26 = vadd.f32 %v1677_v62, %v4171_v5  ;;  %v1660_v5 = vadd.f32 %v1659_v34, %v1581_v51  ;;  %v4810_v51 = vld [vmem:[#allocation16_spill] sm:$0xff]  ;;  %v531_v62 = vadd.f32 %v2801_v47, %v4812_v6 }
 0x642   :  { %v525_v18 = vadd.f32 %v3735_v4, %v4810_v51  ;;  %v1959_v34 = vld [vmem:[%s4732_s10 + $0x50] sm:$0xff] }
 0x643   :  { %v1689_v40 = vmax.f32 %v1678_v26, 0.0  ;;  %v1683_v54 = vmax.f32 %v1660_v5, 0.0  ;;  %v1949_v26 = vld [vmem:[%s4732_s10] sm:$0xff] }
 0x644   :  { %v552_v38 = vmax.f32 %v525_v18, 0.0 }
 0x648   :  { %v1680_v8 = vpop.f32.mrf.mxu3 }
 0x649   :  { %v1681_v2 = vadd.f32 %v1680_v8, %v4142_v3  ;;  %v4808_v3 = vld [vmem:[#allocation21_spill] sm:$0xff]  ;;  %v1951_v8 = vld [vmem:[%s4732_s10 + $0x10] sm:$0xff] }
 0x64a   :  { %v519_v1 = vadd.f32 %v3735_v4, %v4808_v3  ;;  %v1953_v4 = vld [vmem:[%s4732_s10 + $0x20] sm:$0xff] }
 0x64b   :  { %v1690_v36 = vmax.f32 %v1681_v2, 0.0  ;;  %v554_v2 = vmax.f32 %v531_v62, 0.0  ;;  %v1329_v62 = vld [vmem:[%s4726_s7 + $0x48] sm:$0xff] }
 0x64c   :  { %v550_v32 = vmax.f32 %v519_v1, 0.0 }
 0x64d   :  { %1723 = vmatpush.msra.mxu2 %v1690_v36  ;;  %v534_v36 = vadd.f32 %v2801_v47, %v4813_v45 }
 0x64f   :  { %1724 = vmatpush.msra.mxu2 %v1689_v40  ;;  %v555_v11 = vmax.f32 %v534_v36, 0.0  ;;  %v4814_v40 = vld [vmem:[#allocation27_spill] sm:$0xff] }
 0x650   :  { %v537_v21 = vadd.f32 %v2801_v47, %v4814_v40 }
 0x651   :  { %1725 = vmatpush.msra.mxu2 %v1688_v43 }
 0x652   :  { %v556_v43 = vmax.f32 %v537_v21, 0.0 }
 0x653   :  { %1726 = vmatpush.msra.mxu2 %v1687_v17  ;;  %v540_v17 = vadd.f32 %v2801_v47, %v4815_v33 }
 0x655   :  { %1727 = vmatpush.msra.mxu2 %v1686_v53  ;;  %v557_v12 = vmax.f32 %v540_v17, 0.0 }
 0x657   :  { %1728 = vmatpush.msra.mxu2 %v1685_v42 }
 0x659   :  { %1729 = vmatpush.msra.mxu2 %v1684_v22  ;;  %v1330_v22 = vld [vmem:[%s4726_s7 + $0x50] sm:$0xff] }
 0x65b   :  { %1730 = vmatpush.msra.mxu2 %v1683_v54  ;;  %v1331_v54 = vld [vmem:[%s4726_s7 + $0x58] sm:$0xff] }
 0x65c   :  { %2498 = vmatmul.msk.f32.vlgmr.msra.gmra.mxu2 %vm428_vm0, %v550_v32 }
 0x65d   :  { %2027 = vmatpush.msrb.mxu2 %v1963_v0 }
 0x65f   :  { %2028 = vmatpush.msrb.mxu2 %v1961_v25 }
 0x661   :  { %2029 = vmatpush.msrb.mxu2 %v1959_v34 }
 0x663   :  { %2030 = vmatpush.msrb.mxu2 %v1957_v50 }
 0x664   :  { %2499 = vmatmul.msk.f32.gmra.mxu2 %vm428_vm0, %v551_v44 }
 0x665   :  { %2031 = vmatpush.msrb.mxu2 %v1955_v48 }
 0x667   :  { %2032 = vmatpush.msrb.mxu2 %v1953_v4 }
 0x669   :  { %2033 = vmatpush.msrb.mxu2 %v1951_v8 }
 0x66b   :  { %2034 = vmatpush.msrb.mxu2 %v1949_v26 }
 0x66c   :  { %2500 = vmatmul.msk.f32.gmra.mxu2 %vm428_vm0, %v552_v38 }
 0x674   :  { %2501 = vmatmul.msk.f32.gmra.mxu2 %vm428_vm0, %v553_v23 }
 0x67c   :  { %2502 = vmatmul.msk.f32.gmra.mxu2 %vm428_vm0, %v554_v2 }
 0x684   :  { %2503 = vmatmul.msk.f32.gmra.mxu2 %vm428_vm0, %v555_v11 }
 0x68c   :  { %2504 = vmatmul.msk.f32.gmra.mxu2 %vm428_vm0, %v556_v43 }
 0x694   :  { %2505 = vmatmul.msk.f32.gmra.mxu2 %vm428_vm0, %v557_v12 }
 0x69c   :  { %2522 = vmatmul.msk.f32.vlgmr.msrb.gmra.mxu2 %vm428_vm0, %v4176_v28 }
 0x6a4   :  { %2523 = vmatmul.msk.f32.gmra.mxu2 %vm428_vm0, %v4181_v41 }
 0x6ac   :  { %2524 = vmatmul.msk.f32.gmra.mxu2 %vm428_vm0, %v4188_v57 }
 0x6b4   :  { %2525 = vmatmul.msk.f32.gmra.mxu2 %vm428_vm0, %v4194_v49 }
 0x6bc   :  { %2526 = vmatmul.msk.f32.gmra.mxu2 %vm428_vm0, %v4203_v24 }
 0x6c4   :  { %2527 = vmatmul.msk.f32.gmra.mxu2 %vm428_vm0, %v4213_v10 }
 0x6cc   :  { %2528 = vmatmul.msk.f32.gmra.mxu2 %vm428_vm0, %v4221_v35 }
 0x6d4   :  { %2529 = vmatmul.msk.f32.gmra.mxu2 %vm428_vm0, %v4233_v58 }
 0x6df   :  { %v1732_v28 = vpop.f32.mrf.mxu2 }
 0x6e0   :  { %v1756_v41 = vmul.f32 0.125, %v1732_v28 }
 0x6e2   :  { %v1764_v57 = vsel %vm560_vm2, -1e+30, %v1756_v41 }
 0x6e3   :  { %v1772_v53 = vsel %vm1077_vm1, %v1764_v57, -inf }
 0x6e4   :  { %1773 = vmax.xlane.f32.xlu2 %v1772_v53 }
 0x6e7   :  { %v1735_v49 = vpop.f32.mrf.mxu2 }
 0x6e8   :  { %v1757_v5 = vmul.f32 0.125, %v1735_v49 }
 0x6ea   :  { %v1765_v24 = vsel %vm560_vm2, -1e+30, %v1757_v5 }
 0x6eb   :  { %v1775_v10 = vsel %vm1077_vm1, %v1765_v24, -inf }
 0x6ec   :  { %1776 = vmax.xlane.f32.xlu0 %v1775_v10 }
 0x6ef   :  { %v1738_v35 = vpop.f32.mrf.mxu2 }
 0x6f0   :  { %v1758_v42 = vmul.f32 0.125, %v1738_v35 }
 0x6f2   :  { %v1766_v58 = vsel %vm560_vm2, -1e+30, %v1758_v42 }
 0x6f3   :  { %v1778_v3 = vsel %vm1077_vm1, %v1766_v58, -inf }
 0x6f4   :  { %1779 = vmax.xlane.f32.xlu1 %v1778_v3 }
 0x6f7   :  { %v1741_v1 = vpop.f32.mrf.mxu2 }
 0x6f8   :  { %v1759_v18 = vmul.f32 0.125, %v1741_v1 }
 0x6fa   :  { %v1767_v0 = vsel %vm560_vm2, -1e+30, %v1759_v18 }
 0x6fb   :  { %v1781_v14 = vsel %vm1077_vm1, %v1767_v0, -inf }
 0x6fc   :  { %1388 = vperm.xlu2 %2729, %v1330_v22  }
 0x6ff   :  { %v1744_v32 = vpop.f32.mrf.mxu2 }
 0x700   :  { %1393 = vperm.xlu0 %2731, %v1331_v54   ;;  %v1760_v15 = vmul.f32 0.125, %v1744_v32 }
 0x702   :  { %v1768_v48 = vsel %vm560_vm2, -1e+30, %v1760_v15 }
 0x703   :  { %v1784_v47 = vsel %vm1077_vm1, %v1768_v48, -inf }
 0x707   :  { %v1747_v20 = vpop.f32.mrf.mxu2 }
 0x708   :  { %v1761_v27 = vmul.f32 0.125, %v1747_v20 }
 0x70a   :  { %v1769_v44 = vsel %vm560_vm2, -1e+30, %v1761_v27 }
 0x70b   :  { %v1787_v51 = vsel %vm1077_vm1, %v1769_v44, -inf }
 0x70c   :  { %1788 = vmax.xlane.f32.xlu1 %v1787_v51 }
 0x70f   :  { %v1750_v38 = vpop.f32.mrf.mxu2 }
 0x710   :  { %v1762_v25 = vmul.f32 0.125, %v1750_v38 }
 0x712   :  { %v4329_v34 = vsel %vm560_vm2, -1e+30, %v1762_v25 }
 0x713   :  { %v1790_v23 = vsel %vm1077_vm1, %v4329_v34, -inf }
 0x717   :  { %v1753_v50 = vpop.f32.mrf.mxu2 }
 0x718   :  { %v1763_v4 = vmul.f32 0.125, %v1753_v50 }
 0x71a   :  { %v1771_v6 = vsel %vm560_vm2, -1e+30, %v1763_v4 }
 0x725   :  { %1782 = vmax.xlane.f32.xlu2 %v1781_v14  ;;  %1378 = vperm.xlu1 %2730, %v3942_v61   ;;  %v1793_v61 = vsel %vm1077_vm1, %v1771_v6, -inf }
 0x72a   :  { %1791 = vmax.xlane.f32.xlu0 %v1790_v23 }
 0x72d   :  { %1785 = vmax.xlane.f32.xlu2 %v1784_v47 }
 0x732   :  { %1794 = vmax.xlane.f32.xlu0 %v1793_v61 }
 0x745   :  { %1383 = vperm.xlu2 %2729, %v1329_v62  }
 0x757   :  { %v1774_v8 = vpop.xlane.xlu2 %1773 }
 0x758   :  { %v1796_v26 = vsub.f32 %v1764_v57, %v1774_v8 }
 0x75a   :  { %v1804_v2 = vmul.f32 1.442695, %v1796_v26  ;;  %v2101_v26 = vpop.f32.mrf.mxu0 }
 0x75c   :  { %2766 = vpow2.f32 %v1804_v2 }
 0x75f   :  { %v1777_v45 = vpop.xlane.xlu0 %1776  ;;  %v1389_v28 = vpop.permute.xlu2 %1388 }
 0x760   :  { %v1797_v36 = vsub.f32 %v1765_v24, %v1777_v45  ;;  %v1464_v53 = vadd.f32 %v4103_v29, %v1389_v28 }
 0x762   :  { %v1806_v11 = vmul.f32 1.442695, %v1797_v36  ;;  %v4342_v39 = vpop.eup %2766  ;;  %v1529_v10 = vadd.f32 %v4112_v60, %v1464_v53 }
 0x763   :  { %v1820_v12 = vsel %vm1077_vm1, %v4342_v39, 0.0 }
 0x764   :  { %2768 = vpow2.f32 %v1806_v11  ;;  %v1556_v42 = vmax.f32 %v1529_v10, 0.0 }
 0x767   :  { %v1780_v40 = vpop.xlane.xlu1 %1779 }
 0x768   :  { %v1798_v21 = vsub.f32 %v1766_v58, %v1780_v40 }
 0x76a   :  { %v4344_v43 = vpop.eup %2768  ;;  %v1808_v33 = vmul.f32 1.442695, %v1798_v21 }
 0x76b   :  { %v1823_v17 = vsel %vm1077_vm1, %v4344_v43, 0.0 }
 0x76c   :  { %2770 = vpow2.f32 %v1808_v33  ;;  %1824 = vadd.xlane.f32.xlu0 %v1823_v17 }
 0x76e   :  { %1821 = vadd.xlane.f32.xlu2 %v1820_v12 }
 0x772   :  { %v4350_v41 = vpop.eup %2770  ;;  %v1394_v57 = vpop.permute.xlu0 %1393 }
 0x773   :  { %v1467_v49 = vadd.f32 %v4115_v16, %v1394_v57  ;;  %v1826_v5 = vsel %vm1077_vm1, %v4350_v41, 0.0 }
 0x774   :  { %1827 = vadd.xlane.f32.xlu1 %v1826_v5 }
 0x775   :  { %v1532_v24 = vadd.f32 %v4128_v30, %v1467_v49 }
 0x777   :  { %v1557_v35 = vmax.f32 %v1532_v24, 0.0 }
 0x779   :  { %2510 = vmatpush.xpose.msk.msra.mxu3 %vm1077_vm1, %v1557_v35 }
 0x77d   :  { %2511 = vmatpush.xpose.msk.msra.mxu3 %vm1077_vm1, %v1556_v42 }
 0x77f   :  { %v1789_v58 = vpop.xlane.xlu1 %1788 }
 0x780   :  { %v1801_v29 = vsub.f32 %v1769_v44, %v1789_v58 }
 0x782   :  { %v1814_v54 = vmul.f32 1.442695, %v1801_v29 }
 0x797   :  { %v1379_v38 = vpop.permute.xlu1 %1378 }
 0x798   :  { %v1783_v3 = vpop.xlane.xlu2 %1782  ;;  %v1458_v50 = vadd.f32 %v4085_v55, %v1379_v38 }
 0x799   :  { %v1799_v1 = vsub.f32 %v1767_v0, %v1783_v3 }
 0x79b   :  { %v1810_v22 = vmul.f32 1.442695, %v1799_v1 }
 0x79d   :  { %2772 = vpow2.f32 %v1810_v22  ;;  %v1792_v16 = vpop.xlane.xlu0 %1791 }
 0x79e   :  { %v1802_v30 = vsub.f32 %v4329_v34, %v1792_v16  ;;  %2774 = vpow2.f32 %v1814_v54 }
 0x7a0   :  { %v1786_v32 = vpop.xlane.xlu2 %1785  ;;  %v1816_v44 = vmul.f32 1.442695, %v1802_v30 }
 0x7a1   :  { %v1800_v20 = vsub.f32 %v1768_v48, %v1786_v32 }
 0x7a3   :  { %v4361_v27 = vpop.eup %2772  ;;  %v1812_v60 = vmul.f32 1.442695, %v1800_v20 }
 0x7a4   :  { %v1829_v51 = vsel %vm1077_vm1, %v4361_v27, 0.0  ;;  %v4365_v15 = vpop.eup %2774 }
 0x7a5   :  { %2776 = vpow2.f32 %v1812_v60  ;;  %1830 = vadd.xlane.f32.xlu2 %v1829_v51  ;;  %v1795_v18 = vpop.xlane.xlu0 %1794  ;;  %v1835_v47 = vsel %vm1077_vm1, %v4365_v15, 0.0 }
 0x7a6   :  { %v1803_v0 = vsub.f32 %v1771_v6, %v1795_v18  ;;  %2778 = vpow2.f32 %v1816_v44  ;;  %v1523_v6 = vadd.f32 %v4087_v46, %v1458_v50  ;;  %v2036_v46 = vpop.f32.mrf.mxu2 }
 0x7a8   :  { %v1818_v25 = vmul.f32 1.442695, %v1803_v0  ;;  %v1384_v14 = vpop.permute.xlu2 %1383  ;;  %v1554_v62 = vmax.f32 %v1523_v6, 0.0 }
 0x7a9   :  { %v1461_v34 = vadd.f32 %v4089_v13, %v1384_v14 }
 0x7aa   :  { %2780 = vpow2.f32 %v1818_v25 }
 0x7ab   :  { %v4369_v23 = vpop.eup %2776  ;;  %v1526_v48 = vadd.f32 %v4091_v56, %v1461_v34 }
 0x7ac   :  { %v1832_v4 = vsel %vm1077_vm1, %v4369_v23, 0.0  ;;  %v4378_v55 = vpop.eup %2778 }
 0x7ad   :  { %v1555_v61 = vmax.f32 %v1526_v48, 0.0  ;;  %1833 = vadd.xlane.f32.xlu0 %v1832_v4  ;;  %1836 = vadd.xlane.f32.xlu2 %v1835_v47  ;;  %v1838_v56 = vsel %vm1077_vm1, %v4378_v55, 0.0 }
 0x7ae   :  { %v2039_v2 = vpop.f32.mrf.mxu2 }
 0x7af   :  { %2512 = vmatpush.xpose.msk.msra.mxu3 %vm1077_vm1, %v1555_v61 }
 0x7b0   :  { %v4380_v13 = vpop.eup %2780 }
 0x7b1   :  { %v1841_v8 = vsel %vm1077_vm1, %v4380_v13, 0.0 }
 0x7b3   :  { %2513 = vmatpush.xpose.msk.msra.mxu3 %vm1077_vm1, %v1554_v62 }
 0x7b5   :  { %1839 = vadd.xlane.f32.xlu0 %v1838_v56  ;;  %1842 = vadd.xlane.f32.xlu2 %v1841_v8 }
 0x7b7   :  { %2610 = vmatpush.msrb.mxu3 %v4096_v19  ;;  %v1965_v19 = vld [vmem:[%s4733_s11] sm:$0x3] }
 0x7b8   :  { %v4398_v45 = vperm.slane %v1965_v19, 1 }
 0x7b9   :  { %2611 = vmatpush.msrb.mxu3 %v4101_v7  ;;  %v2104_v7 = vpop.f32.mrf.mxu0 }
 0x7ba   :  { %v2105_v11 = vadd.f32 %v2104_v7, %v4398_v45 }
 0x7bb   :  { %2612 = vmatpush.msrb.mxu3 %v4109_v63  ;;  %v4400_v63 = vperm.slane %v1965_v19, 0 }
 0x7bc   :  { %v2152_v33 = vmax.f32 %v2105_v11, 0.0 }
 0x7bd   :  { %2613 = vmatpush.msrb.mxu3 %v4120_v52  ;;  %v2102_v52 = vadd.f32 %v2101_v26, %v4398_v45  ;;  %v2040_v40 = vadd.f32 %v2039_v2, %v4400_v63 }
 0x7bf   :  { %2614 = vmatpush.msrb.mxu3 %v4126_v9  ;;  %v2037_v9 = vadd.f32 %v2036_v46, %v4400_v63  ;;  %v2151_v17 = vmax.f32 %v2040_v40, 0.0 }
 0x7c1   :  { %2615 = vmatpush.msrb.mxu3 %v4134_v37  ;;  %v2042_v37 = vpop.f32.mrf.mxu2  ;;  %v2149_v36 = vmax.f32 %v2037_v9, 0.0 }
 0x7c2   :  { %v2043_v5 = vadd.f32 %v2042_v37, %v4400_v63 }
 0x7c3   :  { %2616 = vmatpush.msrb.mxu3 %v4140_v59  ;;  %v2150_v59 = vmax.f32 %v2102_v52, 0.0 }
 0x7c4   :  { %v2153_v35 = vmax.f32 %v2043_v5, 0.0 }
 0x7c5   :  { %2617 = vmatpush.msrb.mxu3 %v4148_v31  ;;  %v2107_v31 = vpop.f32.mrf.mxu0 }
 0x7c6   :  { %v2108_v49 = vadd.f32 %v2107_v31, %v4398_v45 }
 0x7c8   :  { %v2154_v10 = vmax.f32 %v2108_v49, 0.0 }
 0x7c9   :  { %v2045_v12 = vpop.f32.mrf.mxu2 }
 0x7ca   :  { %v2046_v29 = vadd.f32 %v2045_v12, %v4400_v63 }
 0x7cc   :  { %v2155_v54 = vmax.f32 %v2046_v29, 0.0 }
 0x7cd   :  { %v2110_v57 = vpop.f32.mrf.mxu0 }
 0x7ce   :  { %v2111_v1 = vadd.f32 %v2110_v57, %v4398_v45 }
 0x7d1   :  { %v2048_v3 = vpop.f32.mrf.mxu2 }
 0x7d2   :  { %v2049_v30 = vadd.f32 %v2048_v3, %v4400_v63 }
 0x7d4   :  { %v2157_v44 = vmax.f32 %v2049_v30, 0.0 }
 0x7d5   :  { %v2113_v22 = vpop.f32.mrf.mxu0 }
 0x7d6   :  { %v2114_v20 = vadd.f32 %v2113_v22, %v4398_v45 }
 0x7d8   :  { %v2158_v38 = vmax.f32 %v2114_v20, 0.0 }
 0x7d9   :  { %v2051_v60 = vpop.f32.mrf.mxu2 }
 0x7da   :  { %v2052_v0 = vadd.f32 %v2051_v60, %v4400_v63 }
 0x7dc   :  { %v2159_v50 = vmax.f32 %v2052_v0, 0.0 }
 0x7dd   :  { %v2116_v18 = vpop.f32.mrf.mxu0 }
 0x7de   :  { %2181 = vxpose.xlu0.b32.start [1/8] (short) %v2149_v36, 128  ;;  %2213 = vxpose.xlu2.b32.start [1/8] (short) %v2150_v59, 128 }
 0x7df   :  { %v1825_v28 = vpop.xlane.xlu0 %1824 }
 0x7e1   :  { %v1822_v21 = vpop.xlane.xlu2 %1821  ;;  %v2054_v25 = vpop.f32.mrf.mxu2 }
 0x7e2   :  { %2782 = vrcp.f32 %v1822_v21 }
 0x7e3   :  { %2784 = vrcp.f32 %v1825_v28 }
 0x7e5   :  { %v2119_v34 = vpop.f32.mrf.mxu0 }
 0x7e6   :  { %2182 = vxpose.xlu0.b32.cont [2/8] (short) %v2151_v17, 128  ;;  %2214 = vxpose.xlu2.b32.cont [2/8] (short) %v2152_v33, 128  ;;  %v2120_v48 = vadd.f32 %v2119_v34, %v4398_v45 }
 0x7e7   :  { %v1828_v42 = vpop.xlane.xlu1 %1827 }
 0x7e8   :  { %v2783_v53 = vpop.eup %2782  ;;  %2786 = vrcp.f32 %v1828_v42  ;;  %v2162_v4 = vmax.f32 %v2120_v48, 0.0 }
 0x7e9   :  { %v1852_v24 = vmul.f32 %v2783_v53, %v4342_v39  ;;  %v2785_v58 = vpop.eup %2784  ;;  %v2156_v39 = vmax.f32 %v2111_v1, 0.0  ;;  %v2057_v61 = vpop.f32.mrf.mxu2 }
 0x7ea   :  { %v1853_v16 = vmul.f32 %v2785_v58, %v4344_v43  ;;  %v2117_v43 = vadd.f32 %v2116_v18, %v4398_v45  ;;  %v2058_v56 = vadd.f32 %v2057_v61, %v4400_v63 }
 0x7eb   :  { %2514 = vmatmul.msk.f32.vlgmr.msra.gmra.mxu3 %vm1077_vm1, %v1852_v24 }
 0x7ec   :  { %v2160_v14 = vmax.f32 %v2117_v43, 0.0  ;;  %v2163_v46 = vmax.f32 %v2058_v56, 0.0 }
 0x7ed   :  { %v2122_v6 = vpop.f32.mrf.mxu0 }
 0x7ee   :  { %2183 = vxpose.xlu0.b32.cont [3/8] (short) %v2153_v35, 128  ;;  %2215 = vxpose.xlu2.b32.cont [3/8] (short) %v2154_v10, 128  ;;  %v2787_v32 = vpop.eup %2786  ;;  %v2123_v62 = vadd.f32 %v2122_v6, %v4398_v45 }
 0x7ef   :  { %v1854_v51 = vmul.f32 %v2787_v32, %v4350_v41  ;;  %v2055_v41 = vadd.f32 %v2054_v25, %v4400_v63 }
 0x7f0   :  { %v2164_v8 = vmax.f32 %v2123_v62, 0.0 }
 0x7f1   :  { %v2161_v47 = vmax.f32 %v2055_v41, 0.0 }
 0x7f3   :  { %2515 = vmatmul.msk.f32.gmra.mxu3 %vm1077_vm1, %v1853_v16 }
 0x7f6   :  { %2184 = vxpose.xlu0.b32.cont [4/8] (short) %v2155_v54, 128  ;;  %2216 = vxpose.xlu2.b32.cont [4/8] (short) %v2156_v39, 128 }
 0x7fb   :  { %2516 = vmatmul.msk.f32.gmra.mxu3 %vm1077_vm1, %v1854_v51 }
 0x7fe   :  { %2185 = vxpose.xlu0.b32.cont [5/8] (short) %v2157_v44, 128  ;;  %2217 = vxpose.xlu2.b32.cont [5/8] (short) %v2158_v38, 128 }
 0x806   :  { %2186 = vxpose.xlu0.b32.cont [6/8] (short) %v2159_v50, 128  ;;  %2218 = vxpose.xlu2.b32.cont [6/8] (short) %v2160_v14, 128 }
 0x80e   :  { %2187 = vxpose.xlu0.b32.cont [7/8] (short) %v2161_v47, 128  ;;  %2219 = vxpose.xlu2.b32.cont [7/8] (short) %v2162_v4, 128 }
 0x816   :  { %2188 = vxpose.xlu0.b32.end [8/8] (short) %v2163_v46, 128  ;;  %2220 = vxpose.xlu2.b32.end [8/8] (short) %v2164_v8, 128 }
 0x818   :  { %v1831_v26 = vpop.xlane.xlu2 %1830 }
 0x819   :  { %2788 = vrcp.f32 %v1831_v26 }
 0x81f   :  { %v2789_v19 = vpop.eup %2788 }
 0x820   :  { %v1834_v2 = vpop.xlane.xlu0 %1833  ;;  %v1855_v7 = vmul.f32 %v2789_v19, %v4361_v27  ;;  %v1837_v52 = vpop.xlane.xlu2 %1836 }
 0x821   :  { %2790 = vrcp.f32 %v1834_v2 }
 0x822   :  { %2517 = vmatmul.msk.f32.gmra.mxu3 %vm1077_vm1, %v1855_v7  ;;  %2792 = vrcp.f32 %v1837_v52 }
 0x827   :  { %v2791_v9 = vpop.eup %2790 }
 0x828   :  { %v1856_v37 = vmul.f32 %v2791_v9, %v4369_v23  ;;  %v1840_v59 = vpop.xlane.xlu0 %1839  ;;  %v2793_v36 = vpop.eup %2792 }
 0x829   :  { %2794 = vrcp.f32 %v1840_v59  ;;  %v1857_v31 = vmul.f32 %v2793_v36, %v4365_v15  ;;  %v1843_v11 = vpop.xlane.xlu2 %1842 }
 0x82a   :  { %2518 = vmatmul.msk.f32.gmra.mxu3 %vm1077_vm1, %v1856_v37  ;;  %2796 = vrcp.f32 %v1843_v11 }
 0x82f   :  { %v2795_v40 = vpop.eup %2794 }
 0x830   :  { %v1858_v27 = vmul.f32 %v2795_v40, %v4378_v55  ;;  %v2797_v21 = vpop.eup %2796 }
 0x831   :  { %v1859_v33 = vmul.f32 %v2797_v21, %v4380_v13 }
 0x832   :  { %2519 = vmatmul.msk.f32.gmra.mxu3 %vm1077_vm1, %v1857_v31 }
 0x83a   :  { %2520 = vmatmul.msk.f32.gmra.mxu3 %vm1077_vm1, %v1858_v27 }
 0x842   :  { %2521 = vmatmul.msk.f32.gmra.mxu3 %vm1077_vm1, %v1859_v33 }
 0x86e   :  { %v1925_v23 = vpop.f32.mrf.mxu3 }
 0x86f   :  { %2530 = vmatmul.msk.f32.gmra.mxu2 %vm428_vm0, %v1925_v23  ;;  %2546 = vmatmul.msk.f32.gmra.mxu0 %vm428_vm0, %v1925_v23 }
 0x876   :  { %v1928_v15 = vpop.f32.mrf.mxu3 }
 0x877   :  { %2531 = vmatmul.msk.f32.gmra.mxu2 %vm428_vm0, %v1928_v15  ;;  %2547 = vmatmul.msk.f32.gmra.mxu0 %vm428_vm0, %v1928_v15 }
 0x87e   :  { %v1931_v17 = vpop.f32.mrf.mxu3 }
 0x87f   :  { %2532 = vmatmul.msk.f32.gmra.mxu2 %vm428_vm0, %v1931_v17  ;;  %2548 = vmatmul.msk.f32.gmra.mxu0 %vm428_vm0, %v1931_v17 }
 0x882   :  { %v2197_v60 = vpop.trf.xlu0 }
 0x883   :  { %2245 = vst.msk [vmem:[%s4734_s12] sm:$0xff] %vm428_vm0, %v2197_v60 }
 0x88a   :  { %v2198_v18 = vpop.trf.xlu0 }
 0x88b   :  { %2246 = vst.msk [vmem:[%s4734_s12 + $0x8] sm:$0xff] %vm428_vm0, %v2198_v18 }
 0x892   :  { %v2199_v14 = vpop.trf.xlu0 }
 0x893   :  { %2247 = vst.msk [vmem:[%s4734_s12 + $0x10] sm:$0xff] %vm428_vm0, %v2199_v14 }
 0x89a   :  { %v2200_v6 = vpop.trf.xlu0 }
 0x89b   :  { %2248 = vst.msk [vmem:[%s4734_s12 + $0x18] sm:$0xff] %vm428_vm0, %v2200_v6 }
 0x8a2   :  { %v2201_v19 = vpop.trf.xlu0 }
 0x8a3   :  { %2249 = vst.msk [vmem:[%s4734_s12 + $0x20] sm:$0xff] %vm428_vm0, %v2201_v19 }
 0x8a5   :  { %v1934_v55 = vpop.f32.mrf.mxu3 }
 0x8a6   :  { %2533 = vmatmul.msk.f32.gmra.mxu2 %vm428_vm0, %v1934_v55  ;;  %2549 = vmatmul.msk.f32.gmra.mxu0 %vm428_vm0, %v1934_v55 }
 0x8aa   :  { %v2202_v59 = vpop.trf.xlu0 }
 0x8ab   :  { %2250 = vst.msk [vmem:[%s4734_s12 + $0x28] sm:$0xff] %vm428_vm0, %v2202_v59 }
 0x8ad   :  { %v1937_v13 = vpop.f32.mrf.mxu3 }
 0x8ae   :  { %2534 = vmatmul.msk.f32.gmra.mxu2 %vm428_vm0, %v1937_v13  ;;  %2550 = vmatmul.msk.f32.gmra.mxu0 %vm428_vm0, %v1937_v13  ;;  %v2229_v13 = vpop.trf.xlu2 }
 0x8af   :  { %2261 = vst.msk [vmem:[%s4734_s12 + $0x80] sm:$0xff] %vm428_vm0, %v2229_v13 }
 0x8b2   :  { %v2203_v21 = vpop.trf.xlu0 }
 0x8b3   :  { %2251 = vst.msk [vmem:[%s4734_s12 + $0x30] sm:$0xff] %vm428_vm0, %v2203_v21 }
 0x8b5   :  { %v1940_v12 = vpop.f32.mrf.mxu3 }
 0x8b6   :  { %2535 = vmatmul.msk.f32.gmra.mxu2 %vm428_vm0, %v1940_v12  ;;  %2551 = vmatmul.msk.f32.gmra.mxu0 %vm428_vm0, %v1940_v12 }
 0x8ba   :  { %v2204_v15 = vpop.trf.xlu0 }
 0x8bb   :  { %2252 = vst.msk [vmem:[%s4734_s12 + $0x38] sm:$0xff] %vm428_vm0, %v2204_v15 }
 0x8bd   :  { %v1943_v28 = vpop.f32.mrf.mxu3 }
 0x8be   :  { %2536 = vmatmul.msk.f32.gmra.mxu2 %vm428_vm0, %v1943_v28  ;;  %2552 = vmatmul.msk.f32.gmra.mxu0 %vm428_vm0, %v1943_v28 }
 0x8c2   :  { %v2205_v17 = vpop.trf.xlu0 }
 0x8c3   :  { %2253 = vst.msk [vmem:[%s4734_s12 + $0x40] sm:$0xff] %vm428_vm0, %v2205_v17 }
 0x8c5   :  { %v1946_v57 = vpop.f32.mrf.mxu3 }
 0x8c6   :  { %2537 = vmatmul.msk.f32.gmra.mxu2 %vm428_vm0, %v1946_v57  ;;  %2553 = vmatmul.msk.f32.vlgmr.msrb.gmra.mxu3 %vm428_vm0, %v1946_v57 }
 0x8ec   :  { %v2125_v53 = vpop.f32.mrf.mxu0 }
 0x8ed   :  { %v2126_v49 = vadd.f32 %v2125_v53, %v4398_v45 }
 0x8ef   :  { %v2166_v5 = vmax.f32 %v2126_v49, 0.0  ;;  %v2230_v49 = vpop.trf.xlu2 }
 0x8f0   :  { %2262 = vst.msk [vmem:[%s4734_s12 + $0x88] sm:$0xff] %vm428_vm0, %v2230_v49 }
 0x8f1   :  { %2309 = vxpose.xlu0.b32.start [1/8] (short) %v2166_v5, 128 }
 0x8f2   :  { %v2060_v24 = vpop.f32.mrf.mxu2 }
 0x8f3   :  { %v2061_v10 = vadd.f32 %v2060_v24, %v4400_v63 }
 0x8f4   :  { %v2128_v35 = vpop.f32.mrf.mxu0 }
 0x8f5   :  { %v2165_v42 = vmax.f32 %v2061_v10, 0.0  ;;  %v2129_v58 = vadd.f32 %v2128_v35, %v4398_v45 }
 0x8f7   :  { %v2168_v3 = vmax.f32 %v2129_v58, 0.0  ;;  %2277 = vxpose.xlu1.b32.start [1/8] (short) %v2165_v42, 128  ;;  %v2231_v5 = vpop.trf.xlu2 }
 0x8f8   :  { %2263 = vst.msk [vmem:[%s4734_s12 + $0x90] sm:$0xff] %vm428_vm0, %v2231_v5 }
 0x8f9   :  { %2310 = vxpose.xlu0.b32.cont [2/8] (short) %v2168_v3, 128 }
 0x8fa   :  { %v2063_v1 = vpop.f32.mrf.mxu2 }
 0x8fb   :  { %v2064_v29 = vadd.f32 %v2063_v1, %v4400_v63 }
 0x8fc   :  { %v2131_v22 = vpop.f32.mrf.mxu0 }
 0x8fd   :  { %v2167_v16 = vmax.f32 %v2064_v29, 0.0  ;;  %v2132_v39 = vadd.f32 %v2131_v22, %v4398_v45 }
 0x8ff   :  { %v2170_v54 = vmax.f32 %v2132_v39, 0.0  ;;  %2278 = vxpose.xlu1.b32.cont [2/8] (short) %v2167_v16, 128  ;;  %v2232_v24 = vpop.trf.xlu2 }
 0x900   :  { %2264 = vst.msk [vmem:[%s4734_s12 + $0x98] sm:$0xff] %vm428_vm0, %v2232_v24 }
 0x901   :  { %2311 = vxpose.xlu0.b32.cont [3/8] (short) %v2170_v54, 128 }
 0x902   :  { %v2066_v32 = vpop.f32.mrf.mxu2 }
 0x903   :  { %v2067_v20 = vadd.f32 %v2066_v32, %v4400_v63 }
 0x905   :  { %v2169_v30 = vmax.f32 %v2067_v20, 0.0 }
 0x907   :  { %2279 = vxpose.xlu1.b32.cont [3/8] (short) %v2169_v30, 128  ;;  %v2233_v10 = vpop.trf.xlu2 }
 0x908   :  { %2265 = vst.msk [vmem:[%s4734_s12 + $0xa0] sm:$0xff] %vm428_vm0, %v2233_v10 }
 0x90f   :  { %v2234_v58 = vpop.trf.xlu2 }
 0x910   :  { %2266 = vst.msk [vmem:[%s4734_s12 + $0xa8] sm:$0xff] %vm428_vm0, %v2234_v58 }
 0x917   :  { %v2235_v29 = vpop.trf.xlu2 }
 0x918   :  { %2267 = vst.msk [vmem:[%s4734_s12 + $0xb0] sm:$0xff] %vm428_vm0, %v2235_v29 }
 0x91f   :  { %v2236_v39 = vpop.trf.xlu2 }
 0x920   :  { %2268 = vst.msk [vmem:[%s4734_s12 + $0xb8] sm:$0xff] %vm428_vm0, %v2236_v39 }
 0x923   :  { %v2134_v51 = vpop.f32.mrf.mxu0 }
 0x924   :  { %v2135_v38 = vadd.f32 %v2134_v51, %v4398_v45 }
 0x926   :  { %v2172_v44 = vmax.f32 %v2135_v38, 0.0 }
 0x927   :  { %v2237_v20 = vpop.trf.xlu2 }
 0x928   :  { %2312 = vxpose.xlu0.b32.cont [4/8] (short) %v2172_v44, 128  ;;  %2269 = vst.msk [vmem:[%s4734_s12 + $0xc0] sm:$0xff] %vm428_vm0, %v2237_v20 }
 0x929   :  { %v2069_v43 = vpop.f32.mrf.mxu2 }
 0x92a   :  { %v2070_v0 = vadd.f32 %v2069_v43, %v4400_v63 }
 0x92b   :  { %v2137_v25 = vpop.f32.mrf.mxu0 }
 0x92c   :  { %v2171_v50 = vmax.f32 %v2070_v0, 0.0  ;;  %v2138_v34 = vadd.f32 %v2137_v25, %v4398_v45 }
 0x92e   :  { %v2174_v48 = vmax.f32 %v2138_v34, 0.0  ;;  %2280 = vxpose.xlu1.b32.cont [4/8] (short) %v2171_v50, 128 }
 0x92f   :  { %v2238_v51 = vpop.trf.xlu2 }
 0x930   :  { %2313 = vxpose.xlu0.b32.cont [5/8] (short) %v2174_v48, 128  ;;  %2270 = vst.msk [vmem:[%s4734_s12 + $0xc8] sm:$0xff] %vm428_vm0, %v2238_v51 }
 0x931   :  { %v2072_v41 = vpop.f32.mrf.mxu2 }
 0x932   :  { %v2073_v4 = vadd.f32 %v2072_v41, %v4400_v63 }
 0x933   :  { %v2140_v47 = vpop.f32.mrf.mxu0 }
 0x934   :  { %v2173_v61 = vmax.f32 %v2073_v4, 0.0  ;;  %v2141_v62 = vadd.f32 %v2140_v47, %v4398_v45 }
 0x936   :  { %v2176_v56 = vmax.f32 %v2141_v62, 0.0  ;;  %2281 = vxpose.xlu1.b32.cont [5/8] (short) %v2173_v61, 128 }
 0x937   :  { %v2239_v44 = vpop.trf.xlu2 }
 0x938   :  { %2314 = vxpose.xlu0.b32.cont [6/8] (short) %v2176_v56, 128  ;;  %2271 = vst.msk [vmem:[%s4734_s12 + $0xd0] sm:$0xff] %vm428_vm0, %v2239_v44 }
 0x939   :  { %v2075_v8 = vpop.f32.mrf.mxu2 }
 0x93a   :  { %v2076_v46 = vadd.f32 %v2075_v8, %v4400_v63 }
 0x93b   :  { %v2143_v26 = vpop.f32.mrf.mxu0 }
 0x93c   :  { %v2175_v2 = vmax.f32 %v2076_v46, 0.0  ;;  %v2144_v7 = vadd.f32 %v2143_v26, %v4398_v45 }
 0x93e   :  { %v2178_v52 = vmax.f32 %v2144_v7, 0.0  ;;  %2282 = vxpose.xlu1.b32.cont [6/8] (short) %v2175_v2, 128 }
 0x93f   :  { %v2240_v25 = vpop.trf.xlu2 }
 0x940   :  { %2315 = vxpose.xlu0.b32.cont [7/8] (short) %v2178_v52, 128  ;;  %2272 = vst.msk [vmem:[%s4734_s12 + $0xd8] sm:$0xff] %vm428_vm0, %v2240_v25 }
 0x941   :  { %v2078_v9 = vpop.f32.mrf.mxu2 }
 0x942   :  { %v2079_v37 = vadd.f32 %v2078_v9, %v4400_v63 }
 0x944   :  { %v2177_v36 = vmax.f32 %v2079_v37, 0.0 }
 0x946   :  { %2283 = vxpose.xlu1.b32.cont [7/8] (short) %v2177_v36, 128 }
 0x947   :  { %v2241_v34 = vpop.trf.xlu2 }
 0x948   :  { %2273 = vst.msk [vmem:[%s4734_s12 + $0xe0] sm:$0xff] %vm428_vm0, %v2241_v34 }
 0x949   :  { %v2081_v31 = vpop.f32.mrf.mxu2  ;;  %v2146_v11 = vpop.f32.mrf.mxu3 }
 0x94a   :  { %v2082_v40 = vadd.f32 %v2081_v31, %v4400_v63  ;;  %v2147_v27 = vadd.f32 %v2146_v11, %v4398_v45  ;;  %v2206_v45 = vpop.trf.xlu0 }
 0x94b   :  { %2254 = vst.msk [vmem:[%s4734_s12 + $0x48] sm:$0xff] %vm428_vm0, %v2206_v45 }
 0x94c   :  { %v2179_v33 = vmax.f32 %v2082_v40, 0.0  ;;  %v2180_v23 = vmax.f32 %v2147_v27, 0.0 }
 0x94e   :  { %2316 = vxpose.xlu0.b32.end [8/8] (short) %v2180_v23, 128  ;;  %2284 = vxpose.xlu1.b32.end [8/8] (short) %v2179_v33, 128 }
 0x94f   :  { %v2242_v4 = vpop.trf.xlu2 }
 0x950   :  { %2274 = vst.msk [vmem:[%s4734_s12 + $0xe8] sm:$0xff] %vm428_vm0, %v2242_v4 }
 0x952   :  { %v2207_v63 = vpop.trf.xlu0 }
 0x953   :  { %2255 = vst.msk [vmem:[%s4734_s12 + $0x50] sm:$0xff] %vm428_vm0, %v2207_v63 }
 0x957   :  { %v2243_v61 = vpop.trf.xlu2 }
 0x958   :  { %2275 = vst.msk [vmem:[%s4734_s12 + $0xf0] sm:$0xff] %vm428_vm0, %v2243_v61 }
 0x95a   :  { %v2208_v55 = vpop.trf.xlu0 }
 0x95b   :  { %2256 = vst.msk [vmem:[%s4734_s12 + $0x58] sm:$0xff] %vm428_vm0, %v2208_v55 }
 0x95f   :  { %v2244_v8 = vpop.trf.xlu2 }
 0x960   :  { %2276 = vst.msk [vmem:[%s4734_s12 + $0xf8] sm:$0xff] %vm428_vm0, %v2244_v8 }
 0x962   :  { %v2209_v12 = vpop.trf.xlu0 }
 0x963   :  { %2257 = vst.msk [vmem:[%s4734_s12 + $0x60] sm:$0xff] %vm428_vm0, %v2209_v12 }
 0x96a   :  { %v2210_v28 = vpop.trf.xlu0 }
 0x96b   :  { %2258 = vst.msk [vmem:[%s4734_s12 + $0x68] sm:$0xff] %vm428_vm0, %v2210_v28 }
 0x972   :  { %v2211_v57 = vpop.trf.xlu0 }
 0x973   :  { %2259 = vst.msk [vmem:[%s4734_s12 + $0x70] sm:$0xff] %vm428_vm0, %v2211_v57 }
 0x97a   :  { %v2212_v53 = vpop.trf.xlu0 }
 0x97b   :  { %2260 = vst.msk [vmem:[%s4734_s12 + $0x78] sm:$0xff] %vm428_vm0, %v2212_v53 }
 0x9ba   :  { %v2325_v35 = vpop.trf.xlu0  ;;  %v2293_v42 = vpop.trf.xlu1 }
 0x9bb   :  { %2570 = vst.msk [vmem:[%s4734_s12 + $0x180] sm:$0xff] %vm428_vm0, %v2325_v35 }
 0x9bc   :  { %2554 = vst.msk [vmem:[%s4734_s12 + $0x100] sm:$0xff] %vm428_vm0, %v2293_v42 }
 0x9c2   :  { %v2326_v3 = vpop.trf.xlu0  ;;  %v2294_v1 = vpop.trf.xlu1 }
 0x9c3   :  { %2571 = vst.msk [vmem:[%s4734_s12 + $0x188] sm:$0xff] %vm428_vm0, %v2326_v3 }
 0x9c4   :  { %2555 = vst.msk [vmem:[%s4734_s12 + $0x108] sm:$0xff] %vm428_vm0, %v2294_v1 }
 0x9ca   :  { %v2327_v22 = vpop.trf.xlu0  ;;  %v2295_v16 = vpop.trf.xlu1 }
 0x9cb   :  { %2572 = vst.msk [vmem:[%s4734_s12 + $0x190] sm:$0xff] %vm428_vm0, %v2327_v22 }
 0x9cc   :  { %2556 = vst.msk [vmem:[%s4734_s12 + $0x110] sm:$0xff] %vm428_vm0, %v2295_v16 }
 0x9d2   :  { %v2328_v54 = vpop.trf.xlu0  ;;  %v2296_v32 = vpop.trf.xlu1 }
 0x9d3   :  { %2573 = vst.msk [vmem:[%s4734_s12 + $0x198] sm:$0xff] %vm428_vm0, %v2328_v54 }
 0x9d4   :  { %2557 = vst.msk [vmem:[%s4734_s12 + $0x118] sm:$0xff] %vm428_vm0, %v2296_v32 }
 0x9da   :  { %v2329_v30 = vpop.trf.xlu0  ;;  %v2297_v60 = vpop.trf.xlu1 }
 0x9db   :  { %2574 = vst.msk [vmem:[%s4734_s12 + $0x1a0] sm:$0xff] %vm428_vm0, %v2329_v30 }
 0x9dc   :  { %2558 = vst.msk [vmem:[%s4734_s12 + $0x120] sm:$0xff] %vm428_vm0, %v2297_v60 }
 0x9e2   :  { %v2330_v18 = vpop.trf.xlu0  ;;  %v2298_v38 = vpop.trf.xlu1 }
 0x9e3   :  { %2575 = vst.msk [vmem:[%s4734_s12 + $0x1a8] sm:$0xff] %vm428_vm0, %v2330_v18 }
 0x9e4   :  { %2559 = vst.msk [vmem:[%s4734_s12 + $0x128] sm:$0xff] %vm428_vm0, %v2298_v38 }
 0x9ea   :  { %v2331_v43 = vpop.trf.xlu0  ;;  %v2299_v0 = vpop.trf.xlu1 }
 0x9eb   :  { %2576 = vst.msk [vmem:[%s4734_s12 + $0x1b0] sm:$0xff] %vm428_vm0, %v2331_v43 }
 0x9ec   :  { %2560 = vst.msk [vmem:[%s4734_s12 + $0x130] sm:$0xff] %vm428_vm0, %v2299_v0 }
 0x9f2   :  { %v2332_v14 = vpop.trf.xlu0  ;;  %v2300_v50 = vpop.trf.xlu1 }
 0x9f3   :  { %2577 = vst.msk [vmem:[%s4734_s12 + $0x1b8] sm:$0xff] %vm428_vm0, %v2332_v14 }
 0x9f4   :  { %2561 = vst.msk [vmem:[%s4734_s12 + $0x138] sm:$0xff] %vm428_vm0, %v2300_v50 }
 0x9fa   :  { %v2333_v48 = vpop.trf.xlu0  ;;  %v2301_v41 = vpop.trf.xlu1 }
 0x9fb   :  { %2578 = vst.msk [vmem:[%s4734_s12 + $0x1c0] sm:$0xff] %vm428_vm0, %v2333_v48 }
 0x9fc   :  { %2562 = vst.msk [vmem:[%s4734_s12 + $0x140] sm:$0xff] %vm428_vm0, %v2301_v41 }
 0xa02   :  { %v2334_v47 = vpop.trf.xlu0  ;;  %v2302_v6 = vpop.trf.xlu1 }
 0xa03   :  { %2579 = vst.msk [vmem:[%s4734_s12 + $0x1c8] sm:$0xff] %vm428_vm0, %v2334_v47 }
 0xa04   :  { %2563 = vst.msk [vmem:[%s4734_s12 + $0x148] sm:$0xff] %vm428_vm0, %v2302_v6 }
 0xa0a   :  { %v2335_v62 = vpop.trf.xlu0  ;;  %v2303_v56 = vpop.trf.xlu1 }
 0xa0b   :  { %2580 = vst.msk [vmem:[%s4734_s12 + $0x1d0] sm:$0xff] %vm428_vm0, %v2335_v62 }
 0xa0c   :  { %2564 = vst.msk [vmem:[%s4734_s12 + $0x150] sm:$0xff] %vm428_vm0, %v2303_v56 }
 0xa12   :  { %v2336_v46 = vpop.trf.xlu0  ;;  %v2304_v26 = vpop.trf.xlu1 }
 0xa13   :  { %2581 = vst.msk [vmem:[%s4734_s12 + $0x1d8] sm:$0xff] %vm428_vm0, %v2336_v46 }
 0xa14   :  { %2565 = vst.msk [vmem:[%s4734_s12 + $0x158] sm:$0xff] %vm428_vm0, %v2304_v26 }
 0xa1a   :  { %v2337_v19 = vpop.trf.xlu0  ;;  %v2305_v2 = vpop.trf.xlu1 }
 0xa1b   :  { %2582 = vst.msk [vmem:[%s4734_s12 + $0x1e0] sm:$0xff] %vm428_vm0, %v2337_v19 }
 0xa1c   :  { %2566 = vst.msk [vmem:[%s4734_s12 + $0x160] sm:$0xff] %vm428_vm0, %v2305_v2 }
 0xa22   :  { %v2338_v7 = vpop.trf.xlu0  ;;  %v2306_v52 = vpop.trf.xlu1 }
 0xa23   :  { %2583 = vst.msk [vmem:[%s4734_s12 + $0x1e8] sm:$0xff] %vm428_vm0, %v2338_v7 }
 0xa24   :  { %2567 = vst.msk [vmem:[%s4734_s12 + $0x168] sm:$0xff] %vm428_vm0, %v2306_v52 }
 0xa2a   :  { %v2339_v9 = vpop.trf.xlu0  ;;  %v2307_v37 = vpop.trf.xlu1 }
 0xa2b   :  { %2584 = vst.msk [vmem:[%s4734_s12 + $0x1f0] sm:$0xff] %vm428_vm0, %v2339_v9 }
 0xa2c   :  { %2568 = vst.msk [vmem:[%s4734_s12 + $0x170] sm:$0xff] %vm428_vm0, %v2307_v37 }
 0xa32   :  { %v2340_v59 = vpop.trf.xlu0  ;;  %v2308_v36 = vpop.trf.xlu1 }
 0xa33   :  { %2585 = vst.msk [vmem:[%s4734_s12 + $0x1f8] sm:$0xff] %vm428_vm0, %v2340_v59 }
 0xa34   :  { %2569 = vst.msk [vmem:[%s4734_s12 + $0x178] sm:$0xff] %vm428_vm0, %v2308_v36 }

</bundles_post_ra>
